<compile_context>
chip_gen: v6e
topology: v6e:2x2x1
jax: 0.10.0
libtpu: 0.0.40
codegen_flags: <defaults>
</compile_context>

<pallas_src>
import numpy as np

import jax
import jax.numpy as jnp
from jax.experimental import pallas as pl
from jax.experimental.pallas import tpu as pltpu

# ----------------------------- small config ---------------------------------
N_BATCH = 2          # batch
T_AUDIO = 32         # raw audio/spectrogram time frames
FREQ = 16            # spectrogram frequency bins
TIME_STEPS = 16      # pose time steps (UNet length)
CHANNELS = 32        # in_channels = input_channels = output_channels
OUT_FEATS = 24       # pose feature dimension
MAX_DEPTH = 3        # UNet depth (small-shape equivalent of the default 5)

NEG_SLOPE = 0.2      # LeakyReLU(negative_slope=0.2) of ConvNormRelu(leaky=True)
BN_EPS = 1e-5

WDT = jnp.bfloat16   # matmul operand dtype (MXU native)
ADT = jnp.float32    # accumulation / shift dtype
LANES = 128          # lane width of the packed weight / shift slabs (= padded output lanes)

H_ENC = T_AUDIO // 8                                     # audio encoder height after 3 stride-2 convs

# row-space constant pack layout (all constants are batch-interleaved via kron(., I_N))
SEL_ROW, SEL_SHAPE = 0, (N_BATCH * T_AUDIO // 2, N_BATCH * T_AUDIO)          # even-row decimation
UP_ROW, UP_SHAPE = SEL_SHAPE[0], (N_BATCH * TIME_STEPS, N_BATCH * TIME_STEPS // 2)  # nearest x2
RH_ROW, RH_SHAPE = SEL_SHAPE[0] + UP_SHAPE[0], (N_BATCH * TIME_STEPS, N_BATCH * H_ENC)  # bilinear t-resize
CONST_ROWS = RH_ROW + RH_SHAPE[0]
CONST_COLS = SEL_SHAPE[1]


# ----------------------------- static layer plans ----------------------------
def _audio_specs():
    """7 ConvNormRelu-2d blocks; downsample (k=4, s=2) at layers 1, 3, 5."""
    chs = [1, CHANNELS // 4, CHANNELS // 4, CHANNELS // 2, CHANNELS // 2,
           CHANNELS, CHANNELS, CHANNELS]
    specs = []
    h, w = T_AUDIO, FREQ
    for li in range(7):
        k, s = (4, 2) if li in (1, 3, 5) else (3, 1)
        ho, wo = h // s, w // s                    # padding = 1 keeps / halves the size
        specs.append(dict(k=k, s=s, h_in=h, w_in=w, c_in=chs[li],
                          h_out=ho, w_out=wo, c_out=chs[li + 1]))
        h, w = ho, wo
    return specs


def _unet_specs():
    """pre(2) -> conv_p(MAX_DEPTH, stride 2) -> conv_up(MAX_DEPTH) -> decoder(4)."""
    c = CHANNELS
    specs = []
    l = TIME_STEPS
    for _ in range(2):
        specs.append(dict(tag="pre", k=3, s=1, l_in=l, l_out=l, c_in=c, c_out=c))
    for _ in range(MAX_DEPTH):
        specs.append(dict(tag="down", k=4, s=2, l_in=l, l_out=l // 2, c_in=c, c_out=c))
        l //= 2
    for _ in range(MAX_DEPTH):
        specs.append(dict(tag="up", k=3, s=1, l_in=2 * l, l_out=2 * l, c_in=c, c_out=c))
        l *= 2
    for _ in range(4):
        specs.append(dict(tag="dec", k=3, s=1, l_in=l, l_out=l, c_in=c, c_out=c))
    return specs


def _build_plan():
    """Static per-layer plan shared by the host-side packer and the kernel trace."""
    plan, w_off, sidx = [], 0, 0
    for sp in _audio_specs():
        lanes_in = sp["w_in"] * sp["c_in"]
        k_rows = sp["k"] * lanes_in
        plan.append(dict(tag="audio", k=sp["k"], s=sp["s"],
                         rows_in=N_BATCH * sp["h_in"], rows_out=N_BATCH * sp["h_out"],
                         n_out=sp["w_out"] * sp["c_out"], k_rows=k_rows,
                         w_off=w_off, shift_idx=sidx))
        w_off += k_rows
        sidx += 1
    plan.append(dict(tag="resize"))
    n_down = 0
    for li, sp in enumerate(_unet_specs()):
        lanes_in = 2 * CHANNELS if li == 0 else sp["c_in"]   # width-collapse folded into pre-conv #1
        k_rows = sp["k"] * lanes_in
        save_res = (sp["tag"] == "pre" and li == 1)
        if sp["tag"] == "down":
            save_res = n_down < MAX_DEPTH - 1
            n_down += 1
        plan.append(dict(tag=sp["tag"], k=sp["k"], s=sp["s"],
                         rows_in=N_BATCH * sp["l_in"], rows_out=N_BATCH * sp["l_out"],
                         n_out=sp["c_out"], k_rows=k_rows,
                         w_off=w_off, shift_idx=sidx, save_res=save_res))
        w_off += k_rows
        sidx += 1
    plan.append(dict(tag="logits", k_rows=CHANNELS, n_out=OUT_FEATS, w_off=w_off, shift_idx=sidx))
    w_off += CHANNELS
    sidx += 1
    return plan, w_off, sidx


_PLAN, _W_ROWS, _N_SHIFTS = _build_plan()


# ----------------------------- parameter packing -----------------------------
def _resize_matrix(in_size, out_size):
    """F.interpolate(mode='linear'/'bilinear', align_corners=False) as a matrix."""
    pos = (np.arange(out_size, dtype=np.float64) + 0.5) * in_size / out_size - 0.5
    pos = np.clip(pos, 0.0, in_size - 1)
    lo = np.floor(pos).astype(np.int64)
    hi = np.minimum(lo + 1, in_size - 1)
    w = pos - lo
    m = np.zeros((out_size, in_size), np.float32)
    m[np.arange(out_size), lo] += (1.0 - w)
    m[np.arange(out_size), hi] += w
    return m


def _fold_bn(key, c_out):
    """Conv bias + eval-mode BatchNorm (general running-stats fold) -> (scale, shift)."""
    kb, kg, kbe, km, kv = jax.random.split(key, 5)
    conv_b = np.asarray(0.05 * jax.random.normal(kb, (c_out,)), np.float32)
    gamma = np.asarray(1.0 + 0.1 * jax.random.normal(kg, (c_out,)), np.float32)
    beta = np.asarray(0.05 * jax.random.normal(kbe, (c_out,)), np.float32)
    run_m = np.asarray(0.05 * jax.random.normal(km, (c_out,)), np.float32)
    run_v = np.asarray(1.0 + 0.1 * jnp.abs(jax.random.normal(kv, (c_out,))), np.float32)
    scale = gamma / np.sqrt(run_v + BN_EPS)
    shift = beta + (conv_b - run_m) * scale
    return scale, shift


def _audio_fused(key, sp):
    """Conv2d weight -> one (k*W_in*C_in, W_out*C_out) matrix (row taps stacked along K)."""
    k, s = sp["k"], sp["s"]
    c_in, c_out, w_in, w_out = sp["c_in"], sp["c_out"], sp["w_in"], sp["w_out"]
    kw, kbn = jax.random.split(key)
    kraw = np.asarray(jax.random.normal(kw, (k, k, c_in, c_out)) / np.sqrt(k * k * c_in), np.float32)
    scale, shift = _fold_bn(kbn, c_out)
    kf = kraw * scale                                       # fold BN scale into the weight
    lanes_in = w_in * c_in
    n_out = w_out * c_out
    b = np.zeros((k * lanes_in, n_out), np.float32)
    for i in range(k):                                      # row tap (shift d = i - 1)
        for wo in range(w_out):
            for j in range(k):                              # width tap
                wi = s * wo + j - 1                         # padding = 1
                if 0 <= wi < w_in:
                    b[i * lanes_in + wi * c_in: i * lanes_in + (wi + 1) * c_in,
                      wo * c_out:(wo + 1) * c_out] = kf[i, j]
    return b, np.tile(shift, w_out)


def _unet_fused(key, sp):
    """Conv1d weight -> one (k*C_in, C_out) matrix (row taps stacked along K)."""
    k, c_in, c_out = sp["k"], sp["c_in"], sp["c_out"]
    kw, kbn = jax.random.split(key)
    kraw = np.asarray(jax.random.normal(kw, (k, c_in, c_out)) / np.sqrt(k * c_in), np.float32)
    scale, shift = _fold_bn(kbn, c_out)
    return (kraw * scale).reshape(k * c_in, c_out), shift


def init_params(key):
    """(w_pack, shift_pack, const_pack): 3 packed kernel operands."""
    keys = list(jax.random.split(key, 32))
    ki = 0
    w_pack = np.zeros((_W_ROWS, LANES), np.float32)
    shift_pack = np.zeros((_N_SHIFTS, LANES), np.float32)
    pit = iter([st for st in _PLAN if st["tag"] != "resize"])

    for sp in _audio_specs():
        b, sh = _audio_fused(keys[ki], sp); ki += 1
        st = next(pit)
        w_pack[st["w_off"]:st["w_off"] + st["k_rows"], :st["n_out"]] = b
        shift_pack[st["shift_idx"], :st["n_out"]] = sh

    # width-collapse half of the bilinear resize (2 -> 1, weights 0.5/0.5), folded exactly
    # into the first pre-downsampling conv (both linear, no nonlinearity in between).
    r_w = 0.5 * np.concatenate([np.eye(CHANNELS, dtype=np.float32),
                                np.eye(CHANNELS, dtype=np.float32)], axis=0)   # (2C, C)
    for li, sp in enumerate(_unet_specs()):
        b, sh = _unet_fused(keys[ki], sp); ki += 1
        if li == 0:
            b = np.concatenate([r_w @ b[t * CHANNELS:(t + 1) * CHANNELS, :]
                                for t in range(sp["k"])], axis=0)              # (k*2C, C)
        st = next(pit)
        w_pack[st["w_off"]:st["w_off"] + st["k_rows"], :st["n_out"]] = b
        shift_pack[st["shift_idx"], :st["n_out"]] = sh

    kw, kb = jax.random.split(keys[ki]); ki += 1
    wl = np.asarray(jax.random.normal(kw, (CHANNELS, OUT_FEATS)) / np.sqrt(CHANNELS), np.float32)
    bl = np.asarray(0.05 * jax.random.normal(kb, (OUT_FEATS,)), np.float32)
    st = next(pit)
    w_pack[st["w_off"]:st["w_off"] + st["k_rows"], :st["n_out"]] = wl
    shift_pack[st["shift_idx"], :st["n_out"]] = bl

    # row-space constants, batch-interleaved via kron(., I_N) and packed into one slab
    eye_n = np.eye(N_BATCH, dtype=np.float32)
    sel = np.zeros((T_AUDIO // 2, T_AUDIO), np.float32)
    sel[np.arange(T_AUDIO // 2), 2 * np.arange(T_AUDIO // 2)] = 1.0     # stride-2 row decimation
    ups = np.zeros((TIME_STEPS, TIME_STEPS // 2), np.float32)
    ups[np.arange(TIME_STEPS), np.arange(TIME_STEPS) // 2] = 1.0        # nearest x2 upsample
    r_h = _resize_matrix(H_ENC, TIME_STEPS)                             # bilinear time resize
    const = np.zeros((CONST_ROWS, CONST_COLS), np.float32)
    const[SEL_ROW:SEL_ROW + SEL_SHAPE[0], :SEL_SHAPE[1]] = np.kron(sel, eye_n)
    const[UP_ROW:UP_ROW + UP_SHAPE[0], :UP_SHAPE[1]] = np.kron(ups, eye_n)
    const[RH_ROW:RH_ROW + RH_SHAPE[0], :RH_SHAPE[1]] = np.kron(r_h, eye_n)

    return (jnp.asarray(w_pack, WDT), jnp.asarray(shift_pack, ADT), jnp.asarray(const, WDT))


# ------------------------------- kernel body ---------------------------------
def _leaky(y):
    return jnp.where(y >= 0.0, y, y * NEG_SLOPE)


def _shift_rows(x, d):
    """out[r, :] = x[r + d, :], zero padded; d is a multiple of N_BATCH (per-sample shift)."""
    if d == 0:
        return x
    rows, lanes = x.shape
    pad = jnp.zeros((abs(d), lanes), x.dtype)
    if d > 0:
        return jnp.concatenate([x[d:, :], pad], axis=0)
    return jnp.concatenate([pad, x[:rows + d, :]], axis=0)


def _joint_res_kernel(x_ref, w_ref, shift_ref, const_ref, out_ref):
    """Whole JointRes_G forward on batch-interleaved (row = time*N + batch) 2-D slabs."""

    def conv_block(a, st):
        # in-VMEM im2col: lane-concat of the k row taps -> ONE matmul per layer (whole batch)
        taps = [_shift_rows(a, N_BATCH * d) for d in range(-1, st["k"] - 1)]     # padding = 1
        cols = jnp.concatenate(taps, axis=1)
        if st["s"] == 2:
            # stride 2: decimate rows once with a host-precomputed 0/1 selector (sub-block slice)
            sel = const_ref[SEL_ROW:SEL_ROW + st["rows_out"], 0:st["rows_in"]]
            cols = jnp.dot(sel, cols, preferred_element_type=ADT).astype(WDT)
        w = w_ref[st["w_off"]:st["w_off"] + st["k_rows"], 0:st["n_out"]]
        sh = shift_ref[st["shift_idx"]:st["shift_idx"] + 1, 0:st["n_out"]]
        y = jnp.dot(cols, w, preferred_element_type=ADT) + sh
        return _leaky(y).astype(WDT)

    act = x_ref[...]                                     # (N*T_AUDIO, FREQ) bf16
    residuals = []
    n_up = 0
    for st in _PLAN:
        tag = st["tag"]
        if tag == "audio":
            act = conv_block(act, st)
        elif tag == "resize":
            # bilinear time resize H_ENC -> TIME_STEPS (width collapse folded into next weight)
            rh = const_ref[RH_ROW:RH_ROW + RH_SHAPE[0], 0:RH_SHAPE[1]]
            act = jnp.dot(rh, act, preferred_element_type=ADT).astype(WDT)
        elif tag == "logits":
            # 1x1 conv, no BN / no activation; zero-padded to 128 lanes for a dense store
            w = w_ref[st["w_off"]:st["w_off"] + st["k_rows"], :]
            b = shift_ref[st["shift_idx"]:st["shift_idx"] + 1, :]
            out_ref[...] = jnp.dot(act, w, preferred_element_type=ADT) + b
        else:                                            # UNet 1-D ConvNormRelu blocks
            if tag == "up":
                # nearest x2 upsample (host-precomputed 0/1 matrix) + skip connection
                nr = st["rows_in"]
                up = const_ref[UP_ROW:UP_ROW + nr, 0:nr // 2]
                u = jnp.dot(up, act, preferred_element_type=ADT)
                act = (u + residuals[MAX_DEPTH - n_up - 1].astype(ADT)).astype(WDT)
                n_up += 1
            act = conv_block(act, st)
            if st.get("save_res", False):
                residuals.append(act)


# --------------------------------- forward -----------------------------------
def _num_powers_of_two(n):
    c = 0
    while n > 0 and n % 2 == 0:
        n //= 2
        c += 1
    return c


def forward(params, x, time_steps=TIME_STEPS):
    """x: (N, time, frequency) f32 -> ((N, time_steps, OUT_FEATS) f32, internal_losses)."""
    w_pack, shift_pack, const_pack = params
    n, t_audio, input_size = x.shape
    assert input_size / 2 ** (MAX_DEPTH - 1) >= 1
    assert _num_powers_of_two(input_size) >= MAX_DEPTH
    assert (n, t_audio, input_size) == (N_BATCH, T_AUDIO, FREQ)
    assert time_steps == TIME_STEPS                       # kernel/params specialised at init

    # wrapper-side layout plumbing: batch-interleave rows (row i = time i//N, batch i%N), pre-cast bf16
    x_stk = jnp.transpose(x, (1, 0, 2)).reshape(N_BATCH * T_AUDIO, FREQ).astype(WDT)

    out = pl.pallas_call(
        _joint_res_kernel,
        out_shape=jax.ShapeDtypeStruct((N_BATCH * TIME_STEPS, LANES), jnp.float32),
        in_specs=[pl.BlockSpec(memory_space=pltpu.MemorySpace.VMEM)] * 4,
        out_specs=pl.BlockSpec(memory_space=pltpu.MemorySpace.VMEM),
    )(x_stk, w_pack, shift_pack, const_pack)

    # un-interleave rows and drop the lane padding  (PyTorch returns (N, T, out_feats))
    out = out[:, :OUT_FEATS].reshape(TIME_STEPS, N_BATCH, OUT_FEATS).transpose(1, 0, 2)
    internal_losses = []
    return out, internal_losses


# ----------------------------------- main -------------------------------------
if __name__ == "__main__":
    key = jax.random.PRNGKey(0)
    kp, kx, ky = jax.random.split(key, 3)

    params = init_params(kp)
    x = jax.random.normal(kx, (N_BATCH, T_AUDIO, FREQ), jnp.float32)          # audio spectrogram
    y = jax.random.normal(ky, (N_BATCH, TIME_STEPS, OUT_FEATS), jnp.float32)  # pose (unused, eval path)

    fwd = jax.jit(lambda p, xx: forward(p, xx, TIME_STEPS))
    out, losses = fwd(params, x)
    out = jax.block_until_ready(out)

    assert out.shape == (N_BATCH, TIME_STEPS, OUT_FEATS), out.shape
    assert out.dtype == jnp.float32
    assert losses == []
    assert bool(jnp.all(jnp.isfinite(out)))
    print("KERNEL_OK")
</pallas_src>

<mosaic_0001>
module attributes {stable_mosaic.version = 11 : i64} {
  func.func @_joint_res_kernel(%arg0: memref<64x16xbf16, #tpu.memory_space<vmem>>, %arg1: memref<3536x128xbf16, #tpu.memory_space<vmem>>, %arg2: memref<20x128xf32, #tpu.memory_space<vmem>>, %arg3: memref<96x64xbf16, #tpu.memory_space<vmem>>, %arg4: memref<32x128xf32, #tpu.memory_space<vmem>>) attributes {dimension_semantics = [], scalar_prefetch = 0 : i64, scratch_operands = 0 : i64, tpu.core_type = #tpu.core_type<tc>} {
    %c0 = arith.constant 0 : index
    %c0_0 = arith.constant 0 : index
    %0 = vector.load %arg0[%c0, %c0_0] : memref<64x16xbf16, #tpu.memory_space<vmem>>, vector<64x16xbf16>
    %cst = arith.constant 0.000000e+00 : bf16
    %1 = vector.broadcast %cst : bf16 to vector<2x16xbf16>
    %2 = vector.extract_strided_slice %0 {offsets = [0, 0], sizes = [62, 16], strides = [1, 1]} : vector<64x16xbf16> to vector<62x16xbf16>
    %3 = tpu.concatenate %1, %2 in 0 : vector<2x16xbf16>, vector<62x16xbf16> -> vector<64x16xbf16>
    %cst_1 = arith.constant 0.000000e+00 : bf16
    %4 = vector.broadcast %cst_1 : bf16 to vector<2x16xbf16>
    %5 = vector.extract_strided_slice %0 {offsets = [2, 0], sizes = [62, 16], strides = [1, 1]} : vector<64x16xbf16> to vector<62x16xbf16>
    %6 = tpu.concatenate %5, %4 in 0 : vector<62x16xbf16>, vector<2x16xbf16> -> vector<64x16xbf16>
    %7 = tpu.concatenate %3, %0, %6 in 1 : vector<64x16xbf16>, vector<64x16xbf16>, vector<64x16xbf16> -> vector<64x48xbf16>
    %c0_2 = arith.constant 0 : index
    %c0_3 = arith.constant 0 : index
    %8 = vector.load %arg1[%c0_2, %c0_3] : memref<3536x128xbf16, #tpu.memory_space<vmem>>, vector<48x128xbf16>
    %c0_4 = arith.constant 0 : index
    %c0_5 = arith.constant 0 : index
    %9 = vector.load %arg2[%c0_4, %c0_5] : memref<20x128xf32, #tpu.memory_space<vmem>>, vector<1x128xf32>
    %cst_6 = arith.constant dense<0.000000e+00> : vector<64x128xf32>
    %10 = tpu.matmul %7, %8, %cst_6 {dimension_numbers = #tpu.dot_dimension_numbers<[1], [0], [0], [1], [0, 0, 1, 1], [], []>} : vector<64x48xbf16>, vector<48x128xbf16>, vector<64x128xf32> -> vector<64x128xf32>
    %11 = vector.broadcast %9 : vector<1x128xf32> to vector<64x128xf32>
    %12 = arith.addf %10, %11 : vector<64x128xf32>
    %cst_7 = arith.constant 0.000000e+00 : f32
    %13 = vector.broadcast %cst_7 : f32 to vector<64x128xf32>
    %14 = arith.cmpf oge, %12, %13 : vector<64x128xf32>
    %cst_8 = arith.constant 2.000000e-01 : f32
    %15 = vector.broadcast %cst_8 : f32 to vector<64x128xf32>
    %16 = arith.mulf %12, %15 : vector<64x128xf32>
    %17 = arith.select %14, %12, %16 : vector<64x128xi1>, vector<64x128xf32>
    %18 = arith.truncf %17 : vector<64x128xf32> to vector<64x128xbf16>
    %cst_9 = arith.constant 0.000000e+00 : bf16
    %19 = vector.broadcast %cst_9 : bf16 to vector<2x128xbf16>
    %20 = vector.extract_strided_slice %18 {offsets = [0, 0], sizes = [62, 128], strides = [1, 1]} : vector<64x128xbf16> to vector<62x128xbf16>
    %21 = tpu.concatenate %19, %20 in 0 : vector<2x128xbf16>, vector<62x128xbf16> -> vector<64x128xbf16>
    %cst_10 = arith.constant 0.000000e+00 : bf16
    %22 = vector.broadcast %cst_10 : bf16 to vector<2x128xbf16>
    %23 = vector.extract_strided_slice %18 {offsets = [2, 0], sizes = [62, 128], strides = [1, 1]} : vector<64x128xbf16> to vector<62x128xbf16>
    %24 = tpu.concatenate %23, %22 in 0 : vector<62x128xbf16>, vector<2x128xbf16> -> vector<64x128xbf16>
    %cst_11 = arith.constant 0.000000e+00 : bf16
    %25 = vector.broadcast %cst_11 : bf16 to vector<4x128xbf16>
    %26 = vector.extract_strided_slice %18 {offsets = [4, 0], sizes = [60, 128], strides = [1, 1]} : vector<64x128xbf16> to vector<60x128xbf16>
    %27 = tpu.concatenate %26, %25 in 0 : vector<60x128xbf16>, vector<4x128xbf16> -> vector<64x128xbf16>
    %28 = tpu.concatenate %21, %18, %24, %27 in 1 : vector<64x128xbf16>, vector<64x128xbf16>, vector<64x128xbf16>, vector<64x128xbf16> -> vector<64x512xbf16>
    %c0_12 = arith.constant 0 : index
    %c0_13 = arith.constant 0 : index
    %29 = vector.load %arg3[%c0_12, %c0_13] : memref<96x64xbf16, #tpu.memory_space<vmem>>, vector<32x64xbf16>
    %cst_14 = arith.constant dense<0.000000e+00> : vector<32x512xf32>
    %30 = tpu.matmul %29, %28, %cst_14 {dimension_numbers = #tpu.dot_dimension_numbers<[1], [0], [0], [1], [0, 0, 1, 1], [], []>} : vector<32x64xbf16>, vector<64x512xbf16>, vector<32x512xf32> -> vector<32x512xf32>
    %31 = arith.truncf %30 : vector<32x512xf32> to vector<32x512xbf16>
    %c48 = arith.constant 48 : index
    %c0_15 = arith.constant 0 : index
    %32 = vector.load %arg1[%c48, %c0_15] : memref<3536x128xbf16, #tpu.memory_space<vmem>>, vector<512x64xbf16>
    %c1 = arith.constant 1 : index
    %c0_16 = arith.constant 0 : index
    %33 = vector.load %arg2[%c1, %c0_16] : memref<20x128xf32, #tpu.memory_space<vmem>>, vector<1x64xf32>
    %cst_17 = arith.constant dense<0.000000e+00> : vector<32x64xf32>
    %34 = tpu.matmul %31, %32, %cst_17 {dimension_numbers = #tpu.dot_dimension_numbers<[1], [0], [0], [1], [0, 0, 1, 1], [], []>} : vector<32x512xbf16>, vector<512x64xbf16>, vector<32x64xf32> -> vector<32x64xf32>
    %35 = vector.broadcast %33 : vector<1x64xf32> to vector<32x64xf32>
    %36 = arith.addf %34, %35 : vector<32x64xf32>
    %cst_18 = arith.constant 0.000000e+00 : f32
    %37 = vector.broadcast %cst_18 : f32 to vector<32x64xf32>
    %38 = arith.cmpf oge, %36, %37 : vector<32x64xf32>
    %cst_19 = arith.constant 2.000000e-01 : f32
    %39 = vector.broadcast %cst_19 : f32 to vector<32x64xf32>
    %40 = arith.mulf %36, %39 : vector<32x64xf32>
    %41 = arith.select %38, %36, %40 : vector<32x64xi1>, vector<32x64xf32>
    %42 = arith.truncf %41 : vector<32x64xf32> to vector<32x64xbf16>
    %cst_20 = arith.constant 0.000000e+00 : bf16
    %43 = vector.broadcast %cst_20 : bf16 to vector<2x64xbf16>
    %44 = vector.extract_strided_slice %42 {offsets = [0, 0], sizes = [30, 64], strides = [1, 1]} : vector<32x64xbf16> to vector<30x64xbf16>
    %45 = tpu.concatenate %43, %44 in 0 : vector<2x64xbf16>, vector<30x64xbf16> -> vector<32x64xbf16>
    %cst_21 = arith.constant 0.000000e+00 : bf16
    %46 = vector.broadcast %cst_21 : bf16 to vector<2x64xbf16>
    %47 = vector.extract_strided_slice %42 {offsets = [2, 0], sizes = [30, 64], strides = [1, 1]} : vector<32x64xbf16> to vector<30x64xbf16>
    %48 = tpu.concatenate %47, %46 in 0 : vector<30x64xbf16>, vector<2x64xbf16> -> vector<32x64xbf16>
    %49 = tpu.concatenate %45, %42, %48 in 1 : vector<32x64xbf16>, vector<32x64xbf16>, vector<32x64xbf16> -> vector<32x192xbf16>
    %c560 = arith.constant 560 : index
    %c0_22 = arith.constant 0 : index
    %50 = vector.load %arg1[%c560, %c0_22] : memref<3536x128xbf16, #tpu.memory_space<vmem>>, vector<192x128xbf16>
    %c2 = arith.constant 2 : index
    %c0_23 = arith.constant 0 : index
    %51 = vector.load %arg2[%c2, %c0_23] : memref<20x128xf32, #tpu.memory_space<vmem>>, vector<1x128xf32>
    %cst_24 = arith.constant dense<0.000000e+00> : vector<32x128xf32>
    %52 = tpu.matmul %49, %50, %cst_24 {dimension_numbers = #tpu.dot_dimension_numbers<[1], [0], [0], [1], [0, 0, 1, 1], [], []>} : vector<32x192xbf16>, vector<192x128xbf16>, vector<32x128xf32> -> vector<32x128xf32>
    %53 = vector.broadcast %51 : vector<1x128xf32> to vector<32x128xf32>
    %54 = arith.addf %52, %53 : vector<32x128xf32>
    %cst_25 = arith.constant 0.000000e+00 : f32
    %55 = vector.broadcast %cst_25 : f32 to vector<32x128xf32>
    %56 = arith.cmpf oge, %54, %55 : vector<32x128xf32>
    %cst_26 = arith.constant 2.000000e-01 : f32
    %57 = vector.broadcast %cst_26 : f32 to vector<32x128xf32>
    %58 = arith.mulf %54, %57 : vector<32x128xf32>
    %59 = arith.select %56, %54, %58 : vector<32x128xi1>, vector<32x128xf32>
    %60 = arith.truncf %59 : vector<32x128xf32> to vector<32x128xbf16>
    %cst_27 = arith.constant 0.000000e+00 : bf16
    %61 = vector.broadcast %cst_27 : bf16 to vector<2x128xbf16>
    %62 = vector.extract_strided_slice %60 {offsets = [0, 0], sizes = [30, 128], strides = [1, 1]} : vector<32x128xbf16> to vector<30x128xbf16>
    %63 = tpu.concatenate %61, %62 in 0 : vector<2x128xbf16>, vector<30x128xbf16> -> vector<32x128xbf16>
    %cst_28 = arith.constant 0.000000e+00 : bf16
    %64 = vector.broadcast %cst_28 : bf16 to vector<2x128xbf16>
    %65 = vector.extract_strided_slice %60 {offsets = [2, 0], sizes = [30, 128], strides = [1, 1]} : vector<32x128xbf16> to vector<30x128xbf16>
    %66 = tpu.concatenate %65, %64 in 0 : vector<30x128xbf16>, vector<2x128xbf16> -> vector<32x128xbf16>
    %cst_29 = arith.constant 0.000000e+00 : bf16
    %67 = vector.broadcast %cst_29 : bf16 to vector<4x128xbf16>
    %68 = vector.extract_strided_slice %60 {offsets = [4, 0], sizes = [28, 128], strides = [1, 1]} : vector<32x128xbf16> to vector<28x128xbf16>
    %69 = tpu.concatenate %68, %67 in 0 : vector<28x128xbf16>, vector<4x128xbf16> -> vector<32x128xbf16>
    %70 = tpu.concatenate %63, %60, %66, %69 in 1 : vector<32x128xbf16>, vector<32x128xbf16>, vector<32x128xbf16>, vector<32x128xbf16> -> vector<32x512xbf16>
    %c0_30 = arith.constant 0 : index
    %c0_31 = arith.constant 0 : index
    %71 = vector.load %arg3[%c0_30, %c0_31] : memref<96x64xbf16, #tpu.memory_space<vmem>>, vector<16x32xbf16>
    %cst_32 = arith.constant dense<0.000000e+00> : vector<16x512xf32>
    %72 = tpu.matmul %71, %70, %cst_32 {dimension_numbers = #tpu.dot_dimension_numbers<[1], [0], [0], [1], [0, 0, 1, 1], [], []>} : vector<16x32xbf16>, vector<32x512xbf16>, vector<16x512xf32> -> vector<16x512xf32>
    %73 = arith.truncf %72 : vector<16x512xf32> to vector<16x512xbf16>
    %c752 = arith.constant 752 : index
    %c0_33 = arith.constant 0 : index
    %74 = vector.load %arg1[%c752, %c0_33] : memref<3536x128xbf16, #tpu.memory_space<vmem>>, vector<512x64xbf16>
    %c3 = arith.constant 3 : index
    %c0_34 = arith.constant 0 : index
    %75 = vector.load %arg2[%c3, %c0_34] : memref<20x128xf32, #tpu.memory_space<vmem>>, vector<1x64xf32>
    %cst_35 = arith.constant dense<0.000000e+00> : vector<16x64xf32>
    %76 = tpu.matmul %73, %74, %cst_35 {dimension_numbers = #tpu.dot_dimension_numbers<[1], [0], [0], [1], [0, 0, 1, 1], [], []>} : vector<16x512xbf16>, vector<512x64xbf16>, vector<16x64xf32> -> vector<16x64xf32>
    %77 = vector.broadcast %75 : vector<1x64xf32> to vector<16x64xf32>
    %78 = arith.addf %76, %77 : vector<16x64xf32>
    %cst_36 = arith.constant 0.000000e+00 : f32
    %79 = vector.broadcast %cst_36 : f32 to vector<16x64xf32>
    %80 = arith.cmpf oge, %78, %79 : vector<16x64xf32>
    %cst_37 = arith.constant 2.000000e-01 : f32
    %81 = vector.broadcast %cst_37 : f32 to vector<16x64xf32>
    %82 = arith.mulf %78, %81 : vector<16x64xf32>
    %83 = arith.select %80, %78, %82 : vector<16x64xi1>, vector<16x64xf32>
    %84 = arith.truncf %83 : vector<16x64xf32> to vector<16x64xbf16>
    %cst_38 = arith.constant 0.000000e+00 : bf16
    %85 = vector.broadcast %cst_38 : bf16 to vector<2x64xbf16>
    %86 = vector.extract_strided_slice %84 {offsets = [0, 0], sizes = [14, 64], strides = [1, 1]} : vector<16x64xbf16> to vector<14x64xbf16>
    %87 = tpu.concatenate %85, %86 in 0 : vector<2x64xbf16>, vector<14x64xbf16> -> vector<16x64xbf16>
    %cst_39 = arith.constant 0.000000e+00 : bf16
    %88 = vector.broadcast %cst_39 : bf16 to vector<2x64xbf16>
    %89 = vector.extract_strided_slice %84 {offsets = [2, 0], sizes = [14, 64], strides = [1, 1]} : vector<16x64xbf16> to vector<14x64xbf16>
    %90 = tpu.concatenate %89, %88 in 0 : vector<14x64xbf16>, vector<2x64xbf16> -> vector<16x64xbf16>
    %91 = tpu.concatenate %87, %84, %90 in 1 : vector<16x64xbf16>, vector<16x64xbf16>, vector<16x64xbf16> -> vector<16x192xbf16>
    %c1264 = arith.constant 1264 : index
    %c0_40 = arith.constant 0 : index
    %92 = vector.load %arg1[%c1264, %c0_40] : memref<3536x128xbf16, #tpu.memory_space<vmem>>, vector<192x128xbf16>
    %c4 = arith.constant 4 : index
    %c0_41 = arith.constant 0 : index
    %93 = vector.load %arg2[%c4, %c0_41] : memref<20x128xf32, #tpu.memory_space<vmem>>, vector<1x128xf32>
    %cst_42 = arith.constant dense<0.000000e+00> : vector<16x128xf32>
    %94 = tpu.matmul %91, %92, %cst_42 {dimension_numbers = #tpu.dot_dimension_numbers<[1], [0], [0], [1], [0, 0, 1, 1], [], []>} : vector<16x192xbf16>, vector<192x128xbf16>, vector<16x128xf32> -> vector<16x128xf32>
    %95 = vector.broadcast %93 : vector<1x128xf32> to vector<16x128xf32>
    %96 = arith.addf %94, %95 : vector<16x128xf32>
    %cst_43 = arith.constant 0.000000e+00 : f32
    %97 = vector.broadcast %cst_43 : f32 to vector<16x128xf32>
    %98 = arith.cmpf oge, %96, %97 : vector<16x128xf32>
    %cst_44 = arith.constant 2.000000e-01 : f32
    %99 = vector.broadcast %cst_44 : f32 to vector<16x128xf32>
    %100 = arith.mulf %96, %99 : vector<16x128xf32>
    %101 = arith.select %98, %96, %100 : vector<16x128xi1>, vector<16x128xf32>
    %102 = arith.truncf %101 : vector<16x128xf32> to vector<16x128xbf16>
    %cst_45 = arith.constant 0.000000e+00 : bf16
    %103 = vector.broadcast %cst_45 : bf16 to vector<2x128xbf16>
    %104 = vector.extract_strided_slice %102 {offsets = [0, 0], sizes = [14, 128], strides = [1, 1]} : vector<16x128xbf16> to vector<14x128xbf16>
    %105 = tpu.concatenate %103, %104 in 0 : vector<2x128xbf16>, vector<14x128xbf16> -> vector<16x128xbf16>
    %cst_46 = arith.constant 0.000000e+00 : bf16
    %106 = vector.broadcast %cst_46 : bf16 to vector<2x128xbf16>
    %107 = vector.extract_strided_slice %102 {offsets = [2, 0], sizes = [14, 128], strides = [1, 1]} : vector<16x128xbf16> to vector<14x128xbf16>
    %108 = tpu.concatenate %107, %106 in 0 : vector<14x128xbf16>, vector<2x128xbf16> -> vector<16x128xbf16>
    %cst_47 = arith.constant 0.000000e+00 : bf16
    %109 = vector.broadcast %cst_47 : bf16 to vector<4x128xbf16>
    %110 = vector.extract_strided_slice %102 {offsets = [4, 0], sizes = [12, 128], strides = [1, 1]} : vector<16x128xbf16> to vector<12x128xbf16>
    %111 = tpu.concatenate %110, %109 in 0 : vector<12x128xbf16>, vector<4x128xbf16> -> vector<16x128xbf16>
    %112 = tpu.concatenate %105, %102, %108, %111 in 1 : vector<16x128xbf16>, vector<16x128xbf16>, vector<16x128xbf16>, vector<16x128xbf16> -> vector<16x512xbf16>
    %c0_48 = arith.constant 0 : index
    %c0_49 = arith.constant 0 : index
    %113 = vector.load %arg3[%c0_48, %c0_49] : memref<96x64xbf16, #tpu.memory_space<vmem>>, vector<8x16xbf16>
    %cst_50 = arith.constant dense<0.000000e+00> : vector<8x512xf32>
    %114 = tpu.matmul %113, %112, %cst_50 {dimension_numbers = #tpu.dot_dimension_numbers<[1], [0], [0], [1], [0, 0, 1, 1], [], []>} : vector<8x16xbf16>, vector<16x512xbf16>, vector<8x512xf32> -> vector<8x512xf32>
    %115 = arith.truncf %114 : vector<8x512xf32> to vector<8x512xbf16>
    %c1456 = arith.constant 1456 : index
    %c0_51 = arith.constant 0 : index
    %116 = vector.load %arg1[%c1456, %c0_51] : memref<3536x128xbf16, #tpu.memory_space<vmem>>, vector<512x64xbf16>
    %c5 = arith.constant 5 : index
    %c0_52 = arith.constant 0 : index
    %117 = vector.load %arg2[%c5, %c0_52] : memref<20x128xf32, #tpu.memory_space<vmem>>, vector<1x64xf32>
    %cst_53 = arith.constant dense<0.000000e+00> : vector<8x64xf32>
    %118 = tpu.matmul %115, %116, %cst_53 {dimension_numbers = #tpu.dot_dimension_numbers<[1], [0], [0], [1], [0, 0, 1, 1], [], []>} : vector<8x512xbf16>, vector<512x64xbf16>, vector<8x64xf32> -> vector<8x64xf32>
    %119 = vector.broadcast %117 : vector<1x64xf32> to vector<8x64xf32>
    %120 = arith.addf %118, %119 : vector<8x64xf32>
    %cst_54 = arith.constant 0.000000e+00 : f32
    %121 = vector.broadcast %cst_54 : f32 to vector<8x64xf32>
    %122 = arith.cmpf oge, %120, %121 : vector<8x64xf32>
    %cst_55 = arith.constant 2.000000e-01 : f32
    %123 = vector.broadcast %cst_55 : f32 to vector<8x64xf32>
    %124 = arith.mulf %120, %123 : vector<8x64xf32>
    %125 = arith.select %122, %120, %124 : vector<8x64xi1>, vector<8x64xf32>
    %126 = arith.truncf %125 : vector<8x64xf32> to vector<8x64xbf16>
    %cst_56 = arith.constant 0.000000e+00 : bf16
    %127 = vector.broadcast %cst_56 : bf16 to vector<2x64xbf16>
    %128 = vector.extract_strided_slice %126 {offsets = [0, 0], sizes = [6, 64], strides = [1, 1]} : vector<8x64xbf16> to vector<6x64xbf16>
    %129 = tpu.concatenate %127, %128 in 0 : vector<2x64xbf16>, vector<6x64xbf16> -> vector<8x64xbf16>
    %cst_57 = arith.constant 0.000000e+00 : bf16
    %130 = vector.broadcast %cst_57 : bf16 to vector<2x64xbf16>
    %131 = vector.extract_strided_slice %126 {offsets = [2, 0], sizes = [6, 64], strides = [1, 1]} : vector<8x64xbf16> to vector<6x64xbf16>
    %132 = tpu.concatenate %131, %130 in 0 : vector<6x64xbf16>, vector<2x64xbf16> -> vector<8x64xbf16>
    %133 = tpu.concatenate %129, %126, %132 in 1 : vector<8x64xbf16>, vector<8x64xbf16>, vector<8x64xbf16> -> vector<8x192xbf16>
    %c1968 = arith.constant 1968 : index
    %c0_58 = arith.constant 0 : index
    %134 = vector.load %arg1[%c1968, %c0_58] : memref<3536x128xbf16, #tpu.memory_space<vmem>>, vector<192x64xbf16>
    %c6 = arith.constant 6 : index
    %c0_59 = arith.constant 0 : index
    %135 = vector.load %arg2[%c6, %c0_59] : memref<20x128xf32, #tpu.memory_space<vmem>>, vector<1x64xf32>
    %cst_60 = arith.constant dense<0.000000e+00> : vector<8x64xf32>
    %136 = tpu.matmul %133, %134, %cst_60 {dimension_numbers = #tpu.dot_dimension_numbers<[1], [0], [0], [1], [0, 0, 1, 1], [], []>} : vector<8x192xbf16>, vector<192x64xbf16>, vector<8x64xf32> -> vector<8x64xf32>
    %137 = vector.broadcast %135 : vector<1x64xf32> to vector<8x64xf32>
    %138 = arith.addf %136, %137 : vector<8x64xf32>
    %cst_61 = arith.constant 0.000000e+00 : f32
    %139 = vector.broadcast %cst_61 : f32 to vector<8x64xf32>
    %140 = arith.cmpf oge, %138, %139 : vector<8x64xf32>
    %cst_62 = arith.constant 2.000000e-01 : f32
    %141 = vector.broadcast %cst_62 : f32 to vector<8x64xf32>
    %142 = arith.mulf %138, %141 : vector<8x64xf32>
    %143 = arith.select %140, %138, %142 : vector<8x64xi1>, vector<8x64xf32>
    %144 = arith.truncf %143 : vector<8x64xf32> to vector<8x64xbf16>
    %c64 = arith.constant 64 : index
    %c0_63 = arith.constant 0 : index
    %145 = vector.load %arg3[%c64, %c0_63] : memref<96x64xbf16, #tpu.memory_space<vmem>>, vector<32x8xbf16>
    %cst_64 = arith.constant dense<0.000000e+00> : vector<32x64xf32>
    %146 = tpu.matmul %145, %144, %cst_64 {dimension_numbers = #tpu.dot_dimension_numbers<[1], [0], [0], [1], [0, 0, 1, 1], [], []>} : vector<32x8xbf16>, vector<8x64xbf16>, vector<32x64xf32> -> vector<32x64xf32>
    %147 = arith.truncf %146 : vector<32x64xf32> to vector<32x64xbf16>
    %cst_65 = arith.constant 0.000000e+00 : bf16
    %148 = vector.broadcast %cst_65 : bf16 to vector<2x64xbf16>
    %149 = vector.extract_strided_slice %147 {offsets = [0, 0], sizes = [30, 64], strides = [1, 1]} : vector<32x64xbf16> to vector<30x64xbf16>
    %150 = tpu.concatenate %148, %149 in 0 : vector<2x64xbf16>, vector<30x64xbf16> -> vector<32x64xbf16>
    %cst_66 = arith.constant 0.000000e+00 : bf16
    %151 = vector.broadcast %cst_66 : bf16 to vector<2x64xbf16>
    %152 = vector.extract_strided_slice %147 {offsets = [2, 0], sizes = [30, 64], strides = [1, 1]} : vector<32x64xbf16> to vector<30x64xbf16>
    %153 = tpu.concatenate %152, %151 in 0 : vector<30x64xbf16>, vector<2x64xbf16> -> vector<32x64xbf16>
    %154 = tpu.concatenate %150, %147, %153 in 1 : vector<32x64xbf16>, vector<32x64xbf16>, vector<32x64xbf16> -> vector<32x192xbf16>
    %c2160 = arith.constant 2160 : index
    %c0_67 = arith.constant 0 : index
    %155 = vector.load %arg1[%c2160, %c0_67] : memref<3536x128xbf16, #tpu.memory_space<vmem>>, vector<192x32xbf16>
    %c7 = arith.constant 7 : index
    %c0_68 = arith.constant 0 : index
    %156 = vector.load %arg2[%c7, %c0_68] : memref<20x128xf32, #tpu.memory_space<vmem>>, vector<1x32xf32>
    %cst_69 = arith.constant dense<0.000000e+00> : vector<32x32xf32>
    %157 = tpu.matmul %154, %155, %cst_69 {dimension_numbers = #tpu.dot_dimension_numbers<[1], [0], [0], [1], [0, 0, 1, 1], [], []>} : vector<32x192xbf16>, vector<192x32xbf16>, vector<32x32xf32> -> vector<32x32xf32>
    %158 = vector.broadcast %156 : vector<1x32xf32> to vector<32x32xf32>
    %159 = arith.addf %157, %158 : vector<32x32xf32>
    %cst_70 = arith.constant 0.000000e+00 : f32
    %160 = vector.broadcast %cst_70 : f32 to vector<32x32xf32>
    %161 = arith.cmpf oge, %159, %160 : vector<32x32xf32>
    %cst_71 = arith.constant 2.000000e-01 : f32
    %162 = vector.broadcast %cst_71 : f32 to vector<32x32xf32>
    %163 = arith.mulf %159, %162 : vector<32x32xf32>
    %164 = arith.select %161, %159, %163 : vector<32x32xi1>, vector<32x32xf32>
    %165 = arith.truncf %164 : vector<32x32xf32> to vector<32x32xbf16>
    %cst_72 = arith.constant 0.000000e+00 : bf16
    %166 = vector.broadcast %cst_72 : bf16 to vector<2x32xbf16>
    %167 = vector.extract_strided_slice %165 {offsets = [0, 0], sizes = [30, 32], strides = [1, 1]} : vector<32x32xbf16> to vector<30x32xbf16>
    %168 = tpu.concatenate %166, %167 in 0 : vector<2x32xbf16>, vector<30x32xbf16> -> vector<32x32xbf16>
    %cst_73 = arith.constant 0.000000e+00 : bf16
    %169 = vector.broadcast %cst_73 : bf16 to vector<2x32xbf16>
    %170 = vector.extract_strided_slice %165 {offsets = [2, 0], sizes = [30, 32], strides = [1, 1]} : vector<32x32xbf16> to vector<30x32xbf16>
    %171 = tpu.concatenate %170, %169 in 0 : vector<30x32xbf16>, vector<2x32xbf16> -> vector<32x32xbf16>
    %172 = tpu.concatenate %168, %165, %171 in 1 : vector<32x32xbf16>, vector<32x32xbf16>, vector<32x32xbf16> -> vector<32x96xbf16>
    %c2352 = arith.constant 2352 : index
    %c0_74 = arith.constant 0 : index
    %173 = vector.load %arg1[%c2352, %c0_74] : memref<3536x128xbf16, #tpu.memory_space<vmem>>, vector<96x32xbf16>
    %c8 = arith.constant 8 : index
    %c0_75 = arith.constant 0 : index
    %174 = vector.load %arg2[%c8, %c0_75] : memref<20x128xf32, #tpu.memory_space<vmem>>, vector<1x32xf32>
    %cst_76 = arith.constant dense<0.000000e+00> : vector<32x32xf32>
    %175 = tpu.matmul %172, %173, %cst_76 {dimension_numbers = #tpu.dot_dimension_numbers<[1], [0], [0], [1], [0, 0, 1, 1], [], []>} : vector<32x96xbf16>, vector<96x32xbf16>, vector<32x32xf32> -> vector<32x32xf32>
    %176 = vector.broadcast %174 : vector<1x32xf32> to vector<32x32xf32>
    %177 = arith.addf %175, %176 : vector<32x32xf32>
    %cst_77 = arith.constant 0.000000e+00 : f32
    %178 = vector.broadcast %cst_77 : f32 to vector<32x32xf32>
    %179 = arith.cmpf oge, %177, %178 : vector<32x32xf32>
    %cst_78 = arith.constant 2.000000e-01 : f32
    %180 = vector.broadcast %cst_78 : f32 to vector<32x32xf32>
    %181 = arith.mulf %177, %180 : vector<32x32xf32>
    %182 = arith.select %179, %177, %181 : vector<32x32xi1>, vector<32x32xf32>
    %183 = arith.truncf %182 : vector<32x32xf32> to vector<32x32xbf16>
    %cst_79 = arith.constant 0.000000e+00 : bf16
    %184 = vector.broadcast %cst_79 : bf16 to vector<2x32xbf16>
    %185 = vector.extract_strided_slice %183 {offsets = [0, 0], sizes = [30, 32], strides = [1, 1]} : vector<32x32xbf16> to vector<30x32xbf16>
    %186 = tpu.concatenate %184, %185 in 0 : vector<2x32xbf16>, vector<30x32xbf16> -> vector<32x32xbf16>
    %cst_80 = arith.constant 0.000000e+00 : bf16
    %187 = vector.broadcast %cst_80 : bf16 to vector<2x32xbf16>
    %188 = vector.extract_strided_slice %183 {offsets = [2, 0], sizes = [30, 32], strides = [1, 1]} : vector<32x32xbf16> to vector<30x32xbf16>
    %189 = tpu.concatenate %188, %187 in 0 : vector<30x32xbf16>, vector<2x32xbf16> -> vector<32x32xbf16>
    %cst_81 = arith.constant 0.000000e+00 : bf16
    %190 = vector.broadcast %cst_81 : bf16 to vector<4x32xbf16>
    %191 = vector.extract_strided_slice %183 {offsets = [4, 0], sizes = [28, 32], strides = [1, 1]} : vector<32x32xbf16> to vector<28x32xbf16>
    %192 = tpu.concatenate %191, %190 in 0 : vector<28x32xbf16>, vector<4x32xbf16> -> vector<32x32xbf16>
    %193 = tpu.concatenate %186, %183, %189, %192 in 1 : vector<32x32xbf16>, vector<32x32xbf16>, vector<32x32xbf16>, vector<32x32xbf16> -> vector<32x128xbf16>
    %c0_82 = arith.constant 0 : index
    %c0_83 = arith.constant 0 : index
    %194 = vector.load %arg3[%c0_82, %c0_83] : memref<96x64xbf16, #tpu.memory_space<vmem>>, vector<16x32xbf16>
    %cst_84 = arith.constant dense<0.000000e+00> : vector<16x128xf32>
    %195 = tpu.matmul %194, %193, %cst_84 {dimension_numbers = #tpu.dot_dimension_numbers<[1], [0], [0], [1], [0, 0, 1, 1], [], []>} : vector<16x32xbf16>, vector<32x128xbf16>, vector<16x128xf32> -> vector<16x128xf32>
    %196 = arith.truncf %195 : vector<16x128xf32> to vector<16x128xbf16>
    %c2448 = arith.constant 2448 : index
    %c0_85 = arith.constant 0 : index
    %197 = vector.load %arg1[%c2448, %c0_85] : memref<3536x128xbf16, #tpu.memory_space<vmem>>, vector<128x32xbf16>
    %c9 = arith.constant 9 : index
    %c0_86 = arith.constant 0 : index
    %198 = vector.load %arg2[%c9, %c0_86] : memref<20x128xf32, #tpu.memory_space<vmem>>, vector<1x32xf32>
    %cst_87 = arith.constant dense<0.000000e+00> : vector<16x32xf32>
    %199 = tpu.matmul %196, %197, %cst_87 {dimension_numbers = #tpu.dot_dimension_numbers<[1], [0], [0], [1], [0, 0, 1, 1], [], []>} : vector<16x128xbf16>, vector<128x32xbf16>, vector<16x32xf32> -> vector<16x32xf32>
    %200 = vector.broadcast %198 : vector<1x32xf32> to vector<16x32xf32>
    %201 = arith.addf %199, %200 : vector<16x32xf32>
    %cst_88 = arith.constant 0.000000e+00 : f32
    %202 = vector.broadcast %cst_88 : f32 to vector<16x32xf32>
    %203 = arith.cmpf oge, %201, %202 : vector<16x32xf32>
    %cst_89 = arith.constant 2.000000e-01 : f32
    %204 = vector.broadcast %cst_89 : f32 to vector<16x32xf32>
    %205 = arith.mulf %201, %204 : vector<16x32xf32>
    %206 = arith.select %203, %201, %205 : vector<16x32xi1>, vector<16x32xf32>
    %207 = arith.truncf %206 : vector<16x32xf32> to vector<16x32xbf16>
    %cst_90 = arith.constant 0.000000e+00 : bf16
    %208 = vector.broadcast %cst_90 : bf16 to vector<2x32xbf16>
    %209 = vector.extract_strided_slice %207 {offsets = [0, 0], sizes = [14, 32], strides = [1, 1]} : vector<16x32xbf16> to vector<14x32xbf16>
    %210 = tpu.concatenate %208, %209 in 0 : vector<2x32xbf16>, vector<14x32xbf16> -> vector<16x32xbf16>
    %cst_91 = arith.constant 0.000000e+00 : bf16
    %211 = vector.broadcast %cst_91 : bf16 to vector<2x32xbf16>
    %212 = vector.extract_strided_slice %207 {offsets = [2, 0], sizes = [14, 32], strides = [1, 1]} : vector<16x32xbf16> to vector<14x32xbf16>
    %213 = tpu.concatenate %212, %211 in 0 : vector<14x32xbf16>, vector<2x32xbf16> -> vector<16x32xbf16>
    %cst_92 = arith.constant 0.000000e+00 : bf16
    %214 = vector.broadcast %cst_92 : bf16 to vector<4x32xbf16>
    %215 = vector.extract_strided_slice %207 {offsets = [4, 0], sizes = [12, 32], strides = [1, 1]} : vector<16x32xbf16> to vector<12x32xbf16>
    %216 = tpu.concatenate %215, %214 in 0 : vector<12x32xbf16>, vector<4x32xbf16> -> vector<16x32xbf16>
    %217 = tpu.concatenate %210, %207, %213, %216 in 1 : vector<16x32xbf16>, vector<16x32xbf16>, vector<16x32xbf16>, vector<16x32xbf16> -> vector<16x128xbf16>
    %c0_93 = arith.constant 0 : index
    %c0_94 = arith.constant 0 : index
    %218 = vector.load %arg3[%c0_93, %c0_94] : memref<96x64xbf16, #tpu.memory_space<vmem>>, vector<8x16xbf16>
    %cst_95 = arith.constant dense<0.000000e+00> : vector<8x128xf32>
    %219 = tpu.matmul %218, %217, %cst_95 {dimension_numbers = #tpu.dot_dimension_numbers<[1], [0], [0], [1], [0, 0, 1, 1], [], []>} : vector<8x16xbf16>, vector<16x128xbf16>, vector<8x128xf32> -> vector<8x128xf32>
    %220 = arith.truncf %219 : vector<8x128xf32> to vector<8x128xbf16>
    %c2576 = arith.constant 2576 : index
    %c0_96 = arith.constant 0 : index
    %221 = vector.load %arg1[%c2576, %c0_96] : memref<3536x128xbf16, #tpu.memory_space<vmem>>, vector<128x32xbf16>
    %c10 = arith.constant 10 : index
    %c0_97 = arith.constant 0 : index
    %222 = vector.load %arg2[%c10, %c0_97] : memref<20x128xf32, #tpu.memory_space<vmem>>, vector<1x32xf32>
    %cst_98 = arith.constant dense<0.000000e+00> : vector<8x32xf32>
    %223 = tpu.matmul %220, %221, %cst_98 {dimension_numbers = #tpu.dot_dimension_numbers<[1], [0], [0], [1], [0, 0, 1, 1], [], []>} : vector<8x128xbf16>, vector<128x32xbf16>, vector<8x32xf32> -> vector<8x32xf32>
    %224 = vector.broadcast %222 : vector<1x32xf32> to vector<8x32xf32>
    %225 = arith.addf %223, %224 : vector<8x32xf32>
    %cst_99 = arith.constant 0.000000e+00 : f32
    %226 = vector.broadcast %cst_99 : f32 to vector<8x32xf32>
    %227 = arith.cmpf oge, %225, %226 : vector<8x32xf32>
    %cst_100 = arith.constant 2.000000e-01 : f32
    %228 = vector.broadcast %cst_100 : f32 to vector<8x32xf32>
    %229 = arith.mulf %225, %228 : vector<8x32xf32>
    %230 = arith.select %227, %225, %229 : vector<8x32xi1>, vector<8x32xf32>
    %231 = arith.truncf %230 : vector<8x32xf32> to vector<8x32xbf16>
    %cst_101 = arith.constant 0.000000e+00 : bf16
    %232 = vector.broadcast %cst_101 : bf16 to vector<2x32xbf16>
    %233 = vector.extract_strided_slice %231 {offsets = [0, 0], sizes = [6, 32], strides = [1, 1]} : vector<8x32xbf16> to vector<6x32xbf16>
    %234 = tpu.concatenate %232, %233 in 0 : vector<2x32xbf16>, vector<6x32xbf16> -> vector<8x32xbf16>
    %cst_102 = arith.constant 0.000000e+00 : bf16
    %235 = vector.broadcast %cst_102 : bf16 to vector<2x32xbf16>
    %236 = vector.extract_strided_slice %231 {offsets = [2, 0], sizes = [6, 32], strides = [1, 1]} : vector<8x32xbf16> to vector<6x32xbf16>
    %237 = tpu.concatenate %236, %235 in 0 : vector<6x32xbf16>, vector<2x32xbf16> -> vector<8x32xbf16>
    %cst_103 = arith.constant 0.000000e+00 : bf16
    %238 = vector.broadcast %cst_103 : bf16 to vector<4x32xbf16>
    %239 = vector.extract_strided_slice %231 {offsets = [4, 0], sizes = [4, 32], strides = [1, 1]} : vector<8x32xbf16> to vector<4x32xbf16>
    %240 = tpu.concatenate %239, %238 in 0 : vector<4x32xbf16>, vector<4x32xbf16> -> vector<8x32xbf16>
    %241 = tpu.concatenate %234, %231, %237, %240 in 1 : vector<8x32xbf16>, vector<8x32xbf16>, vector<8x32xbf16>, vector<8x32xbf16> -> vector<8x128xbf16>
    %c0_104 = arith.constant 0 : index
    %c0_105 = arith.constant 0 : index
    %242 = vector.load %arg3[%c0_104, %c0_105] : memref<96x64xbf16, #tpu.memory_space<vmem>>, vector<4x8xbf16>
    %cst_106 = arith.constant dense<0.000000e+00> : vector<4x128xf32>
    %243 = tpu.matmul %242, %241, %cst_106 {dimension_numbers = #tpu.dot_dimension_numbers<[1], [0], [0], [1], [0, 0, 1, 1], [], []>} : vector<4x8xbf16>, vector<8x128xbf16>, vector<4x128xf32> -> vector<4x128xf32>
    %244 = arith.truncf %243 : vector<4x128xf32> to vector<4x128xbf16>
    %c2704 = arith.constant 2704 : index
    %c0_107 = arith.constant 0 : index
    %245 = vector.load %arg1[%c2704, %c0_107] : memref<3536x128xbf16, #tpu.memory_space<vmem>>, vector<128x32xbf16>
    %c11 = arith.constant 11 : index
    %c0_108 = arith.constant 0 : index
    %246 = vector.load %arg2[%c11, %c0_108] : memref<20x128xf32, #tpu.memory_space<vmem>>, vector<1x32xf32>
    %cst_109 = arith.constant dense<0.000000e+00> : vector<4x32xf32>
    %247 = tpu.matmul %244, %245, %cst_109 {dimension_numbers = #tpu.dot_dimension_numbers<[1], [0], [0], [1], [0, 0, 1, 1], [], []>} : vector<4x128xbf16>, vector<128x32xbf16>, vector<4x32xf32> -> vector<4x32xf32>
    %248 = vector.broadcast %246 : vector<1x32xf32> to vector<4x32xf32>
    %249 = arith.addf %247, %248 : vector<4x32xf32>
    %cst_110 = arith.constant 0.000000e+00 : f32
    %250 = vector.broadcast %cst_110 : f32 to vector<4x32xf32>
    %251 = arith.cmpf oge, %249, %250 : vector<4x32xf32>
    %cst_111 = arith.constant 2.000000e-01 : f32
    %252 = vector.broadcast %cst_111 : f32 to vector<4x32xf32>
    %253 = arith.mulf %249, %252 : vector<4x32xf32>
    %254 = arith.select %251, %249, %253 : vector<4x32xi1>, vector<4x32xf32>
    %255 = arith.truncf %254 : vector<4x32xf32> to vector<4x32xbf16>
    %c32 = arith.constant 32 : index
    %c0_112 = arith.constant 0 : index
    %256 = vector.load %arg3[%c32, %c0_112] : memref<96x64xbf16, #tpu.memory_space<vmem>>, vector<8x4xbf16>
    %cst_113 = arith.constant dense<0.000000e+00> : vector<8x32xf32>
    %257 = tpu.matmul %256, %255, %cst_113 {dimension_numbers = #tpu.dot_dimension_numbers<[1], [0], [0], [1], [0, 0, 1, 1], [], []>} : vector<8x4xbf16>, vector<4x32xbf16>, vector<8x32xf32> -> vector<8x32xf32>
    %258 = arith.extf %231 : vector<8x32xbf16> to vector<8x32xf32>
    %259 = arith.addf %257, %258 : vector<8x32xf32>
    %260 = arith.truncf %259 : vector<8x32xf32> to vector<8x32xbf16>
    %cst_114 = arith.constant 0.000000e+00 : bf16
    %261 = vector.broadcast %cst_114 : bf16 to vector<2x32xbf16>
    %262 = vector.extract_strided_slice %260 {offsets = [0, 0], sizes = [6, 32], strides = [1, 1]} : vector<8x32xbf16> to vector<6x32xbf16>
    %263 = tpu.concatenate %261, %262 in 0 : vector<2x32xbf16>, vector<6x32xbf16> -> vector<8x32xbf16>
    %cst_115 = arith.constant 0.000000e+00 : bf16
    %264 = vector.broadcast %cst_115 : bf16 to vector<2x32xbf16>
    %265 = vector.extract_strided_slice %260 {offsets = [2, 0], sizes = [6, 32], strides = [1, 1]} : vector<8x32xbf16> to vector<6x32xbf16>
    %266 = tpu.concatenate %265, %264 in 0 : vector<6x32xbf16>, vector<2x32xbf16> -> vector<8x32xbf16>
    %267 = tpu.concatenate %263, %260, %266 in 1 : vector<8x32xbf16>, vector<8x32xbf16>, vector<8x32xbf16> -> vector<8x96xbf16>
    %c2832 = arith.constant 2832 : index
    %c0_116 = arith.constant 0 : index
    %268 = vector.load %arg1[%c2832, %c0_116] : memref<3536x128xbf16, #tpu.memory_space<vmem>>, vector<96x32xbf16>
    %c12 = arith.constant 12 : index
    %c0_117 = arith.constant 0 : index
    %269 = vector.load %arg2[%c12, %c0_117] : memref<20x128xf32, #tpu.memory_space<vmem>>, vector<1x32xf32>
    %cst_118 = arith.constant dense<0.000000e+00> : vector<8x32xf32>
    %270 = tpu.matmul %267, %268, %cst_118 {dimension_numbers = #tpu.dot_dimension_numbers<[1], [0], [0], [1], [0, 0, 1, 1], [], []>} : vector<8x96xbf16>, vector<96x32xbf16>, vector<8x32xf32> -> vector<8x32xf32>
    %271 = vector.broadcast %269 : vector<1x32xf32> to vector<8x32xf32>
    %272 = arith.addf %270, %271 : vector<8x32xf32>
    %cst_119 = arith.constant 0.000000e+00 : f32
    %273 = vector.broadcast %cst_119 : f32 to vector<8x32xf32>
    %274 = arith.cmpf oge, %272, %273 : vector<8x32xf32>
    %cst_120 = arith.constant 2.000000e-01 : f32
    %275 = vector.broadcast %cst_120 : f32 to vector<8x32xf32>
    %276 = arith.mulf %272, %275 : vector<8x32xf32>
    %277 = arith.select %274, %272, %276 : vector<8x32xi1>, vector<8x32xf32>
    %278 = arith.truncf %277 : vector<8x32xf32> to vector<8x32xbf16>
    %c32_121 = arith.constant 32 : index
    %c0_122 = arith.constant 0 : index
    %279 = vector.load %arg3[%c32_121, %c0_122] : memref<96x64xbf16, #tpu.memory_space<vmem>>, vector<16x8xbf16>
    %cst_123 = arith.constant dense<0.000000e+00> : vector<16x32xf32>
    %280 = tpu.matmul %279, %278, %cst_123 {dimension_numbers = #tpu.dot_dimension_numbers<[1], [0], [0], [1], [0, 0, 1, 1], [], []>} : vector<16x8xbf16>, vector<8x32xbf16>, vector<16x32xf32> -> vector<16x32xf32>
    %281 = arith.extf %207 : vector<16x32xbf16> to vector<16x32xf32>
    %282 = arith.addf %280, %281 : vector<16x32xf32>
    %283 = arith.truncf %282 : vector<16x32xf32> to vector<16x32xbf16>
    %cst_124 = arith.constant 0.000000e+00 : bf16
    %284 = vector.broadcast %cst_124 : bf16 to vector<2x32xbf16>
    %285 = vector.extract_strided_slice %283 {offsets = [0, 0], sizes = [14, 32], strides = [1, 1]} : vector<16x32xbf16> to vector<14x32xbf16>
    %286 = tpu.concatenate %284, %285 in 0 : vector<2x32xbf16>, vector<14x32xbf16> -> vector<16x32xbf16>
    %cst_125 = arith.constant 0.000000e+00 : bf16
    %287 = vector.broadcast %cst_125 : bf16 to vector<2x32xbf16>
    %288 = vector.extract_strided_slice %283 {offsets = [2, 0], sizes = [14, 32], strides = [1, 1]} : vector<16x32xbf16> to vector<14x32xbf16>
    %289 = tpu.concatenate %288, %287 in 0 : vector<14x32xbf16>, vector<2x32xbf16> -> vector<16x32xbf16>
    %290 = tpu.concatenate %286, %283, %289 in 1 : vector<16x32xbf16>, vector<16x32xbf16>, vector<16x32xbf16> -> vector<16x96xbf16>
    %c2928 = arith.constant 2928 : index
    %c0_126 = arith.constant 0 : index
    %291 = vector.load %arg1[%c2928, %c0_126] : memref<3536x128xbf16, #tpu.memory_space<vmem>>, vector<96x32xbf16>
    %c13 = arith.constant 13 : index
    %c0_127 = arith.constant 0 : index
    %292 = vector.load %arg2[%c13, %c0_127] : memref<20x128xf32, #tpu.memory_space<vmem>>, vector<1x32xf32>
    %cst_128 = arith.constant dense<0.000000e+00> : vector<16x32xf32>
    %293 = tpu.matmul %290, %291, %cst_128 {dimension_numbers = #tpu.dot_dimension_numbers<[1], [0], [0], [1], [0, 0, 1, 1], [], []>} : vector<16x96xbf16>, vector<96x32xbf16>, vector<16x32xf32> -> vector<16x32xf32>
    %294 = vector.broadcast %292 : vector<1x32xf32> to vector<16x32xf32>
    %295 = arith.addf %293, %294 : vector<16x32xf32>
    %cst_129 = arith.constant 0.000000e+00 : f32
    %296 = vector.broadcast %cst_129 : f32 to vector<16x32xf32>
    %297 = arith.cmpf oge, %295, %296 : vector<16x32xf32>
    %cst_130 = arith.constant 2.000000e-01 : f32
    %298 = vector.broadcast %cst_130 : f32 to vector<16x32xf32>
    %299 = arith.mulf %295, %298 : vector<16x32xf32>
    %300 = arith.select %297, %295, %299 : vector<16x32xi1>, vector<16x32xf32>
    %301 = arith.truncf %300 : vector<16x32xf32> to vector<16x32xbf16>
    %c32_131 = arith.constant 32 : index
    %c0_132 = arith.constant 0 : index
    %302 = vector.load %arg3[%c32_131, %c0_132] : memref<96x64xbf16, #tpu.memory_space<vmem>>, vector<32x16xbf16>
    %cst_133 = arith.constant dense<0.000000e+00> : vector<32x32xf32>
    %303 = tpu.matmul %302, %301, %cst_133 {dimension_numbers = #tpu.dot_dimension_numbers<[1], [0], [0], [1], [0, 0, 1, 1], [], []>} : vector<32x16xbf16>, vector<16x32xbf16>, vector<32x32xf32> -> vector<32x32xf32>
    %304 = arith.extf %183 : vector<32x32xbf16> to vector<32x32xf32>
    %305 = arith.addf %303, %304 : vector<32x32xf32>
    %306 = arith.truncf %305 : vector<32x32xf32> to vector<32x32xbf16>
    %cst_134 = arith.constant 0.000000e+00 : bf16
    %307 = vector.broadcast %cst_134 : bf16 to vector<2x32xbf16>
    %308 = vector.extract_strided_slice %306 {offsets = [0, 0], sizes = [30, 32], strides = [1, 1]} : vector<32x32xbf16> to vector<30x32xbf16>
    %309 = tpu.concatenate %307, %308 in 0 : vector<2x32xbf16>, vector<30x32xbf16> -> vector<32x32xbf16>
    %cst_135 = arith.constant 0.000000e+00 : bf16
    %310 = vector.broadcast %cst_135 : bf16 to vector<2x32xbf16>
    %311 = vector.extract_strided_slice %306 {offsets = [2, 0], sizes = [30, 32], strides = [1, 1]} : vector<32x32xbf16> to vector<30x32xbf16>
    %312 = tpu.concatenate %311, %310 in 0 : vector<30x32xbf16>, vector<2x32xbf16> -> vector<32x32xbf16>
    %313 = tpu.concatenate %309, %306, %312 in 1 : vector<32x32xbf16>, vector<32x32xbf16>, vector<32x32xbf16> -> vector<32x96xbf16>
    %c3024 = arith.constant 3024 : index
    %c0_136 = arith.constant 0 : index
    %314 = vector.load %arg1[%c3024, %c0_136] : memref<3536x128xbf16, #tpu.memory_space<vmem>>, vector<96x32xbf16>
    %c14 = arith.constant 14 : index
    %c0_137 = arith.constant 0 : index
    %315 = vector.load %arg2[%c14, %c0_137] : memref<20x128xf32, #tpu.memory_space<vmem>>, vector<1x32xf32>
    %cst_138 = arith.constant dense<0.000000e+00> : vector<32x32xf32>
    %316 = tpu.matmul %313, %314, %cst_138 {dimension_numbers = #tpu.dot_dimension_numbers<[1], [0], [0], [1], [0, 0, 1, 1], [], []>} : vector<32x96xbf16>, vector<96x32xbf16>, vector<32x32xf32> -> vector<32x32xf32>
    %317 = vector.broadcast %315 : vector<1x32xf32> to vector<32x32xf32>
    %318 = arith.addf %316, %317 : vector<32x32xf32>
    %cst_139 = arith.constant 0.000000e+00 : f32
    %319 = vector.broadcast %cst_139 : f32 to vector<32x32xf32>
    %320 = arith.cmpf oge, %318, %319 : vector<32x32xf32>
    %cst_140 = arith.constant 2.000000e-01 : f32
    %321 = vector.broadcast %cst_140 : f32 to vector<32x32xf32>
    %322 = arith.mulf %318, %321 : vector<32x32xf32>
    %323 = arith.select %320, %318, %322 : vector<32x32xi1>, vector<32x32xf32>
    %324 = arith.truncf %323 : vector<32x32xf32> to vector<32x32xbf16>
    %cst_141 = arith.constant 0.000000e+00 : bf16
    %325 = vector.broadcast %cst_141 : bf16 to vector<2x32xbf16>
    %326 = vector.extract_strided_slice %324 {offsets = [0, 0], sizes = [30, 32], strides = [1, 1]} : vector<32x32xbf16> to vector<30x32xbf16>
    %327 = tpu.concatenate %325, %326 in 0 : vector<2x32xbf16>, vector<30x32xbf16> -> vector<32x32xbf16>
    %cst_142 = arith.constant 0.000000e+00 : bf16
    %328 = vector.broadcast %cst_142 : bf16 to vector<2x32xbf16>
    %329 = vector.extract_strided_slice %324 {offsets = [2, 0], sizes = [30, 32], strides = [1, 1]} : vector<32x32xbf16> to vector<30x32xbf16>
    %330 = tpu.concatenate %329, %328 in 0 : vector<30x32xbf16>, vector<2x32xbf16> -> vector<32x32xbf16>
    %331 = tpu.concatenate %327, %324, %330 in 1 : vector<32x32xbf16>, vector<32x32xbf16>, vector<32x32xbf16> -> vector<32x96xbf16>
    %c3120 = arith.constant 3120 : index
    %c0_143 = arith.constant 0 : index
    %332 = vector.load %arg1[%c3120, %c0_143] : memref<3536x128xbf16, #tpu.memory_space<vmem>>, vector<96x32xbf16>
    %c15 = arith.constant 15 : index
    %c0_144 = arith.constant 0 : index
    %333 = vector.load %arg2[%c15, %c0_144] : memref<20x128xf32, #tpu.memory_space<vmem>>, vector<1x32xf32>
    %cst_145 = arith.constant dense<0.000000e+00> : vector<32x32xf32>
    %334 = tpu.matmul %331, %332, %cst_145 {dimension_numbers = #tpu.dot_dimension_numbers<[1], [0], [0], [1], [0, 0, 1, 1], [], []>} : vector<32x96xbf16>, vector<96x32xbf16>, vector<32x32xf32> -> vector<32x32xf32>
    %335 = vector.broadcast %333 : vector<1x32xf32> to vector<32x32xf32>
    %336 = arith.addf %334, %335 : vector<32x32xf32>
    %cst_146 = arith.constant 0.000000e+00 : f32
    %337 = vector.broadcast %cst_146 : f32 to vector<32x32xf32>
    %338 = arith.cmpf oge, %336, %337 : vector<32x32xf32>
    %cst_147 = arith.constant 2.000000e-01 : f32
    %339 = vector.broadcast %cst_147 : f32 to vector<32x32xf32>
    %340 = arith.mulf %336, %339 : vector<32x32xf32>
    %341 = arith.select %338, %336, %340 : vector<32x32xi1>, vector<32x32xf32>
    %342 = arith.truncf %341 : vector<32x32xf32> to vector<32x32xbf16>
    %cst_148 = arith.constant 0.000000e+00 : bf16
    %343 = vector.broadcast %cst_148 : bf16 to vector<2x32xbf16>
    %344 = vector.extract_strided_slice %342 {offsets = [0, 0], sizes = [30, 32], strides = [1, 1]} : vector<32x32xbf16> to vector<30x32xbf16>
    %345 = tpu.concatenate %343, %344 in 0 : vector<2x32xbf16>, vector<30x32xbf16> -> vector<32x32xbf16>
    %cst_149 = arith.constant 0.000000e+00 : bf16
    %346 = vector.broadcast %cst_149 : bf16 to vector<2x32xbf16>
    %347 = vector.extract_strided_slice %342 {offsets = [2, 0], sizes = [30, 32], strides = [1, 1]} : vector<32x32xbf16> to vector<30x32xbf16>
    %348 = tpu.concatenate %347, %346 in 0 : vector<30x32xbf16>, vector<2x32xbf16> -> vector<32x32xbf16>
    %349 = tpu.concatenate %345, %342, %348 in 1 : vector<32x32xbf16>, vector<32x32xbf16>, vector<32x32xbf16> -> vector<32x96xbf16>
    %c3216 = arith.constant 3216 : index
    %c0_150 = arith.constant 0 : index
    %350 = vector.load %arg1[%c3216, %c0_150] : memref<3536x128xbf16, #tpu.memory_space<vmem>>, vector<96x32xbf16>
    %c16 = arith.constant 16 : index
    %c0_151 = arith.constant 0 : index
    %351 = vector.load %arg2[%c16, %c0_151] : memref<20x128xf32, #tpu.memory_space<vmem>>, vector<1x32xf32>
    %cst_152 = arith.constant dense<0.000000e+00> : vector<32x32xf32>
    %352 = tpu.matmul %349, %350, %cst_152 {dimension_numbers = #tpu.dot_dimension_numbers<[1], [0], [0], [1], [0, 0, 1, 1], [], []>} : vector<32x96xbf16>, vector<96x32xbf16>, vector<32x32xf32> -> vector<32x32xf32>
    %353 = vector.broadcast %351 : vector<1x32xf32> to vector<32x32xf32>
    %354 = arith.addf %352, %353 : vector<32x32xf32>
    %cst_153 = arith.constant 0.000000e+00 : f32
    %355 = vector.broadcast %cst_153 : f32 to vector<32x32xf32>
    %356 = arith.cmpf oge, %354, %355 : vector<32x32xf32>
    %cst_154 = arith.constant 2.000000e-01 : f32
    %357 = vector.broadcast %cst_154 : f32 to vector<32x32xf32>
    %358 = arith.mulf %354, %357 : vector<32x32xf32>
    %359 = arith.select %356, %354, %358 : vector<32x32xi1>, vector<32x32xf32>
    %360 = arith.truncf %359 : vector<32x32xf32> to vector<32x32xbf16>
    %cst_155 = arith.constant 0.000000e+00 : bf16
    %361 = vector.broadcast %cst_155 : bf16 to vector<2x32xbf16>
    %362 = vector.extract_strided_slice %360 {offsets = [0, 0], sizes = [30, 32], strides = [1, 1]} : vector<32x32xbf16> to vector<30x32xbf16>
    %363 = tpu.concatenate %361, %362 in 0 : vector<2x32xbf16>, vector<30x32xbf16> -> vector<32x32xbf16>
    %cst_156 = arith.constant 0.000000e+00 : bf16
    %364 = vector.broadcast %cst_156 : bf16 to vector<2x32xbf16>
    %365 = vector.extract_strided_slice %360 {offsets = [2, 0], sizes = [30, 32], strides = [1, 1]} : vector<32x32xbf16> to vector<30x32xbf16>
    %366 = tpu.concatenate %365, %364 in 0 : vector<30x32xbf16>, vector<2x32xbf16> -> vector<32x32xbf16>
    %367 = tpu.concatenate %363, %360, %366 in 1 : vector<32x32xbf16>, vector<32x32xbf16>, vector<32x32xbf16> -> vector<32x96xbf16>
    %c3312 = arith.constant 3312 : index
    %c0_157 = arith.constant 0 : index
    %368 = vector.load %arg1[%c3312, %c0_157] : memref<3536x128xbf16, #tpu.memory_space<vmem>>, vector<96x32xbf16>
    %c17 = arith.constant 17 : index
    %c0_158 = arith.constant 0 : index
    %369 = vector.load %arg2[%c17, %c0_158] : memref<20x128xf32, #tpu.memory_space<vmem>>, vector<1x32xf32>
    %cst_159 = arith.constant dense<0.000000e+00> : vector<32x32xf32>
    %370 = tpu.matmul %367, %368, %cst_159 {dimension_numbers = #tpu.dot_dimension_numbers<[1], [0], [0], [1], [0, 0, 1, 1], [], []>} : vector<32x96xbf16>, vector<96x32xbf16>, vector<32x32xf32> -> vector<32x32xf32>
    %371 = vector.broadcast %369 : vector<1x32xf32> to vector<32x32xf32>
    %372 = arith.addf %370, %371 : vector<32x32xf32>
    %cst_160 = arith.constant 0.000000e+00 : f32
    %373 = vector.broadcast %cst_160 : f32 to vector<32x32xf32>
    %374 = arith.cmpf oge, %372, %373 : vector<32x32xf32>
    %cst_161 = arith.constant 2.000000e-01 : f32
    %375 = vector.broadcast %cst_161 : f32 to vector<32x32xf32>
    %376 = arith.mulf %372, %375 : vector<32x32xf32>
    %377 = arith.select %374, %372, %376 : vector<32x32xi1>, vector<32x32xf32>
    %378 = arith.truncf %377 : vector<32x32xf32> to vector<32x32xbf16>
    %cst_162 = arith.constant 0.000000e+00 : bf16
    %379 = vector.broadcast %cst_162 : bf16 to vector<2x32xbf16>
    %380 = vector.extract_strided_slice %378 {offsets = [0, 0], sizes = [30, 32], strides = [1, 1]} : vector<32x32xbf16> to vector<30x32xbf16>
    %381 = tpu.concatenate %379, %380 in 0 : vector<2x32xbf16>, vector<30x32xbf16> -> vector<32x32xbf16>
    %cst_163 = arith.constant 0.000000e+00 : bf16
    %382 = vector.broadcast %cst_163 : bf16 to vector<2x32xbf16>
    %383 = vector.extract_strided_slice %378 {offsets = [2, 0], sizes = [30, 32], strides = [1, 1]} : vector<32x32xbf16> to vector<30x32xbf16>
    %384 = tpu.concatenate %383, %382 in 0 : vector<30x32xbf16>, vector<2x32xbf16> -> vector<32x32xbf16>
    %385 = tpu.concatenate %381, %378, %384 in 1 : vector<32x32xbf16>, vector<32x32xbf16>, vector<32x32xbf16> -> vector<32x96xbf16>
    %c3408 = arith.constant 3408 : index
    %c0_164 = arith.constant 0 : index
    %386 = vector.load %arg1[%c3408, %c0_164] : memref<3536x128xbf16, #tpu.memory_space<vmem>>, vector<96x32xbf16>
    %c18 = arith.constant 18 : index
    %c0_165 = arith.constant 0 : index
    %387 = vector.load %arg2[%c18, %c0_165] : memref<20x128xf32, #tpu.memory_space<vmem>>, vector<1x32xf32>
    %cst_166 = arith.constant dense<0.000000e+00> : vector<32x32xf32>
    %388 = tpu.matmul %385, %386, %cst_166 {dimension_numbers = #tpu.dot_dimension_numbers<[1], [0], [0], [1], [0, 0, 1, 1], [], []>} : vector<32x96xbf16>, vector<96x32xbf16>, vector<32x32xf32> -> vector<32x32xf32>
    %389 = vector.broadcast %387 : vector<1x32xf32> to vector<32x32xf32>
    %390 = arith.addf %388, %389 : vector<32x32xf32>
    %cst_167 = arith.constant 0.000000e+00 : f32
    %391 = vector.broadcast %cst_167 : f32 to vector<32x32xf32>
    %392 = arith.cmpf oge, %390, %391 : vector<32x32xf32>
    %cst_168 = arith.constant 2.000000e-01 : f32
    %393 = vector.broadcast %cst_168 : f32 to vector<32x32xf32>
    %394 = arith.mulf %390, %393 : vector<32x32xf32>
    %395 = arith.select %392, %390, %394 : vector<32x32xi1>, vector<32x32xf32>
    %396 = arith.truncf %395 : vector<32x32xf32> to vector<32x32xbf16>
    %c3504 = arith.constant 3504 : index
    %c0_169 = arith.constant 0 : index
    %397 = vector.load %arg1[%c3504, %c0_169] : memref<3536x128xbf16, #tpu.memory_space<vmem>>, vector<32x128xbf16>
    %c19 = arith.constant 19 : index
    %c0_170 = arith.constant 0 : index
    %398 = vector.load %arg2[%c19, %c0_170] : memref<20x128xf32, #tpu.memory_space<vmem>>, vector<1x128xf32>
    %cst_171 = arith.constant dense<0.000000e+00> : vector<32x128xf32>
    %399 = tpu.matmul %396, %397, %cst_171 {dimension_numbers = #tpu.dot_dimension_numbers<[1], [0], [0], [1], [0, 0, 1, 1], [], []>} : vector<32x32xbf16>, vector<32x128xbf16>, vector<32x128xf32> -> vector<32x128xf32>
    %400 = vector.broadcast %398 : vector<1x128xf32> to vector<32x128xf32>
    %401 = arith.addf %399, %400 : vector<32x128xf32>
    %c0_172 = arith.constant 0 : index
    %c0_173 = arith.constant 0 : index
    %402 = vector.load %arg4[%c0_172, %c0_173] : memref<32x128xf32, #tpu.memory_space<vmem>>, vector<32x128xf32>
    tpu.vector_store %arg4[%c0_172, %c0_173], %401 {strides = array<i32>} : memref<32x128xf32, #tpu.memory_space<vmem>>, vector<32x128xf32>,
    return
  }
}

</mosaic_0001>

<bundles_post_ra>
// kernel: _lambda_.1
= control target key start
LH: loop header
LB: loop body
LE: loop exit
PB: predicated region body
PF: predicated region fallthrough
CT: control target
= control target key end

     0   :  { %9 = vsyncpa [#allocation3], 0  ;;  %s5566_s15 = smov [#allocation2]   ;;  %s6125_s0 = inlined_call_operand.vmem [shape: bf16[64,16], index: 0, kind: input, shape index: {}]   ;;  %s6126_s1 = inlined_call_operand.hbm [shape: bf16[3536,128], index: 1, kind: input, shape index: {}]   ;;  %s6127_s2 = inlined_call_operand.vmem [shape: f32[20,128], index: 2, kind: input, shape index: {}]   ;;  %s6128_s3 = inlined_call_operand.vmem [shape: bf16[96,64], index: 3, kind: input, shape index: {}]   ;;  %s6129_s4 = inlined_call_operand.vmem [shape: f32[32,128], index: 4, kind: output, shape index: {}]  }
   0x1   :  { %s17_s16 = sshll.u32 %s5566_s15, 4  ;;  %s18_s16 = int_to_ptr.vmem [resolvable:$true] %s17_s16 }
   0x2   :  { %s5552_s17 = scalar_lea.vmem %s18_s16, 28288  ;;  %p5557_p1 = scmp.lt.s32.totalorder %s18_s16, %s18_s16 }
   0x3   :  { %p5553_p0 = scmp.ne.s32.totalorder %s18_s16, %s5552_s17  ;;  %p5558_p2 = scmp.lt.s32.totalorder %s5552_s17, %s5552_s17 }
   0x5   :  { %p5559_p3 = por %p5558_p2, %p5557_p1 }
   0x7   :  { %p5560_p4 = pnand %p5559_p3, %p5553_p0 }
   0x9   :  { %5563 = shalt.err (!%p5560_p4)
}
   0xa   :  { %s5567_s18 = smov 64   ;;  %s5568_s19 = smov 4  }
   0xb   :  { %23 = dma.hbm_to_vmem [thread:$0]  %s6126_s1, 28288, %s18_s16, [#allocation3], %s5567_s18, %s5567_s18, %s5568_s19  }
   0xc   :  { %5564 = dma.done.wait [#allocation3], 28288  }
   0xd   :  { %5565 = vsyncadd [#allocation3], 4294939008  ;;  %vm72_vm0 = vcmask 1046528   ;;  %v5310_v0 = vld [vmem:[%s6125_s0] sm:$0xff]   ;;  %v5311_v1 = vld [vmem:[%s6125_s0 + $0x8] sm:$0xff]   ;;  %vm60_vm1 = vcmask 1040384  }
   0xe   :  { %s5569_s26 = smov 16   ;;  %v73_v2 = vrot.slane %v5310_v0, 1  ;;  %v5312_v3 = vld [vmem:[%s6125_s0 + $0x10] sm:$0xff]   ;;  %v74_v4 = vrot.slane %v5311_v1, 1  ;;  %v5313_v5 = vld [vmem:[%s6125_s0 + $0x18] sm:$0xff]   ;;  %v61_v10 = vrot.slane %v5310_v0, 7  ;;  %vm5664_vm14 = vmneg %vm60_vm1 }
   0xf   :  { %83 = vrot.lane.b32.xlu0 %v5310_v0, %s5569_s26  ;;  %v76_v6 = vrot.slane %v5312_v3, 1  ;;  %v5314_v7 = vld [vmem:[#allocation2 + $0x10] sm:$0xff]   ;;  %v78_v9 = vrot.slane %v5313_v5, 1  ;;  %s5570_s30 = smov 32   ;;  %v5315_v11 = vld [vmem:[#allocation2 + $0x8] sm:$0xff]   ;;  %v62_v12 = vrot.slane %v5311_v1, 7 }
  0x10   :  { %v75_v8 = vsel %vm72_vm0, %v73_v2, %v74_v4  ;;  %5046 = vmatprep.subr.bf16.mxu0 %v5314_v7  ;;  %v71_v15 = vsel %vm60_vm1, 0, %v61_v10  ;;  %v64_v16 = vrot.slane %v5312_v3, 7  ;;  %v5316_v18 = vld [vmem:[#allocation2] sm:$0xff]   ;;  %v66_v19 = vrot.slane %v5313_v5, 7  ;;  %s5574_s8 = smov 96  }
  0x11   :  { %92 = vrot.lane.b32.xlu1 %v75_v8, %s5570_s30  ;;  %v77_v13 = vsel %vm72_vm0, %v74_v4, %v76_v6  ;;  %v82_v14 = vsel %vm72_vm0, %v78_v9, 0  ;;  %5047 = vmatpush3.bf16.msra.mxu0 %v5314_v7  ;;  %v63_v17 = vsel %vm60_vm1, %v61_v10, %v62_v12  ;;  %v79_v22 = vsel %vm72_vm0, %v76_v6, %v78_v9  ;;  %v4484_v43 = vld [vmem:[%s6127_s2] ss:$0 sm:$0xff] }
  0x12   :  { %5048 = vmatprep.subr.bf16.mxu0 %v5315_v11  ;;  %v65_v20 = vsel %vm60_vm1, %v62_v12, %v64_v16  ;;  %v67_v21 = vsel %vm60_vm1, %v64_v16, %v66_v19  ;;  %vm100_vm2 = vcmask 130048   ;;  %vm112_vm3 = vcmask 261120  }
  0x13   :  { %85 = vrot.lane.b32.xlu0 %v5311_v1, %s5569_s26  ;;  %vm150_vm4 = vcmask 392192   ;;  %v5571_v39 = vmov 0   ;;  %vm282_vm13 = vcmask 1045504   ;;  %vm311_vm15 = vcmask 523264  }
  0x14   :  { %350 = vmatprep.mubr.bf16.mxu1 %v5571_v39 }
  0x15   :  { %94 = vrot.lane.b32.xlu1 %v77_v13, %s5570_s30  ;;  %5049 = vmatpush3.bf16.msra.mxu0 %v5315_v11 }
  0x16   :  { %5050 = vmatprep.subr.bf16.mxu0 %v5316_v18 }
  0x17   :  { %87 = vrot.lane.b32.xlu0 %v5312_v3, %s5569_s26 }
  0x19   :  { %89 = vrot.lane.b32.xlu1 %v5313_v5, %s5569_s26  ;;  %5051 = vmatpush3.bf16.msra.mxu0 %v5316_v18 }
  0x1b   :  { %96 = vrot.lane.b32.xlu0 %v79_v22, %s5570_s30 }
  0x1d   :  { %98 = vrot.lane.b32.xlu1 %v82_v14, %s5570_s30 }
  0x81   :  { %v84_v23 = vpop.permute.xlu0 %83 }
  0x82   :  { %v102_v24 = vsel %vm100_vm2, %v71_v15, %v84_v23 }
  0x83   :  { %v93_v25 = vpop.permute.xlu1 %92 }
  0x84   :  { %v114_v27 = vsel %vm112_vm3, %v102_v24, %v93_v25 }
  0x85   :  { %v86_v26 = vpop.permute.xlu0 %85  ;;  %5052 = vmatprep.mubr.msk.bf16.mxu0 %vm150_vm4, %v114_v27 }
  0x86   :  { %v105_v28 = vsel %vm100_vm2, %v63_v17, %v86_v26 }
  0x87   :  { %v95_v29 = vpop.permute.xlu1 %94 }
  0x88   :  { %v116_v31 = vsel %vm112_vm3, %v105_v28, %v95_v29 }
  0x89   :  { %v88_v30 = vpop.permute.xlu0 %87  ;;  %5053 = vmatmul.mubr.msk.bf16.vlgmr.msra.gmra.mxu0 %vm150_vm4, %v116_v31 }
  0x8a   :  { %v108_v32 = vsel %vm100_vm2, %v65_v20, %v88_v30 }
  0x8b   :  { %v90_v33 = vpop.permute.xlu1 %89 }
  0x8c   :  { %v111_v36 = vsel %vm100_vm2, %v67_v21, %v90_v33 }
  0x8d   :  { %v97_v34 = vpop.permute.xlu0 %96 }
  0x8e   :  { %v118_v35 = vsel %vm112_vm3, %v108_v32, %v97_v34  ;;  %v5319_v34 = vld [vmem:[#allocation2 + $0x110] sm:$0xff]  }
  0x8f   :  { %5056 = vmatprep.mubr.msk.bf16.mxu0 %vm150_vm4, %v118_v35  ;;  %v99_v37 = vpop.permute.xlu1 %98 }
  0x90   :  { %v120_v38 = vsel %vm112_vm3, %v111_v36, %v99_v37  ;;  %v5317_v37 = vld [vmem:[%s6128_s3] sm:$0xff]   ;;  %v5410_v36 = vld [vmem:[#allocation2 + $0x348] sm:$0xff]  }
  0x91   :  { %5057 = vmatmul.mubr.msk.bf16.gmra.mxu0 %vm150_vm4, %v120_v38  ;;  %v5321_v38 = vld [vmem:[#allocation2 + $0x90] sm:$0xff]  }
  0x92   :  { %403 = vmatprep.mubr.bf16.mxu0 %v5571_v39 }
 0x149   :  { %v5054_v40 = vpop.f32.mrf.mxu0 }
 0x14a   :  { %v202_v46 = vadd.f32 %v5054_v40, %v4484_v43  ;;  %v5320_v40 = vld [vmem:[#allocation2 + $0xd0] sm:$0xff]  }
 0x14b   :  { %v193_v41 = vpop.f32.mrf.mxu0 }
 0x14c   :  { %v194_v51 = vadd.f32 %v4484_v43, %v193_v41  ;;  %vm226_vm5 = vcmp.ge.f32.partialorder %v202_v46, 0.0  ;;  %v234_v56 = vmul.f32 0.2, %v202_v46  ;;  %v5323_v41 = vld [vmem:[#allocation2 + $0x108] sm:$0xff]  }
 0x14d   :  { %v5055_v42 = vpop.f32.mrf.mxu0 }
 0x14e   :  { %v205_v48 = vadd.f32 %v5055_v42, %v4484_v43  ;;  %v232_v62 = vmul.f32 0.2, %v194_v51  ;;  %vm224_vm12 = vcmp.ge.f32.partialorder %v194_v51, 0.0  ;;  %v242_v5 = vsel %vm226_vm5, %v202_v46, %v234_v56  ;;  %v5322_v42 = vld [vmem:[#allocation2 + $0x50] sm:$0xff]   ;;  %v5326_v46 = vld [vmem:[#allocation2 + $0x48] sm:$0xff]  }
 0x14f   :  { %v196_v44 = vpop.f32.mrf.mxu0  ;;  %v5337_v56 = vld [vmem:[#allocation2 + $0x70] sm:$0xff]  }
 0x150   :  { %v197_v52 = vadd.f32 %v4484_v43, %v196_v44  ;;  %vm227_vm6 = vcmp.ge.f32.partialorder %v205_v48, 0.0  ;;  %v235_v57 = vmul.f32 0.2, %v205_v48  ;;  %v240_v12 = vsel %vm224_vm12, %v194_v51, %v232_v62  ;;  %v5324_v44 = vld [vmem:[#allocation2 + $0xc8] sm:$0xff]   ;;  %v5330_v51 = vld [vmem:[#allocation2 + $0x40] sm:$0xff]  }
 0x151   :  { %v5058_v45 = vpop.f32.mrf.mxu0  ;;  %v5342_v62 = vld [vmem:[#allocation2 + $0x28] sm:$0xff]  }
 0x152   :  { %v218_v47 = vadd.f32 %v5058_v45, %v4484_v43  ;;  %vm225_vm9 = vcmp.ge.f32.partialorder %v197_v52, 0.0  ;;  %v233_v63 = vmul.f32 0.2, %v197_v52  ;;  %v243_v3 = vsel %vm227_vm6, %v205_v48, %v235_v57  ;;  %v5327_v45 = vld [vmem:[#allocation2 + $0x100] sm:$0xff]   ;;  %v5336_v57 = vld [vmem:[#allocation2 + $0xb0] sm:$0xff]  }
 0x153   :  { %v209_v49 = vpop.f32.mrf.mxu0  ;;  %v249_v13 = vpack.c.bf16 %v243_v3, %v242_v5  ;;  %v5329_v48 = vld [vmem:[#allocation2 + $0x80] sm:$0xff]   ;;  %v5347_v3 = vld [vmem:[#allocation2 + $0xd8] sm:$0xff]  }
 0x154   :  { %v210_v50 = vadd.f32 %v4484_v43, %v209_v49  ;;  %v238_v54 = vmul.f32 0.2, %v218_v47  ;;  %vm230_vm7 = vcmp.ge.f32.partialorder %v218_v47, 0.0  ;;  %v241_v8 = vsel %vm225_vm9, %v197_v52, %v233_v63  ;;  %v5328_v49 = vld [vmem:[#allocation2 + $0xc0] sm:$0xff]   ;;  %v5333_v52 = vld [vmem:[#allocation2 + $0x78] sm:$0xff]  }
 0x155   :  { %v5059_v53 = vpop.f32.mrf.mxu0  ;;  %v248_v19 = vpack.c.bf16 %v241_v8, %v240_v12  ;;  %v284_v22 = vrot.slane %v249_v13, 2  ;;  %v257_v24 = vrot.slane %v249_v13, 7  ;;  %v270_v28 = vrot.slane %v249_v13, 1  ;;  %v5343_v63 = vld [vmem:[#allocation2 + $0xe0] sm:$0xff]   ;;  %v5349_v5 = vld [vmem:[#allocation2 + $0x58] sm:$0xff]  }
 0x156   :  { %v221_v55 = vadd.f32 %v5059_v53, %v4484_v43  ;;  %v236_v59 = vmul.f32 0.2, %v210_v50  ;;  %vm228_vm10 = vcmp.ge.f32.partialorder %v210_v50, 0.0  ;;  %v246_v0 = vsel %vm230_vm7, %v218_v47, %v238_v54  ;;  %v5318_v47 = vld [vmem:[%s6128_s3 + $0x8] sm:$0xff]   ;;  %v5332_v53 = vld [vmem:[#allocation2 + $0xb8] sm:$0xff]   ;;  %v5335_v54 = vld [vmem:[#allocation2 + $0xf0] sm:$0xff]  }
 0x157   :  { %v212_v58 = vpop.f32.mrf.mxu0  ;;  %v283_v26 = vrot.slane %v248_v19, 2  ;;  %v256_v29 = vrot.slane %v248_v19, 7  ;;  %v269_v31 = vrot.slane %v248_v19, 1 }
 0x158   :  { %vm231_vm8 = vcmp.ge.f32.partialorder %v221_v55, 0.0  ;;  %v239_v60 = vmul.f32 0.2, %v221_v55  ;;  %v213_v61 = vadd.f32 %v4484_v43, %v212_v58  ;;  %v244_v6 = vsel %vm228_vm10, %v210_v50, %v236_v59  ;;  %v5325_v43 = vld [vmem:[#allocation2 + $0x88] sm:$0xff]   ;;  %v5331_v50 = vld [vmem:[#allocation2 + $0xf8] sm:$0xff]   ;;  %v5338_v59 = vld [vmem:[#allocation2 + $0x30] sm:$0xff]  }
 0x159   :  { %v285_v32 = vsel %vm282_vm13, %v283_v26, %v284_v22  ;;  %v258_v33 = vsel %vm60_vm1, %v256_v29, %v257_v24  ;;  %v271_v35 = vsel %vm72_vm0, %v269_v31, %v270_v28  ;;  %v5339_v58 = vld [vmem:[#allocation2 + $0xe8] sm:$0xff]   ;;  %v5351_v31 = vld [vmem:[#allocation2 + $0x150] sm:$0xff]  }
 0x15a   :  { %v247_v1 = vsel %vm231_vm8, %v221_v55, %v239_v60  ;;  %vm229_vm11 = vcmp.ge.f32.partialorder %v213_v61, 0.0  ;;  %v237_v2 = vmul.f32 0.2, %v213_v61  ;;  %v5334_v55 = vld [vmem:[#allocation2 + $0x38] sm:$0xff]   ;;  %v5340_v60 = vld [vmem:[#allocation2 + $0xa8] sm:$0xff]  }
 0x15b   :  { %v251_v4 = vpack.c.bf16 %v247_v1, %v246_v0  ;;  %v5344_v0 = vld [vmem:[#allocation2 + $0xa0] sm:$0xff]  }
 0x15c   :  { %v245_v7 = vsel %vm229_vm11, %v213_v61, %v237_v2  ;;  %v5341_v61 = vld [vmem:[#allocation2 + $0x68] sm:$0xff]   ;;  %v5345_v1 = vld [vmem:[#allocation2 + $0x60] sm:$0xff]  }
 0x15d   :  { %v250_v9 = vpack.c.bf16 %v245_v7, %v244_v6  ;;  %326 = vmatprep.subr.bf16.mxu1 %v251_v4  ;;  %v288_v10 = vrot.slane %v251_v4, 2  ;;  %v274_v11 = vrot.slane %v251_v4, 1  ;;  %v261_v14 = vrot.slane %v251_v4, 7  ;;  %v5346_v2 = vld [vmem:[#allocation2 + $0x20] sm:$0xff]   ;;  %v5348_v4 = vld [vmem:[#allocation2 + $0x98] sm:$0xff]  }
 0x15e   :  { %v5350_v6 = vld [vmem:[#allocation2 + $0x18] sm:$0xff]  }
 0x15f   :  { %4498 = vmatprep.subr.msk.bf16.mxu0 %vm282_vm13, %v288_v10  ;;  %v280_v15 = vsel %vm72_vm0, %v274_v11, 0  ;;  %v259_v16 = vrot.slane %v250_v9, 7  ;;  %v286_v17 = vrot.slane %v250_v9, 2  ;;  %v272_v18 = vrot.slane %v250_v9, 1 }
 0x160   :  { %380 = vmatpush1.bf16.msra.mxu0 %v280_v15 }
 0x161   :  { %v262_v20 = vsel %vm60_vm1, %v259_v16, %v261_v14  ;;  %v289_v21 = vsel %vm282_vm13, %v286_v17, %v288_v10  ;;  %v275_v23 = vsel %vm72_vm0, %v272_v18, %v274_v11  ;;  %v287_v25 = vsel %vm282_vm13, %v284_v22, %v286_v17 }
 0x162   :  { %327 = vmatpush1.bf16.msra.mxu1 %v262_v20  ;;  %381 = vmatprep.subr.bf16.mxu0 %v289_v21  ;;  %v260_v27 = vsel %vm60_vm1, %v257_v24, %v259_v16  ;;  %v273_v30 = vsel %vm72_vm0, %v270_v28, %v272_v18 }
 0x163   :  { %328 = vmatprep.subr.bf16.mxu1 %v250_v9 }
 0x164   :  { %382 = vmatpush1.bf16.msra.mxu0 %v275_v23 }
 0x165   :  { %383 = vmatprep.subr.bf16.mxu0 %v287_v25 }
 0x166   :  { %329 = vmatpush1.bf16.msra.mxu1 %v260_v27 }
 0x167   :  { %330 = vmatprep.subr.bf16.mxu1 %v249_v13 }
 0x168   :  { %384 = vmatpush1.bf16.msra.mxu0 %v273_v30 }
 0x169   :  { %385 = vmatprep.subr.bf16.mxu0 %v285_v32  ;;  %v5352_v32 = vld [vmem:[#allocation2 + $0x148] sm:$0xff]  }
 0x16a   :  { %331 = vmatpush1.bf16.msra.mxu1 %v258_v33  ;;  %v5353_v33 = vld [vmem:[#allocation2 + $0x140] sm:$0xff]  }
 0x16b   :  { %332 = vmatprep.subr.bf16.mxu1 %v248_v19 }
 0x16c   :  { %386 = vmatpush1.bf16.msra.mxu0 %v271_v35  ;;  %v5355_v35 = vld [vmem:[#allocation2 + $0x130] sm:$0xff]  }
 0x16d   :  { %4820 = vmatprep.subr.bf16.mxu0 %v5319_v34  ;;  %v5354_v34 = vld [vmem:[#allocation2 + $0x138] sm:$0xff]  }
 0x16e   :  { %4495 = vmatpush1.bf16.msk.msra.mxu1 %vm5664_vm14, %v256_v29 }
 0x16f   :  { %4499 = vmatmul.mubr.msk.bf16.vlgmr.msra.gmra.mxu0 %vm311_vm15, %v5317_v37  ;;  %4792 = vmatprep.subr.bf16.mxu1 %v5321_v38  ;;  %v5357_v38 = vld [vmem:[#allocation2 + $0x120] sm:$0xff]  }
 0x170   :  { %413 = vmatprep.mubr.bf16.mxu0 %v5571_v39  ;;  %4821 = vmatpush3.bf16.msra.mxu0 %v5320_v40  ;;  %v5358_v40 = vld [vmem:[#allocation2 + $0x118] sm:$0xff]  }
 0x171   :  { %4496 = vmatmul.mubr.msk.bf16.vlgmr.msra.gmra.mxu1 %vm311_vm15, %v5317_v37  ;;  %4822 = vmatprep.subr.bf16.mxu0 %v5323_v41  ;;  %v5356_v37 = vld [vmem:[#allocation2 + $0x128] sm:$0xff]   ;;  %v5359_v41 = vld [vmem:[#allocation2 + $0x170] sm:$0xff]  }
 0x172   :  { %360 = vmatprep.mubr.bf16.mxu1 %v5571_v39  ;;  %4793 = vmatpush3.bf16.msra.mxu1 %v5322_v42  ;;  %v5360_v42 = vld [vmem:[#allocation2 + $0x168] sm:$0xff]  }
 0x173   :  { %4794 = vmatprep.subr.bf16.mxu1 %v5325_v43  ;;  %v5361_v43 = vld [vmem:[#allocation2 + $0x160] sm:$0xff]  }
 0x174   :  { %4823 = vmatpush3.bf16.msra.mxu0 %v5324_v44  ;;  %v5362_v44 = vld [vmem:[#allocation2 + $0x158] sm:$0xff]  }
 0x175   :  { %4824 = vmatprep.subr.bf16.mxu0 %v5327_v45 }
 0x176   :  { %4795 = vmatpush3.bf16.msra.mxu1 %v5326_v46 }
 0x177   :  { %4500 = vmatmul.mubr.msk.bf16.gmra.mxu0 %vm311_vm15, %v5318_v47  ;;  %4796 = vmatprep.subr.bf16.mxu1 %v5329_v48  ;;  %v4501_v48 = vld [vmem:[%s6127_s2 + $0x1] ss:$0 sm:$0xff] }
 0x178   :  { %4825 = vmatpush3.bf16.msra.mxu0 %v5328_v49 }
 0x179   :  { %4497 = vmatmul.mubr.msk.bf16.gmra.mxu1 %vm311_vm15, %v5318_v47  ;;  %4826 = vmatprep.subr.bf16.mxu0 %v5331_v50 }
 0x17a   :  { %4797 = vmatpush3.bf16.msra.mxu1 %v5330_v51 }
 0x17b   :  { %4798 = vmatprep.subr.bf16.mxu1 %v5333_v52 }
 0x17c   :  { %4827 = vmatpush3.bf16.msra.mxu0 %v5332_v53 }
 0x17d   :  { %4828 = vmatprep.subr.bf16.mxu0 %v5335_v54 }
 0x17e   :  { %4799 = vmatpush3.bf16.msra.mxu1 %v5334_v55 }
 0x17f   :  { %4800 = vmatprep.subr.bf16.mxu1 %v5337_v56 }
 0x180   :  { %4829 = vmatpush3.bf16.msra.mxu0 %v5336_v57 }
 0x181   :  { %4830 = vmatprep.subr.bf16.mxu0 %v5339_v58 }
 0x182   :  { %4801 = vmatpush3.bf16.msra.mxu1 %v5338_v59 }
 0x183   :  { %4802 = vmatprep.subr.bf16.mxu1 %v5341_v61 }
 0x184   :  { %4831 = vmatpush3.bf16.msra.mxu0 %v5340_v60 }
 0x185   :  { %4832 = vmatprep.subr.bf16.mxu0 %v5343_v63 }
 0x186   :  { %4803 = vmatpush3.bf16.msra.mxu1 %v5342_v62 }
 0x187   :  { %4804 = vmatprep.subr.bf16.mxu1 %v5345_v1 }
 0x188   :  { %4833 = vmatpush3.bf16.msra.mxu0 %v5344_v0 }
 0x189   :  { %4834 = vmatprep.subr.bf16.mxu0 %v5347_v3 }
 0x18a   :  { %4805 = vmatpush3.bf16.msra.mxu1 %v5346_v2 }
 0x18b   :  { %4806 = vmatprep.subr.bf16.mxu1 %v5349_v5 }
 0x18c   :  { %4835 = vmatpush3.bf16.msra.mxu0 %v5348_v4 }
 0x18e   :  { %4807 = vmatpush3.bf16.msra.mxu1 %v5350_v6 }
 0x18f   :  { %934 = vmatprep.subr.bf16.mxu1 %v5571_v39 }
 0x22f   :  { %v405_v7 = vpop.f32.mrf.mxu0 }
 0x231   :  { %v352_v8 = vpop.f32.mrf.mxu1  ;;  %v407_v9 = vpop.f32.mrf.mxu0 }
 0x233   :  { %v354_v10 = vpop.f32.mrf.mxu1  ;;  %v409_v11 = vpop.f32.mrf.mxu0 }
 0x234   :  { %v426_v15 = vpack.c.bf16 %v409_v11, %v405_v7 }
 0x235   :  { %v356_v12 = vpop.f32.mrf.mxu1  ;;  %v411_v13 = vpop.f32.mrf.mxu0 }
 0x236   :  { %v427_v14 = vpack.c.bf16 %v411_v13, %v407_v9  ;;  %v424_v19 = vpack.c.bf16 %v356_v12, %v352_v8 }
 0x237   :  { %v358_v16 = vpop.f32.mrf.mxu1  ;;  %v415_v17 = vpop.f32.mrf.mxu0 }
 0x238   :  { %v425_v18 = vpack.c.bf16 %v358_v16, %v354_v10  ;;  %774 = vmatprep.mubr.bf16.mxu0 %v427_v14 }
 0x239   :  { %v362_v20 = vpop.f32.mrf.mxu1  ;;  %v417_v21 = vpop.f32.mrf.mxu0  ;;  %775 = vmatmul.mubr.bf16.vlgmr.msra.gmra.mxu0 %v426_v15 }
 0x23a   :  { %725 = vmatprep.mubr.bf16.mxu1 %v425_v18 }
 0x23b   :  { %v364_v22 = vpop.f32.mrf.mxu1  ;;  %v419_v23 = vpop.f32.mrf.mxu0  ;;  %726 = vmatmul.mubr.bf16.vlgmr.msra.gmra.mxu1 %v424_v19 }
 0x23c   :  { %v430_v27 = vpack.c.bf16 %v419_v23, %v415_v17  ;;  %935 = vmatpush1.bf16.msra.mxu1 %v5351_v31 }
 0x23d   :  { %v366_v24 = vpop.f32.mrf.mxu1  ;;  %v421_v25 = vpop.f32.mrf.mxu0  ;;  %936 = vmatprep.subr.bf16.mxu1 %v5571_v39 }
 0x23e   :  { %v431_v26 = vpack.c.bf16 %v421_v25, %v417_v21  ;;  %v428_v30 = vpack.c.bf16 %v366_v24, %v362_v20 }
 0x23f   :  { %v368_v28 = vpop.f32.mrf.mxu1 }
 0x240   :  { %v429_v29 = vpack.c.bf16 %v368_v28, %v364_v22  ;;  %782 = vmatprep.mubr.bf16.mxu0 %v431_v26  ;;  %937 = vmatpush1.bf16.msra.mxu1 %v5352_v32 }
 0x241   :  { %783 = vmatmul.mubr.bf16.gmra.mxu0 %v430_v27  ;;  %938 = vmatprep.subr.bf16.mxu1 %v5571_v39 }
 0x242   :  { %733 = vmatprep.mubr.bf16.mxu1 %v429_v29  ;;  %1062 = vmatprep.mubr.bf16.mxu0 %v5571_v39 }
 0x243   :  { %734 = vmatmul.mubr.bf16.gmra.mxu1 %v428_v30 }
 0x244   :  { %939 = vmatpush1.bf16.msra.mxu1 %v5353_v33 }
 0x245   :  { %940 = vmatprep.subr.bf16.mxu1 %v5571_v39 }
 0x248   :  { %941 = vmatpush1.bf16.msra.mxu1 %v5354_v34 }
 0x249   :  { %942 = vmatprep.subr.bf16.mxu1 %v5571_v39 }
 0x24c   :  { %943 = vmatpush1.bf16.msra.mxu1 %v5355_v35 }
 0x24d   :  { %944 = vmatprep.subr.bf16.mxu1 %v5571_v39 }
 0x250   :  { %945 = vmatpush1.bf16.msra.mxu1 %v5356_v37  ;;  %v5369_v37 = vld [vmem:[#allocation2 + $0x270] sm:$0xff]  }
 0x251   :  { %946 = vmatprep.subr.bf16.mxu1 %v5571_v39 }
 0x254   :  { %947 = vmatpush1.bf16.msra.mxu1 %v5357_v38  ;;  %v5371_v38 = vld [vmem:[#allocation2 + $0x230] sm:$0xff]  }
 0x255   :  { %948 = vmatprep.subr.bf16.mxu1 %v5571_v39 }
 0x258   :  { %949 = vmatpush1.bf16.msra.mxu1 %v5358_v40  ;;  %v5373_v40 = vld [vmem:[#allocation2 + $0x268] sm:$0xff]  }
 0x259   :  { %958 = vmatprep.subr.bf16.mxu1 %v5571_v39 }
 0x25c   :  { %959 = vmatpush2.bf16.msra.mxu1 %v5359_v41  ;;  %v5375_v41 = vld [vmem:[#allocation2 + $0x228] sm:$0xff]  }
 0x25d   :  { %960 = vmatprep.subr.bf16.mxu1 %v5571_v39 }
 0x260   :  { %961 = vmatpush2.bf16.msra.mxu1 %v5360_v42  ;;  %v5377_v42 = vld [vmem:[#allocation2 + $0x260] sm:$0xff]  }
 0x261   :  { %962 = vmatprep.subr.bf16.mxu1 %v5571_v39 }
 0x264   :  { %963 = vmatpush2.bf16.msra.mxu1 %v5361_v43  ;;  %v5379_v43 = vld [vmem:[#allocation2 + $0x220] sm:$0xff]  }
 0x265   :  { %964 = vmatprep.subr.bf16.mxu1 %v5571_v39 }
 0x268   :  { %965 = vmatpush2.bf16.msra.mxu1 %v5362_v44  ;;  %v5381_v44 = vld [vmem:[#allocation2 + $0x258] sm:$0xff]  }
 0x269   :  { %4870 = vmatprep.subr.bf16.mxu1 %v5369_v37  ;;  %v5392_v37 = vld [vmem:[#allocation2 + $0x240] sm:$0xff]  }
 0x2f9   :  { %v4836_v45 = vpop.f32.mrf.mxu0 }
 0x2fb   :  { %v4808_v46 = vpop.f32.mrf.mxu1  ;;  %v4837_v47 = vpop.f32.mrf.mxu0 }
 0x2fc   :  { %v4838_v54 = vadd.f32 %v4837_v47, %v4836_v45  ;;  %v5383_v45 = vld [vmem:[#allocation2 + $0x218] sm:$0xff]  }
 0x2fd   :  { %v4809_v49 = vpop.f32.mrf.mxu1  ;;  %v4839_v50 = vpop.f32.mrf.mxu0 }
 0x2fe   :  { %v4810_v51 = vadd.f32 %v4809_v49, %v4808_v46 }
 0x2ff   :  { %v4811_v52 = vpop.f32.mrf.mxu1  ;;  %v4840_v53 = vpop.f32.mrf.mxu0 }
 0x300   :  { %v728_v55 = vadd.f32 %v4810_v51, %v4501_v48  ;;  %v4841_v62 = vadd.f32 %v4840_v53, %v4839_v50 }
 0x301   :  { %v4812_v56 = vpop.f32.mrf.mxu1  ;;  %v4842_v57 = vpop.f32.mrf.mxu0 }
 0x302   :  { %v777_v58 = vadd.f32 %v4838_v54, %v728_v55  ;;  %v4813_v59 = vadd.f32 %v4812_v56, %v4811_v52 }
 0x303   :  { %v4814_v60 = vpop.f32.mrf.mxu1  ;;  %v4843_v61 = vpop.f32.mrf.mxu0 }
 0x304   :  { %v731_v63 = vadd.f32 %v4813_v59, %v4501_v48  ;;  %v795_v2 = vmul.f32 0.2, %v777_v58  ;;  %vm791_vm4 = vcmp.ge.f32.partialorder %v777_v58, 0.0  ;;  %v4844_v7 = vadd.f32 %v4843_v61, %v4842_v57 }
 0x305   :  { %v4815_v0 = vpop.f32.mrf.mxu1  ;;  %v4845_v1 = vpop.f32.mrf.mxu0 }
 0x306   :  { %v780_v3 = vadd.f32 %v4841_v62, %v731_v63  ;;  %v4816_v4 = vadd.f32 %v4815_v0, %v4814_v60  ;;  %v799_v13 = vsel %vm791_vm4, %v777_v58, %v795_v2 }
 0x307   :  { %v4817_v5 = vpop.f32.mrf.mxu1  ;;  %v4846_v9 = vpop.f32.mrf.mxu0 }
 0x308   :  { %v796_v6 = vmul.f32 0.2, %v780_v3  ;;  %v736_v8 = vadd.f32 %v4816_v4, %v4501_v48  ;;  %vm792_vm5 = vcmp.ge.f32.partialorder %v780_v3, 0.0  ;;  %v4847_v16 = vadd.f32 %v4846_v9, %v4845_v1  ;;  %v5363_v9 = vld [vmem:[%s6128_s3] sm:$0xff]  }
 0x309   :  { %v4818_v10 = vpop.f32.mrf.mxu1 }
 0x30a   :  { %v785_v11 = vadd.f32 %v4844_v7, %v736_v8  ;;  %v4819_v12 = vadd.f32 %v4818_v10, %v4817_v5  ;;  %v800_v14 = vsel %vm792_vm5, %v780_v3, %v796_v6 }
 0x30b   :  { %v803_v15 = vpack.c.bf16 %v800_v14, %v799_v13 }
 0x30c   :  { %v739_v17 = vadd.f32 %v4819_v12, %v4501_v48  ;;  %v797_v18 = vmul.f32 0.2, %v785_v11  ;;  %vm793_vm6 = vcmp.ge.f32.partialorder %v785_v11, 0.0  ;;  %v4534_v48 = vld [vmem:[%s6127_s2 + $0x2] ss:$0 sm:$0xff] }
 0x30d   :  { %817 = vrot.lane.b32.xlu0 %v803_v15, %s5567_s18  ;;  %v812_v24 = vrot.slane %v803_v15, 1  ;;  %v807_v26 = vrot.slane %v803_v15, 7  ;;  %v5364_v15 = vld [vmem:[#allocation2 + $0x1f0] sm:$0xff]  }
 0x30e   :  { %v788_v19 = vadd.f32 %v4847_v16, %v739_v17  ;;  %v801_v21 = vsel %vm793_vm6, %v785_v11, %v797_v18  ;;  %v5365_v17 = vld [vmem:[#allocation2 + $0x1b0] sm:$0xff]   ;;  %v5366_v18 = vld [vmem:[#allocation2 + $0x1e8] sm:$0xff]  }
 0x30f   :  { %v811_v31 = vsel %vm60_vm1, 0, %v807_v26 }
 0x310   :  { %v798_v20 = vmul.f32 0.2, %v788_v19  ;;  %vm794_vm7 = vcmp.ge.f32.partialorder %v788_v19, 0.0 }
 0x312   :  { %v802_v22 = vsel %vm794_vm7, %v788_v19, %v798_v20  ;;  %v5367_v19 = vld [vmem:[#allocation2 + $0x1a8] sm:$0xff]   ;;  %v5368_v20 = vld [vmem:[#allocation2 + $0x1e0] sm:$0xff]   ;;  %vm2086_vm7 = vcmask 1042432  }
 0x313   :  { %v804_v23 = vpack.c.bf16 %v802_v22, %v801_v21  ;;  %v5370_v21 = vld [vmem:[#allocation2 + $0x1a0] sm:$0xff]   ;;  %v5372_v22 = vld [vmem:[#allocation2 + $0x1d8] sm:$0xff]  }
 0x315   :  { %819 = vrot.lane.b32.xlu1 %v804_v23, %s5567_s18  ;;  %v813_v25 = vrot.slane %v804_v23, 1  ;;  %v808_v27 = vrot.slane %v804_v23, 7  ;;  %v5374_v23 = vld [vmem:[#allocation2 + $0x198] sm:$0xff]  }
 0x317   :  { %v814_v28 = vsel %vm72_vm0, %v812_v24, %v813_v25  ;;  %v809_v29 = vsel %vm60_vm1, %v807_v26, %v808_v27  ;;  %v816_v33 = vsel %vm72_vm0, %v813_v25, 0  ;;  %v5376_v24 = vld [vmem:[#allocation2 + $0x1d0] sm:$0xff]   ;;  %v5380_v26 = vld [vmem:[#allocation2 + $0x1c8] sm:$0xff]  }
 0x318   :  { %4547 = vmatprep.mubr.msk.bf16.mxu1 %vm311_vm15, %v814_v28  ;;  %v5378_v25 = vld [vmem:[#allocation2 + $0x190] sm:$0xff]   ;;  %v5382_v27 = vld [vmem:[#allocation2 + $0x188] sm:$0xff]   ;;  %v5384_v28 = vld [vmem:[#allocation2 + $0x1c0] sm:$0xff]  }
 0x37f   :  { %v818_v30 = vpop.permute.xlu0 %817 }
 0x380   :  { %v822_v32 = vsel %vm311_vm15, %v811_v31, %v818_v30  ;;  %v5386_v30 = vld [vmem:[#allocation2 + $0x180] sm:$0xff]   ;;  %v5387_v31 = vld [vmem:[#allocation2 + $0x210] sm:$0xff]  }
 0x381   :  { %967 = vmatmul.mubr.bf16.vlgmr.msra.gmra.mxu1 %v822_v32  ;;  %v5388_v32 = vld [vmem:[#allocation2 + $0x1b8] sm:$0xff]  }
 0x382   :  { %4548 = vmatprep.mubr.msk.bf16.mxu1 %vm311_vm15, %v816_v33  ;;  %4871 = vmatpush3.bf16.msra.mxu1 %v5371_v38  ;;  %v5389_v33 = vld [vmem:[#allocation2 + $0x248] sm:$0xff]   ;;  %v5393_v38 = vld [vmem:[#allocation2 + $0x200] sm:$0xff]  }
 0x383   :  { %4872 = vmatprep.subr.bf16.mxu1 %v5373_v40  ;;  %v5394_v40 = vld [vmem:[#allocation2 + $0x238] sm:$0xff]  }
 0x386   :  { %4873 = vmatpush3.bf16.msra.mxu1 %v5375_v41  ;;  %v5395_v41 = vld [vmem:[#allocation2 + $0x1f8] sm:$0xff]  }
 0x387   :  { %v820_v34 = vpop.permute.xlu1 %819  ;;  %4874 = vmatprep.subr.bf16.mxu1 %v5377_v42 }
 0x388   :  { %v826_v35 = vsel %vm311_vm15, %v809_v29, %v820_v34  ;;  %v5385_v29 = vld [vmem:[#allocation2 + $0x250] sm:$0xff]   ;;  %v5390_v34 = vld [vmem:[#allocation2 + $0x178] sm:$0xff]  }
 0x389   :  { %975 = vmatmul.mubr.bf16.gmra.mxu1 %v826_v35  ;;  %v5391_v35 = vld [vmem:[#allocation2 + $0x208] sm:$0xff]  }
 0x38a   :  { %4875 = vmatpush3.bf16.msra.mxu1 %v5379_v43 }
 0x38b   :  { %4876 = vmatprep.subr.bf16.mxu1 %v5381_v44 }
 0x38e   :  { %4877 = vmatpush3.bf16.msra.mxu1 %v5383_v45 }
 0x38f   :  { %4878 = vmatprep.subr.bf16.mxu1 %v5385_v29 }
 0x392   :  { %4879 = vmatpush3.bf16.msra.mxu1 %v5387_v31  ;;  %v5415_v31 = vld [vmem:[#allocation2 + $0x390] sm:$0xff]  }
 0x393   :  { %4880 = vmatprep.subr.bf16.mxu1 %v5389_v33  ;;  %v5419_v33 = vld [vmem:[#allocation2 + $0x388] sm:$0xff]  }
 0x396   :  { %4881 = vmatpush3.bf16.msra.mxu1 %v5391_v35  ;;  %v5423_v35 = vld [vmem:[#allocation2 + $0x380] sm:$0xff]  }
 0x397   :  { %4882 = vmatprep.subr.bf16.mxu1 %v5392_v37  ;;  %v5425_v37 = vld [vmem:[#allocation2 + $0x3b8] sm:$0xff]  }
 0x39a   :  { %4883 = vmatpush3.bf16.msra.mxu1 %v5393_v38  ;;  %v5427_v38 = vld [vmem:[#allocation2 + $0x378] sm:$0xff]  }
 0x39b   :  { %4884 = vmatprep.subr.bf16.mxu1 %v5394_v40  ;;  %v5429_v40 = vld [vmem:[#allocation2 + $0x3b0] sm:$0xff]  }
 0x39e   :  { %4885 = vmatpush3.bf16.msra.mxu1 %v5395_v41  ;;  %v5431_v41 = vld [vmem:[#allocation2 + $0x370] sm:$0xff]  }
 0x441   :  { %v968_v46 = vpop.f32.mrf.mxu1 }
 0x442   :  { %v969_v52 = vadd.f32 %v4534_v48, %v968_v46 }
 0x443   :  { %v970_v47 = vpop.f32.mrf.mxu1 }
 0x444   :  { %v987_v57 = vmul.f32 0.2, %v969_v52  ;;  %vm983_vm9 = vcmp.ge.f32.partialorder %v969_v52, 0.0 }
 0x445   :  { %v971_v49 = vpop.f32.mrf.mxu1 }
 0x446   :  { %v972_v50 = vadd.f32 %v4534_v48, %v971_v49  ;;  %v991_v63 = vsel %vm983_vm9, %v969_v52, %v987_v57  ;;  %v5399_v57 = vld [vmem:[#allocation2 + $0x298] sm:$0xff]  }
 0x447   :  { %v973_v51 = vpop.f32.mrf.mxu1 }
 0x448   :  { %v988_v54 = vmul.f32 0.2, %v972_v50  ;;  %vm984_vm8 = vcmp.ge.f32.partialorder %v972_v50, 0.0 }
 0x449   :  { %v976_v53 = vpop.f32.mrf.mxu1 }
 0x44a   :  { %v977_v55 = vadd.f32 %v4534_v48, %v976_v53  ;;  %v992_v59 = vsel %vm984_vm8, %v972_v50, %v988_v54  ;;  %v5396_v54 = vld [vmem:[#allocation2 + $0x2b0] sm:$0xff]   ;;  %vm2255_vm8 = vcmask 64512  }
 0x44b   :  { %v978_v56 = vpop.f32.mrf.mxu1  ;;  %v995_v1 = vpack.c.bf16 %v992_v59, %v991_v63  ;;  %v5401_v59 = vld [vmem:[#allocation2 + $0x288] sm:$0xff]  }
 0x44c   :  { %v989_v60 = vmul.f32 0.2, %v977_v55  ;;  %vm985_vm10 = vcmp.ge.f32.partialorder %v977_v55, 0.0  ;;  %v5398_v56 = vld [vmem:[#allocation2 + $0x2a0] sm:$0xff]   ;;  %v5405_v63 = vld [vmem:[#allocation2 + $0x2c8] sm:$0xff]  }
 0x44d   :  { %v979_v58 = vpop.f32.mrf.mxu1  ;;  %v999_v5 = vrot.slane %v995_v1, 7  ;;  %v1013_v11 = vrot.slane %v995_v1, 2  ;;  %v1006_v14 = vrot.slane %v995_v1, 1 }
 0x44e   :  { %v980_v61 = vadd.f32 %v4534_v48, %v979_v58  ;;  %v993_v2 = vsel %vm985_vm10, %v977_v55, %v989_v60  ;;  %v5397_v55 = vld [vmem:[#allocation2 + $0x2a8] sm:$0xff]   ;;  %v5400_v58 = vld [vmem:[#allocation2 + $0x290] sm:$0xff]   ;;  %v5402_v60 = vld [vmem:[#allocation2 + $0x280] sm:$0xff]   ;;  %vm2262_vm10 = vcmask 1043456  }
 0x44f   :  { %v981_v62 = vpop.f32.mrf.mxu1 }
 0x450   :  { %vm986_vm11 = vcmp.ge.f32.partialorder %v980_v61, 0.0  ;;  %v990_v0 = vmul.f32 0.2, %v980_v61  ;;  %v5404_v62 = vld [vmem:[#allocation2 + $0x2d0] sm:$0xff]  }
 0x452   :  { %v994_v3 = vsel %vm986_vm11, %v980_v61, %v990_v0  ;;  %v5403_v61 = vld [vmem:[#allocation2 + $0x278] sm:$0xff]   ;;  %v5406_v0 = vld [vmem:[#allocation2 + $0x2c0] sm:$0xff]  }
 0x453   :  { %v996_v4 = vpack.c.bf16 %v994_v3, %v993_v2 }
 0x455   :  { %1042 = vmatprep.subr.bf16.mxu0 %v996_v4  ;;  %v1000_v6 = vrot.slane %v996_v4, 7  ;;  %v1014_v8 = vrot.slane %v996_v4, 2  ;;  %v1007_v10 = vrot.slane %v996_v4, 1 }
 0x457   :  { %v1001_v7 = vsel %vm60_vm1, %v999_v5, %v1000_v6  ;;  %v1011_v12 = vsel %vm72_vm0, %v1007_v10, 0  ;;  %v1015_v13 = vsel %vm282_vm13, %v1013_v11, %v1014_v8  ;;  %v1008_v16 = vsel %vm72_vm0, %v1006_v14, %v1007_v10  ;;  %v4555_v6 = vld [vmem:[%s6127_s2 + $0x3] ss:$0 sm:$0xff] }
 0x458   :  { %1043 = vmatpush1.bf16.msra.mxu0 %v1001_v7 }
 0x459   :  { %1044 = vmatprep.subr.bf16.mxu0 %v995_v1  ;;  %v5407_v1 = vld [vmem:[#allocation2 + $0x2b8] sm:$0xff]  }
 0x45c   :  { %4551 = vmatpush1.bf16.msk.msra.mxu0 %vm5664_vm14, %v999_v5 }
 0x45d   :  { %4553 = vmatprep.subr.msk.bf16.mxu0 %vm282_vm13, %v1014_v8 }
 0x45f   :  { %4552 = vmatmul.mubr.msk.bf16.vlgmr.msra.gmra.mxu0 %vm112_vm3, %v5363_v9 }
 0x460   :  { %1086 = vmatpush1.bf16.msra.mxu0 %v1011_v12  ;;  %1105 = vmatprep.mubr.bf16.mxu0 %v5571_v39 }
 0x461   :  { %1087 = vmatprep.subr.bf16.mxu0 %v1015_v13 }
 0x464   :  { %1088 = vmatpush1.bf16.msra.mxu0 %v1008_v16 }
 0x465   :  { %4848 = vmatprep.subr.bf16.mxu0 %v5364_v15 }
 0x467   :  { %4554 = vmatmul.mubr.msk.bf16.vlgmr.msra.gmra.mxu0 %vm112_vm3, %v5363_v9 }
 0x468   :  { %4849 = vmatpush3.bf16.msra.mxu0 %v5365_v17 }
 0x469   :  { %4850 = vmatprep.subr.bf16.mxu0 %v5366_v18 }
 0x46c   :  { %4851 = vmatpush3.bf16.msra.mxu0 %v5367_v19 }
 0x46d   :  { %4852 = vmatprep.subr.bf16.mxu0 %v5368_v20 }
 0x470   :  { %4853 = vmatpush3.bf16.msra.mxu0 %v5370_v21 }
 0x471   :  { %4854 = vmatprep.subr.bf16.mxu0 %v5372_v22 }
 0x474   :  { %4855 = vmatpush3.bf16.msra.mxu0 %v5374_v23 }
 0x475   :  { %4856 = vmatprep.subr.bf16.mxu0 %v5376_v24 }
 0x478   :  { %4857 = vmatpush3.bf16.msra.mxu0 %v5378_v25 }
 0x479   :  { %4858 = vmatprep.subr.bf16.mxu0 %v5380_v26 }
 0x47c   :  { %4859 = vmatpush3.bf16.msra.mxu0 %v5382_v27 }
 0x47d   :  { %4860 = vmatprep.subr.bf16.mxu0 %v5384_v28 }
 0x480   :  { %4861 = vmatpush3.bf16.msra.mxu0 %v5386_v30  ;;  %v5413_v30 = vld [vmem:[#allocation2 + $0x3d0] sm:$0xff]  }
 0x481   :  { %4862 = vmatprep.subr.bf16.mxu0 %v5388_v32  ;;  %v5417_v32 = vld [vmem:[#allocation2 + $0x3c8] sm:$0xff]  }
 0x484   :  { %4863 = vmatpush3.bf16.msra.mxu0 %v5390_v34  ;;  %v5421_v34 = vld [vmem:[#allocation2 + $0x3c0] sm:$0xff]  }
 0x485   :  { %1585 = vmatprep.subr.bf16.mxu0 %v5571_v39 }
 0x51f   :  { %v1064_v42 = vpop.f32.mrf.mxu0 }
 0x521   :  { %v1066_v43 = vpop.f32.mrf.mxu0 }
 0x523   :  { %v1068_v44 = vpop.f32.mrf.mxu0 }
 0x524   :  { %v1116_v47 = vpack.c.bf16 %v1068_v44, %v1064_v42  ;;  %v4588_v42 = vld [vmem:[%s6127_s2 + $0x4] ss:$0 sm:$0xff] }
 0x525   :  { %v1070_v45 = vpop.f32.mrf.mxu0 }
 0x526   :  { %v1117_v46 = vpack.c.bf16 %v1070_v45, %v1066_v43 }
 0x527   :  { %v1107_v48 = vpop.f32.mrf.mxu0 }
 0x528   :  { %1413 = vmatprep.mubr.bf16.mxu0 %v1117_v46 }
 0x529   :  { %v1109_v49 = vpop.f32.mrf.mxu0  ;;  %1414 = vmatmul.mubr.bf16.vlgmr.msra.gmra.mxu0 %v1116_v47 }
 0x52a   :  { %1586 = vmatpush1.bf16.msra.mxu0 %v5396_v54 }
 0x52b   :  { %v1111_v50 = vpop.f32.mrf.mxu0  ;;  %1587 = vmatprep.subr.bf16.mxu0 %v5571_v39 }
 0x52c   :  { %v1118_v53 = vpack.c.bf16 %v1111_v50, %v1107_v48 }
 0x52d   :  { %v1113_v51 = vpop.f32.mrf.mxu0 }
 0x52e   :  { %v1119_v52 = vpack.c.bf16 %v1113_v51, %v1109_v49  ;;  %1588 = vmatpush1.bf16.msra.mxu0 %v5397_v55 }
 0x52f   :  { %1589 = vmatprep.subr.bf16.mxu0 %v5571_v39 }
 0x530   :  { %1454 = vmatprep.mubr.bf16.mxu1 %v1119_v52 }
 0x531   :  { %1455 = vmatmul.mubr.bf16.vlgmr.msra.gmra.mxu1 %v1118_v53 }
 0x532   :  { %1682 = vmatprep.mubr.bf16.mxu1 %v5571_v39  ;;  %1590 = vmatpush1.bf16.msra.mxu0 %v5398_v56 }
 0x533   :  { %1591 = vmatprep.subr.bf16.mxu0 %v5571_v39 }
 0x536   :  { %1592 = vmatpush1.bf16.msra.mxu0 %v5399_v57  ;;  %v5753_v57 = vld [vmem:[%s6128_s3] sm:$0xf] }
 0x537   :  { %1593 = vmatprep.subr.bf16.mxu0 %v5571_v39 }
 0x53a   :  { %1594 = vmatpush1.bf16.msra.mxu0 %v5400_v58  ;;  %v5408_v58 = vld [vmem:[#allocation2 + $0x350] sm:$0xff]  }
 0x53b   :  { %1595 = vmatprep.subr.bf16.mxu0 %v5571_v39 }
 0x53e   :  { %1596 = vmatpush1.bf16.msra.mxu0 %v5401_v59 }
 0x53f   :  { %1597 = vmatprep.subr.bf16.mxu0 %v5571_v39 }
 0x542   :  { %1598 = vmatpush1.bf16.msra.mxu0 %v5402_v60  ;;  %v5409_v60 = vld [vmem:[#allocation2 + $0x310] sm:$0xff]  }
 0x543   :  { %1599 = vmatprep.subr.bf16.mxu0 %v5571_v39 }
 0x546   :  { %1600 = vmatpush1.bf16.msra.mxu0 %v5403_v61  ;;  %v5411_v61 = vld [vmem:[#allocation2 + $0x308] sm:$0xff]  }
 0x547   :  { %1609 = vmatprep.subr.bf16.mxu0 %v5571_v39 }
 0x54a   :  { %1610 = vmatpush2.bf16.msra.mxu0 %v5404_v62  ;;  %v5412_v62 = vld [vmem:[#allocation2 + $0x340] sm:$0xff]  }
 0x54b   :  { %1611 = vmatprep.subr.bf16.mxu0 %v5571_v39 }
 0x54e   :  { %1612 = vmatpush2.bf16.msra.mxu0 %v5405_v63  ;;  %v5414_v63 = vld [vmem:[#allocation2 + $0x300] sm:$0xff]  }
 0x54f   :  { %1613 = vmatprep.subr.bf16.mxu0 %v5571_v39 }
 0x552   :  { %1614 = vmatpush2.bf16.msra.mxu0 %v5406_v0  ;;  %v5416_v0 = vld [vmem:[#allocation2 + $0x338] sm:$0xff]  }
 0x553   :  { %1615 = vmatprep.subr.bf16.mxu0 %v5571_v39 }
 0x556   :  { %1616 = vmatpush2.bf16.msra.mxu0 %v5407_v1  ;;  %v5418_v1 = vld [vmem:[#allocation2 + $0x2f8] sm:$0xff]  }
 0x557   :  { %4914 = vmatprep.subr.bf16.mxu0 %v5413_v30  ;;  %v5442_v30 = vld [vmem:[#allocation2 + $0x400] sm:$0xff]  }
 0x5e9   :  { %v4864_v2 = vpop.f32.mrf.mxu0 }
 0x5eb   :  { %v4865_v3 = vpop.f32.mrf.mxu0 }
 0x5ec   :  { %v4866_v5 = vadd.f32 %v4865_v3, %v4864_v2  ;;  %v5420_v2 = vld [vmem:[#allocation2 + $0x330] sm:$0xff]  }
 0x5ed   :  { %v4867_v4 = vpop.f32.mrf.mxu0  ;;  %v5422_v3 = vld [vmem:[#allocation2 + $0x2f0] sm:$0xff]  }
 0x5ee   :  { %v1416_v10 = vadd.f32 %v4866_v5, %v4555_v6  ;;  %v5426_v5 = vld [vmem:[#allocation2 + $0x2e8] sm:$0xff]  }
 0x5ef   :  { %v4868_v7 = vpop.f32.mrf.mxu0 }
 0x5f0   :  { %v4869_v11 = vadd.f32 %v4868_v7, %v4867_v4  ;;  %v5424_v4 = vld [vmem:[#allocation2 + $0x328] sm:$0xff]   ;;  %v5430_v7 = vld [vmem:[#allocation2 + $0x2e0] sm:$0xff]  }
 0x5f1   :  { %v4886_v8 = vpop.f32.mrf.mxu1 }
 0x5f2   :  { %v1419_v16 = vadd.f32 %v4869_v11, %v4555_v6  ;;  %v5428_v6 = vld [vmem:[#allocation2 + $0x320] sm:$0xff]   ;;  %v5435_v11 = vld [vmem:[#allocation2 + $0x368] sm:$0xff]  }
 0x5f3   :  { %v4887_v9 = vpop.f32.mrf.mxu1 }
 0x5f4   :  { %v4888_v12 = vadd.f32 %v4887_v9, %v4886_v8  ;;  %v5432_v8 = vld [vmem:[#allocation2 + $0x318] sm:$0xff]   ;;  %v5433_v9 = vld [vmem:[#allocation2 + $0x3a8] sm:$0xff]  }
 0x5f5   :  { %v4889_v13 = vpop.f32.mrf.mxu1 }
 0x5f6   :  { %v1457_v14 = vadd.f32 %v4888_v12, %v1416_v10  ;;  %v5434_v10 = vld [vmem:[#allocation2 + $0x2d8] sm:$0xff]   ;;  %v5436_v12 = vld [vmem:[#allocation2 + $0x3a0] sm:$0xff]  }
 0x5f7   :  { %v4890_v15 = vpop.f32.mrf.mxu1 }
 0x5f8   :  { %v4891_v17 = vadd.f32 %v4890_v15, %v4889_v13  ;;  %v1465_v18 = vmul.f32 0.2, %v1457_v14  ;;  %vm1463_vm12 = vcmp.ge.f32.partialorder %v1457_v14, 0.0  ;;  %v5437_v13 = vld [vmem:[#allocation2 + $0x360] sm:$0xff]   ;;  %v5439_v15 = vld [vmem:[#allocation2 + $0x358] sm:$0xff]  }
 0x5fa   :  { %v1460_v19 = vadd.f32 %v4891_v17, %v1419_v16  ;;  %v1467_v21 = vsel %vm1463_vm12, %v1457_v14, %v1465_v18  ;;  %v5438_v14 = vld [vmem:[#allocation2 + $0x398] sm:$0xff]  }
 0x5fc   :  { %vm1464_vm4 = vcmp.ge.f32.partialorder %v1460_v19, 0.0  ;;  %v1466_v20 = vmul.f32 0.2, %v1460_v19 }
 0x5fe   :  { %v1468_v22 = vsel %vm1464_vm4, %v1460_v19, %v1466_v20 }
 0x5ff   :  { %v1469_v23 = vpack.c.bf16 %v1468_v22, %v1467_v21 }
 0x601   :  { %1477 = vrot.lane.b32.xlu0 %v1469_v23, %s5567_s18  ;;  %v1474_v24 = vrot.slane %v1469_v23, 1  ;;  %v1471_v26 = vrot.slane %v1469_v23, 7 }
 0x603   :  { %v1476_v25 = vsel %vm72_vm0, %v1474_v24, 0  ;;  %v1473_v28 = vsel %vm60_vm1, 0, %v1471_v26 }
 0x604   :  { %4601 = vmatprep.mubr.msk.bf16.mxu0 %vm311_vm15, %v1476_v25 }
 0x673   :  { %v1478_v27 = vpop.permute.xlu0 %1477 }
 0x674   :  { %v1480_v29 = vsel %vm311_vm15, %v1473_v28, %v1478_v27  ;;  %v5440_v28 = vld [vmem:[#allocation2 + $0x410] sm:$0xff]  }
 0x675   :  { %1618 = vmatmul.mubr.bf16.vlgmr.msra.gmra.mxu0 %v1480_v29  ;;  %v5441_v29 = vld [vmem:[#allocation2 + $0x408] sm:$0xff]  }
 0x676   :  { %4915 = vmatpush3.bf16.msra.mxu0 %v5415_v31  ;;  %v5443_v31 = vld [vmem:[#allocation2 + $0x3f8] sm:$0xff]  }
 0x677   :  { %4916 = vmatprep.subr.bf16.mxu0 %v5417_v32  ;;  %v5444_v32 = vld [vmem:[#allocation2 + $0x3f0] sm:$0xff]  }
 0x67a   :  { %4917 = vmatpush3.bf16.msra.mxu0 %v5419_v33  ;;  %v5445_v33 = vld [vmem:[#allocation2 + $0x3e8] sm:$0xff]  }
 0x67b   :  { %4918 = vmatprep.subr.bf16.mxu0 %v5421_v34  ;;  %v5446_v34 = vld [vmem:[#allocation2 + $0x3e0] sm:$0xff]  }
 0x67e   :  { %4919 = vmatpush3.bf16.msra.mxu0 %v5423_v35  ;;  %v5447_v35 = vld [vmem:[#allocation2 + $0x3d8] sm:$0xff]  }
 0x67f   :  { %4920 = vmatprep.subr.bf16.mxu0 %v5425_v37  ;;  %v5448_v37 = vld [vmem:[#allocation2 + $0x430] sm:$0xff]  }
 0x682   :  { %4921 = vmatpush3.bf16.msra.mxu0 %v5427_v38  ;;  %v5449_v38 = vld [vmem:[#allocation2 + $0x428] sm:$0xff]  }
 0x683   :  { %4922 = vmatprep.subr.bf16.mxu0 %v5429_v40  ;;  %v5450_v40 = vld [vmem:[#allocation2 + $0x420] sm:$0xff]  }
 0x686   :  { %4923 = vmatpush3.bf16.msra.mxu0 %v5431_v41  ;;  %v5451_v41 = vld [vmem:[#allocation2 + $0x418] sm:$0xff]  }
 0x687   :  { %4924 = vmatprep.subr.bf16.mxu0 %v5433_v9 }
 0x68a   :  { %4925 = vmatpush3.bf16.msra.mxu0 %v5435_v11  ;;  %v5453_v11 = vld [vmem:[%s6128_s3 + $0x28] sm:$0xff]  }
 0x68b   :  { %4926 = vmatprep.subr.bf16.mxu0 %v5436_v12  ;;  %v5454_v12 = vld [vmem:[#allocation2 + $0x470] sm:$0xff]  }
 0x68e   :  { %4927 = vmatpush3.bf16.msra.mxu0 %v5437_v13  ;;  %v5455_v13 = vld [vmem:[#allocation2 + $0x468] sm:$0xff]  }
 0x68f   :  { %4928 = vmatprep.subr.bf16.mxu0 %v5438_v14  ;;  %v5456_v14 = vld [vmem:[#allocation2 + $0x460] sm:$0xff]  }
 0x692   :  { %4929 = vmatpush3.bf16.msra.mxu0 %v5439_v15  ;;  %v5457_v15 = vld [vmem:[#allocation2 + $0x458] sm:$0xff]  }
 0x735   :  { %v1619_v43 = vpop.f32.mrf.mxu0 }
 0x736   :  { %v1620_v44 = vadd.f32 %v4588_v42, %v1619_v43 }
 0x737   :  { %v1621_v45 = vpop.f32.mrf.mxu0 }
 0x738   :  { %v1628_v47 = vmul.f32 0.2, %v1620_v44  ;;  %vm1626_vm5 = vcmp.ge.f32.partialorder %v1620_v44, 0.0 }
 0x739   :  { %v1622_v46 = vpop.f32.mrf.mxu0 }
 0x73a   :  { %v1623_v48 = vadd.f32 %v4588_v42, %v1622_v46  ;;  %v1630_v51 = vsel %vm1626_vm5, %v1620_v44, %v1628_v47  ;;  %v4607_v47 = vld [vmem:[%s6127_s2 + $0x5] ss:$0 sm:$0xff] }
 0x73b   :  { %v1624_v49 = vpop.f32.mrf.mxu0 }
 0x73c   :  { %vm1627_vm6 = vcmp.ge.f32.partialorder %v1623_v48, 0.0  ;;  %v1629_v50 = vmul.f32 0.2, %v1623_v48 }
 0x73e   :  { %v1631_v52 = vsel %vm1627_vm6, %v1623_v48, %v1629_v50  ;;  %vm2592_vm6 = vcmask 785408  }
 0x73f   :  { %v1632_v53 = vpack.c.bf16 %v1631_v52, %v1630_v51 }
 0x741   :  { %1664 = vmatprep.subr.bf16.mxu1 %v1632_v53  ;;  %v1634_v54 = vrot.slane %v1632_v53, 7  ;;  %v1642_v55 = vrot.slane %v1632_v53, 2  ;;  %v1638_v56 = vrot.slane %v1632_v53, 1 }
 0x743   :  { %4603 = vmatpush1.bf16.msk.msra.mxu1 %vm5664_vm14, %v1634_v54  ;;  %v1640_v59 = vsel %vm72_vm0, %v1638_v56, 0 }
 0x744   :  { %4605 = vmatprep.subr.msk.bf16.mxu1 %vm282_vm13, %v1642_v55 }
 0x746   :  { %4604 = vmatmul.mubr.msk.bf16.vlgmr.msra.gmra.mxu1 %vm100_vm2, %v5753_v57 }
 0x747   :  { %1706 = vmatpush1.bf16.msra.mxu1 %v1640_v59  ;;  %1723 = vmatprep.mubr.bf16.mxu1 %v5571_v39 }
 0x748   :  { %4892 = vmatprep.subr.bf16.mxu1 %v5408_v58 }
 0x74e   :  { %4606 = vmatmul.mubr.msk.bf16.vlgmr.msra.gmra.mxu1 %vm100_vm2, %v5753_v57 }
 0x74f   :  { %4893 = vmatpush3.bf16.msra.mxu1 %v5409_v60 }
 0x750   :  { %4894 = vmatprep.subr.bf16.mxu1 %v5410_v36 }
 0x753   :  { %4895 = vmatpush3.bf16.msra.mxu1 %v5411_v61 }
 0x754   :  { %4896 = vmatprep.subr.bf16.mxu1 %v5412_v62 }
 0x757   :  { %4897 = vmatpush3.bf16.msra.mxu1 %v5414_v63 }
 0x758   :  { %4898 = vmatprep.subr.bf16.mxu1 %v5416_v0  ;;  %v5452_v0 = vld [vmem:[%s6128_s3 + $0x20] sm:$0xff]  }
 0x75b   :  { %4899 = vmatpush3.bf16.msra.mxu1 %v5418_v1  ;;  %v4640_v1 = vld [vmem:[%s6127_s2 + $0x6] ss:$0 sm:$0xff] }
 0x75c   :  { %4900 = vmatprep.subr.bf16.mxu1 %v5420_v2 }
 0x75f   :  { %4901 = vmatpush3.bf16.msra.mxu1 %v5422_v3 }
 0x760   :  { %4902 = vmatprep.subr.bf16.mxu1 %v5424_v4 }
 0x763   :  { %4903 = vmatpush3.bf16.msra.mxu1 %v5426_v5 }
 0x764   :  { %4904 = vmatprep.subr.bf16.mxu1 %v5428_v6 }
 0x767   :  { %4905 = vmatpush3.bf16.msra.mxu1 %v5430_v7 }
 0x768   :  { %4906 = vmatprep.subr.bf16.mxu1 %v5432_v8 }
 0x76b   :  { %4907 = vmatpush3.bf16.msra.mxu1 %v5434_v10 }
 0x76c   :  { %2197 = vmatprep.subr.bf16.mxu1 %v5571_v39 }
 0x806   :  { %v1684_v16 = vpop.f32.mrf.mxu1 }
 0x807   :  { %v1732_v19 = vpack.c.bf16 %v1684_v16, %v1684_v16  ;;  %v5458_v16 = vld [vmem:[#allocation2 + $0x450] sm:$0xff]  }
 0x808   :  { %v1686_v17 = vpop.f32.mrf.mxu1 }
 0x809   :  { %v1733_v18 = vpack.c.bf16 %v1686_v17, %v1686_v17  ;;  %v5459_v17 = vld [vmem:[#allocation2 + $0x448] sm:$0xff]  }
 0x80a   :  { %v1688_v20 = vpop.f32.mrf.mxu1 }
 0x80b   :  { %2029 = vmatprep.mubr.bf16.mxu1 %v1733_v18  ;;  %v5460_v18 = vld [vmem:[#allocation2 + $0x440] sm:$0xff]   ;;  %v5462_v20 = vld [vmem:[#allocation2 + $0x490] sm:$0xff]  }
 0x80c   :  { %v1689_v21 = vpop.f32.mrf.mxu1  ;;  %2030 = vmatmul.mubr.bf16.vlgmr.msra.gmra.mxu1 %v1732_v19  ;;  %v5461_v19 = vld [vmem:[#allocation2 + $0x438] sm:$0xff]  }
 0x80d   :  { %2198 = vmatpush1.bf16.msra.mxu1 %v5440_v28  ;;  %v5463_v21 = vld [vmem:[#allocation2 + $0x488] sm:$0xff]  }
 0x80e   :  { %v1725_v22 = vpop.f32.mrf.mxu1  ;;  %2199 = vmatprep.subr.bf16.mxu1 %v5571_v39 }
 0x80f   :  { %v1734_v25 = vpack.c.bf16 %v1725_v22, %v1725_v22  ;;  %v5464_v22 = vld [vmem:[#allocation2 + $0x480] sm:$0xff]  }
 0x810   :  { %v1727_v23 = vpop.f32.mrf.mxu1 }
 0x811   :  { %v1735_v24 = vpack.c.bf16 %v1727_v23, %v1727_v23  ;;  %2200 = vmatpush1.bf16.msra.mxu1 %v5441_v29  ;;  %v5465_v23 = vld [vmem:[#allocation2 + $0x478] sm:$0xff]  }
 0x812   :  { %v1729_v26 = vpop.f32.mrf.mxu1  ;;  %2201 = vmatprep.subr.bf16.mxu1 %v5571_v39 }
 0x813   :  { %2069 = vmatprep.mubr.bf16.mxu0 %v1735_v24 }
 0x814   :  { %v1730_v27 = vpop.f32.mrf.mxu1  ;;  %2070 = vmatmul.mubr.bf16.vlgmr.msra.gmra.mxu0 %v1734_v25 }
 0x815   :  { %2202 = vmatpush1.bf16.msra.mxu1 %v5442_v30  ;;  %5062 = vmatprep.mubr.msk.bf16.mxu0 %vm2255_vm8, %v5452_v0 }
 0x816   :  { %2203 = vmatprep.subr.bf16.mxu1 %v5571_v39 }
 0x819   :  { %2204 = vmatpush1.bf16.msra.mxu1 %v5443_v31 }
 0x81a   :  { %2205 = vmatprep.subr.bf16.mxu1 %v5571_v39 }
 0x81d   :  { %2206 = vmatpush1.bf16.msra.mxu1 %v5444_v32 }
 0x81e   :  { %2207 = vmatprep.subr.bf16.mxu1 %v5571_v39 }
 0x821   :  { %2208 = vmatpush1.bf16.msra.mxu1 %v5445_v33 }
 0x822   :  { %2209 = vmatprep.subr.bf16.mxu1 %v5571_v39 }
 0x825   :  { %2210 = vmatpush1.bf16.msra.mxu1 %v5446_v34 }
 0x826   :  { %2211 = vmatprep.subr.bf16.mxu1 %v5571_v39 }
 0x829   :  { %2212 = vmatpush1.bf16.msra.mxu1 %v5447_v35 }
 0x82a   :  { %2221 = vmatprep.subr.bf16.mxu1 %v5571_v39 }
 0x82d   :  { %2222 = vmatpush2.bf16.msra.mxu1 %v5448_v37 }
 0x82e   :  { %2223 = vmatprep.subr.bf16.mxu1 %v5571_v39 }
 0x831   :  { %2224 = vmatpush2.bf16.msra.mxu1 %v5449_v38 }
 0x832   :  { %2225 = vmatprep.subr.bf16.mxu1 %v5571_v39 }
 0x835   :  { %2226 = vmatpush2.bf16.msra.mxu1 %v5450_v40 }
 0x836   :  { %2227 = vmatprep.subr.bf16.mxu1 %v5571_v39 }
 0x839   :  { %2228 = vmatpush2.bf16.msra.mxu1 %v5451_v41 }
 0x8cc   :  { %v4908_v42 = vpop.f32.mrf.mxu1 }
 0x8ce   :  { %v4909_v43 = vpop.f32.mrf.mxu1 }
 0x8cf   :  { %v4910_v46 = vadd.f32 %v4909_v43, %v4908_v42  ;;  %v5466_v43 = vld [vmem:[#allocation2 + $0x4c0] sm:$0xff]  }
 0x8d0   :  { %v4911_v44 = vpop.f32.mrf.mxu1  ;;  %5066 = vmatprep.subr.bf16.mxu1 %v5466_v43 }
 0x8d1   :  { %v2032_v50 = vadd.f32 %v4910_v46, %v4607_v47  ;;  %v5467_v44 = vld [vmem:[#allocation2 + $0x4b8] sm:$0xff]   ;;  %v4658_v46 = vld [vmem:[%s6127_s2 + $0x7] ss:$0 sm:$0xff]  ;;  %v5469_v47 = vld [vmem:[#allocation2 + $0x4a8] sm:$0xff]  }
 0x8d2   :  { %v4912_v45 = vpop.f32.mrf.mxu1 }
 0x8d3   :  { %v5468_v45 = vld [vmem:[#allocation2 + $0x4b0] sm:$0xff]  }
 0x8d4   :  { %v4930_v48 = vpop.f32.mrf.mxu0 }
 0x8d6   :  { %v4931_v49 = vpop.f32.mrf.mxu0 }
 0x8d7   :  { %v4932_v51 = vadd.f32 %v4931_v49, %v4930_v48  ;;  %v5470_v48 = vld [vmem:[#allocation2 + $0x4a0] sm:$0xff]  }
 0x8d8   :  { %v4933_v52 = vpop.f32.mrf.mxu0 }
 0x8d9   :  { %v2072_v53 = vadd.f32 %v4932_v51, %v2032_v50 }
 0x8da   :  { %v4934_v54 = vpop.f32.mrf.mxu0 }
 0x8db   :  { %v2078_v55 = vmul.f32 0.2, %v2072_v53  ;;  %vm2077_vm14 = vcmp.ge.f32.partialorder %v2072_v53, 0.0 }
 0x8dd   :  { %v2079_v56 = vsel %vm2077_vm14, %v2072_v53, %v2078_v55 }
 0x8de   :  { %v2080_v58 = vpack.c.bf16 %v2079_v56, %v2079_v56 }
 0x8e0   :  { %2089 = vrot.lane.b32.xlu1 %v2080_v58, %s5567_s18  ;;  %v2085_v59 = vrot.slane %v2080_v58, 1  ;;  %v2082_v36 = vrot.slane %v2080_v58, 7  ;;  %v5471_v58 = vld [vmem:[#allocation2 + $0x498] sm:$0xff]  }
 0x8e2   :  { %v2088_v60 = vsel %vm2086_vm7, %v2085_v59, 0  ;;  %v2084_v62 = vsel %vm60_vm1, 0, %v2082_v36 }
 0x8e3   :  { %4653 = vmatprep.mubr.msk.bf16.mxu1 %vm311_vm15, %v2088_v60 }
 0x952   :  { %v2090_v61 = vpop.permute.xlu1 %2089 }
 0x953   :  { %v2092_v63 = vsel %vm311_vm15, %v2084_v62, %v2090_v61 }
 0x954   :  { %2230 = vmatmul.mubr.bf16.vlgmr.msra.gmra.mxu1 %v2092_v63 }
 0x955   :  { %5067 = vmatpush3.bf16.msra.mxu1 %v5466_v43 }
 0x956   :  { %5068 = vmatprep.subr.bf16.mxu1 %v5467_v44 }
 0x959   :  { %5069 = vmatpush3.bf16.msra.mxu1 %v5467_v44 }
 0x95a   :  { %5070 = vmatprep.subr.bf16.mxu1 %v5468_v45 }
 0x95d   :  { %5071 = vmatpush3.bf16.msra.mxu1 %v5468_v45 }
 0x95e   :  { %5072 = vmatprep.subr.bf16.mxu1 %v5469_v47 }
 0x961   :  { %5073 = vmatpush3.bf16.msra.mxu1 %v5469_v47 }
 0x962   :  { %5074 = vmatprep.subr.bf16.mxu1 %v5470_v48 }
 0x965   :  { %5075 = vmatpush3.bf16.msra.mxu1 %v5470_v48 }
 0x966   :  { %5076 = vmatprep.subr.bf16.mxu1 %v5471_v58 }
 0x969   :  { %5077 = vmatpush3.bf16.msra.mxu1 %v5471_v58  ;;  %v5474_v58 = vld [vmem:[#allocation2 + $0x4f0] sm:$0xff]  }
 0xa14   :  { %v2231_v2 = vpop.f32.mrf.mxu1 }
 0xa15   :  { %v2232_v3 = vadd.f32 %v4640_v1, %v2231_v2 }
 0xa16   :  { %v2233_v4 = vpop.f32.mrf.mxu1 }
 0xa17   :  { %vm2237_vm9 = vcmp.ge.f32.partialorder %v2232_v3, 0.0  ;;  %v2238_v5 = vmul.f32 0.2, %v2232_v3 }
 0xa18   :  { %v2234_v6 = vpop.f32.mrf.mxu1 }
 0xa19   :  { %v2239_v7 = vsel %vm2237_vm9, %v2232_v3, %v2238_v5 }
 0xa1a   :  { %v2240_v8 = vpack.c.bf16 %v2239_v7, %v2239_v7  ;;  %v2235_v9 = vpop.f32.mrf.mxu1 }
 0xa1c   :  { %5300 = vmatprep.subr.msk.bf16.mxu0 %vm2262_vm10, %v2240_v8  ;;  %v2264_v10 = vsel %vm2262_vm10, %v2240_v8, 0 }
 0xa1d   :  { %5061 = vmatpush3.bf16.msra.mxu0 %v2264_v10 }
 0xa1e   :  { %2446 = vmatprep.subr.bf16.mxu0 %v5571_v39 }
 0xa20   :  { %5063 = vmatmul.mubr.msk.bf16.vlgmr.msra.gmra.mxu0 %vm2255_vm8, %v5453_v11 }
 0xa21   :  { %2447 = vmatpush1.bf16.msra.mxu0 %v5454_v12 }
 0xa22   :  { %2448 = vmatprep.subr.bf16.mxu0 %v5571_v39 }
 0xa25   :  { %2449 = vmatpush1.bf16.msra.mxu0 %v5455_v13 }
 0xa26   :  { %2450 = vmatprep.subr.bf16.mxu0 %v5571_v39 }
 0xa29   :  { %2451 = vmatpush1.bf16.msra.mxu0 %v5456_v14 }
 0xa2a   :  { %2452 = vmatprep.subr.bf16.mxu0 %v5571_v39 }
 0xa2d   :  { %2453 = vmatpush1.bf16.msra.mxu0 %v5457_v15 }
 0xa2e   :  { %2454 = vmatprep.subr.bf16.mxu0 %v5571_v39 }
 0xa31   :  { %2455 = vmatpush1.bf16.msra.mxu0 %v5458_v16 }
 0xa32   :  { %2456 = vmatprep.subr.bf16.mxu0 %v5571_v39 }
 0xa35   :  { %2457 = vmatpush1.bf16.msra.mxu0 %v5459_v17 }
 0xa36   :  { %2458 = vmatprep.subr.bf16.mxu0 %v5571_v39 }
 0xa39   :  { %2459 = vmatpush1.bf16.msra.mxu0 %v5460_v18 }
 0xa3a   :  { %2460 = vmatprep.subr.bf16.mxu0 %v5571_v39 }
 0xa3d   :  { %2461 = vmatpush1.bf16.msra.mxu0 %v5461_v19 }
 0xa3e   :  { %2470 = vmatprep.subr.bf16.mxu0 %v5571_v39 }
 0xa41   :  { %2471 = vmatpush2.bf16.msra.mxu0 %v5462_v20 }
 0xa42   :  { %2472 = vmatprep.subr.bf16.mxu0 %v5571_v39 }
 0xa45   :  { %2473 = vmatpush2.bf16.msra.mxu0 %v5463_v21 }
 0xa46   :  { %2474 = vmatprep.subr.bf16.mxu0 %v5571_v39 }
 0xa49   :  { %2475 = vmatpush2.bf16.msra.mxu0 %v5464_v22 }
 0xa4a   :  { %2476 = vmatprep.subr.bf16.mxu0 %v5571_v39 }
 0xa4d   :  { %2477 = vmatpush2.bf16.msra.mxu0 %v5465_v23 }
 0xae0   :  { %v5064_v24 = vpop.f32.mrf.mxu0 }
 0xae2   :  { %v2300_v25 = vpop.f32.mrf.mxu0 }
 0xae4   :  { %v5065_v26 = vpop.f32.mrf.mxu0 }
 0xae5   :  { %v2316_v27 = vpack.c.bf16 %v5065_v26, %v5064_v24  ;;  %v4673_v24 = vld [vmem:[%s6127_s2 + $0x8] ss:$0 sm:$0xff] }
 0xae6   :  { %v2303_v28 = vpop.f32.mrf.mxu0 }
 0xae7   :  { %v2315_v29 = vpack.c.bf16 %v2303_v28, %v2300_v25  ;;  %2331 = vrot.lane.b32.xlu1 %v2316_v27, %s5567_s18  ;;  %v2320_v30 = vrot.slane %v2316_v27, 7  ;;  %v2325_v31 = vrot.slane %v2316_v27, 1 }
 0xae9   :  { %v2319_v32 = vrot.slane %v2315_v29, 7  ;;  %v2324_v33 = vrot.slane %v2315_v29, 1  ;;  %2329 = vrot.lane.b32.xlu0 %v2315_v29, %s5567_s18  ;;  %v2328_v40 = vsel %vm72_vm0, %v2325_v31, 0 }
 0xaeb   :  { %v2326_v34 = vsel %vm72_vm0, %v2324_v33, %v2325_v31  ;;  %v2321_v39 = vsel %vm60_vm1, %v2319_v32, %v2320_v30  ;;  %v2323_v37 = vsel %vm60_vm1, 0, %v2319_v32  ;;  %v5572_v30 = vmov 0.0  }
 0xaec   :  { %4671 = vmatprep.mubr.msk.bf16.mxu0 %vm311_vm15, %v2326_v34  ;;  %5082 = vmatprep.subr.bf16.mxu1 %v5572_v30 }
 0xaed   :  { %5090 = vmatprep.subr.bf16.mxu0 %v5572_v30 }
 0xb59   :  { %v2332_v41 = vpop.permute.xlu1 %2331 }
 0xb5a   :  { %v2338_v42 = vsel %vm311_vm15, %v2321_v39, %v2332_v41 }
 0xb5b   :  { %v2330_v35 = vpop.permute.xlu0 %2329 }
 0xb5c   :  { %v2334_v38 = vsel %vm311_vm15, %v2323_v37, %v2330_v35 }
 0xb5d   :  { %2479 = vmatmul.mubr.bf16.vlgmr.msra.gmra.mxu0 %v2334_v38 }
 0xb5e   :  { %4672 = vmatprep.mubr.msk.bf16.mxu0 %vm311_vm15, %v2328_v40 }
 0xb65   :  { %2487 = vmatmul.mubr.bf16.gmra.mxu0 %v2338_v42 }
 0xc1d   :  { %v2480_v49 = vpop.f32.mrf.mxu0 }
 0xc1e   :  { %v2481_v50 = vadd.f32 %v4658_v46, %v2480_v49  ;;  %v5472_v49 = vld [vmem:[#allocation2 + $0x500] sm:$0xff]  }
 0xc1f   :  { %v2482_v51 = vpop.f32.mrf.mxu0  ;;  %5091 = vmatpush3.bf16.msra.mxu0 %v5472_v49  ;;  %v5482_v49 = vld [vmem:[#allocation2 + $0x530] sm:$0xff]  }
 0xc20   :  { %v2499_v53 = vmul.f32 0.2, %v2481_v50  ;;  %vm2495_vm11 = vcmp.ge.f32.partialorder %v2481_v50, 0.0  ;;  %5092 = vmatprep.subr.bf16.mxu0 %v5572_v30 }
 0xc21   :  { %v2483_v52 = vpop.f32.mrf.mxu0 }
 0xc22   :  { %v2484_v54 = vadd.f32 %v4658_v46, %v2483_v52  ;;  %v2503_v36 = vsel %vm2495_vm11, %v2481_v50, %v2499_v53  ;;  %v5473_v53 = vld [vmem:[#allocation2 + $0x4f8] sm:$0xff]  }
 0xc23   :  { %v2485_v55 = vpop.f32.mrf.mxu0  ;;  %5093 = vmatpush3.bf16.msra.mxu0 %v5473_v53  ;;  %v5487_v53 = vld [vmem:[#allocation2 + $0x508] sm:$0xff]  }
 0xc24   :  { %vm2496_vm12 = vcmp.ge.f32.partialorder %v2484_v54, 0.0  ;;  %v2500_v56 = vmul.f32 0.2, %v2484_v54  ;;  %5094 = vmatprep.subr.bf16.mxu0 %v5572_v30 }
 0xc25   :  { %v2488_v59 = vpop.f32.mrf.mxu0 }
 0xc26   :  { %v2489_v60 = vadd.f32 %v4658_v46, %v2488_v59  ;;  %v2504_v61 = vsel %vm2496_vm12, %v2484_v54, %v2500_v56 }
 0xc27   :  { %v2490_v62 = vpop.f32.mrf.mxu0  ;;  %v2507_v63 = vpack.c.bf16 %v2504_v61, %v2503_v36  ;;  %5095 = vmatpush3.bf16.msra.mxu0 %v5474_v58  ;;  %v5476_v36 = vld [vmem:[#allocation2 + $0x4e0] sm:$0xff]   ;;  %v5477_v61 = vld [vmem:[#allocation2 + $0x4d8] sm:$0xff]  }
 0xc28   :  { %v2501_v1 = vmul.f32 0.2, %v2489_v60  ;;  %vm2497_vm4 = vcmp.ge.f32.partialorder %v2489_v60, 0.0  ;;  %5096 = vmatprep.subr.bf16.mxu0 %v5572_v30 }
 0xc29   :  { %2521 = vrot.lane.b32.xlu0 %v2507_v63, %s5570_s30  ;;  %v2491_v0 = vpop.f32.mrf.mxu0  ;;  %v2516_v8 = vrot.slane %v2507_v63, 1  ;;  %v2511_v10 = vrot.slane %v2507_v63, 7 }
 0xc2a   :  { %v2492_v2 = vadd.f32 %v4658_v46, %v2491_v0  ;;  %v2505_v5 = vsel %vm2497_vm4, %v2489_v60, %v2501_v1  ;;  %vm5573_vm4 = vmmov 0   ;;  %v5475_v60 = vld [vmem:[#allocation2 + $0x4e8] sm:$0xff]  }
 0xc2b   :  { %v2493_v3 = vpop.f32.mrf.mxu0  ;;  %v2515_v17 = vsel %vm60_vm1, 0, %v2511_v10  ;;  %5106 = vmatprep.mubr.msk.bf16.mxu0 %vm5573_vm4, %v5572_v30  ;;  %5097 = vmatpush3.bf16.msra.mxu0 %v5475_v60  ;;  %v4693_v60 = vld [vmem:[%s6127_s2 + $0xa] ss:$0 sm:$0xff] }
 0xc2c   :  { %vm2498_vm5 = vcmp.ge.f32.partialorder %v2492_v2, 0.0  ;;  %v2502_v4 = vmul.f32 0.2, %v2492_v2  ;;  %5098 = vmatprep.subr.bf16.mxu0 %v5572_v30 }
 0xc2e   :  { %v2506_v6 = vsel %vm2498_vm5, %v2492_v2, %v2502_v4 }
 0xc2f   :  { %v2508_v7 = vpack.c.bf16 %v2506_v6, %v2505_v5  ;;  %5099 = vmatpush3.bf16.msra.mxu0 %v5476_v36 }
 0xc30   :  { %5100 = vmatprep.subr.bf16.mxu0 %v5572_v30 }
 0xc31   :  { %2523 = vrot.lane.b32.xlu1 %v2508_v7, %s5570_s30  ;;  %v2517_v9 = vrot.slane %v2508_v7, 1  ;;  %v2512_v11 = vrot.slane %v2508_v7, 7 }
 0xc33   :  { %v2518_v12 = vsel %vm72_vm0, %v2516_v8, %v2517_v9  ;;  %v2520_v13 = vsel %vm72_vm0, %v2517_v9, 0  ;;  %v2513_v14 = vsel %vm60_vm1, %v2511_v10, %v2512_v11  ;;  %5101 = vmatpush3.bf16.msra.mxu0 %v5477_v61  ;;  %v5543_v11 = vld [vmem:[%s6128_s3] sm:$0xff]  }
 0xc34   :  { %2526 = vrot.lane.b32.xlu0 %v2518_v12, %s5567_s18  ;;  %5102 = vmatprep.subr.bf16.mxu0 %v5572_v30  ;;  %v5478_v12 = vld [vmem:[#allocation2 + $0x4d0] sm:$0xff]  }
 0xc35   :  { %2528 = vrot.lane.b32.xlu1 %v2520_v13, %s5567_s18  ;;  %v5479_v13 = vld [vmem:[#allocation2 + $0x4c8] sm:$0xff]  }
 0xc37   :  { %5103 = vmatpush3.bf16.msra.mxu0 %v5478_v12 }
 0xc38   :  { %5104 = vmatprep.subr.bf16.mxu0 %v5572_v30 }
 0xc3b   :  { %5105 = vmatpush3.bf16.msra.mxu0 %v5479_v13 }
 0xc3c   :  { %5136 = vmatprep.subr.bf16.mxu0 %v5572_v30 }
 0xc9b   :  { %v2522_v15 = vpop.permute.xlu0 %2521 }
 0xc9c   :  { %v2531_v18 = vsel %vm112_vm3, %v2515_v17, %v2522_v15 }
 0xca3   :  { %v2524_v16 = vpop.permute.xlu1 %2523 }
 0xca4   :  { %v2534_v20 = vsel %vm112_vm3, %v2513_v14, %v2524_v16 }
 0xca6   :  { %v2527_v19 = vpop.permute.xlu0 %2526 }
 0xca7   :  { %v2536_v21 = vsel %vm311_vm15, %v2531_v18, %v2527_v19  ;;  %v2529_v22 = vpop.permute.xlu1 %2528  ;;  %v4683_v19 = vld [vmem:[%s6127_s2 + $0x9] ss:$0 sm:$0xff] }
 0xca8   :  { %v2538_v23 = vsel %vm311_vm15, %v2534_v20, %v2529_v22  ;;  %5078 = vmatprep.mubr.msk.bf16.mxu1 %vm2592_vm6, %v2536_v21 }
 0xca9   :  { %5079 = vmatmul.mubr.msk.bf16.vlgmr.msra.gmra.mxu1 %vm2592_vm6, %v2538_v23 }
 0xcaa   :  { %5086 = vmatprep.mubr.msk.bf16.mxu1 %vm5573_vm4, %v5572_v30 }
 0xd69   :  { %v5080_v25 = vpop.f32.mrf.mxu1 }
 0xd6a   :  { %v2640_v26 = vadd.f32 %v5080_v25, %v4673_v24 }
 0xd6b   :  { %v2631_v27 = vpop.f32.mrf.mxu1 }
 0xd6c   :  { %v2632_v28 = vadd.f32 %v4673_v24, %v2631_v27  ;;  %v2652_v31 = vmul.f32 0.2, %v2640_v26  ;;  %vm2648_vm14 = vcmp.ge.f32.partialorder %v2640_v26, 0.0 }
 0xd6d   :  { %v5081_v29 = vpop.f32.mrf.mxu1 }
 0xd6e   :  { %v2643_v32 = vadd.f32 %v5081_v29, %v4673_v24  ;;  %v2650_v34 = vmul.f32 0.2, %v2632_v28  ;;  %vm2646_vm11 = vcmp.ge.f32.partialorder %v2632_v28, 0.0  ;;  %v2656_v37 = vsel %vm2648_vm14, %v2640_v26, %v2652_v31 }
 0xd6f   :  { %v2634_v33 = vpop.f32.mrf.mxu1 }
 0xd70   :  { %vm2649_vm9 = vcmp.ge.f32.partialorder %v2643_v32, 0.0  ;;  %v2653_v39 = vmul.f32 0.2, %v2643_v32  ;;  %v2635_v35 = vadd.f32 %v4673_v24, %v2634_v33  ;;  %v2654_v42 = vsel %vm2646_vm11, %v2632_v28, %v2650_v34 }
 0xd72   :  { %v2657_v38 = vsel %vm2649_vm9, %v2643_v32, %v2653_v39  ;;  %vm2647_vm12 = vcmp.ge.f32.partialorder %v2635_v35, 0.0  ;;  %v2651_v40 = vmul.f32 0.2, %v2635_v35  ;;  %vm3052_vm9 = vcmask 1041408  }
 0xd73   :  { %v5839_v41 = vpack.c.bf16 %v2657_v38, %v2656_v37 }
 0xd74   :  { %v2655_v43 = vsel %vm2647_vm12, %v2635_v35, %v2651_v40  ;;  %vm3231_vm12 = vcmask 31744  }
 0xd75   :  { %v5841_v44 = vpack.c.bf16 %v2655_v43, %v2654_v42  ;;  %2679 = vrot.lane.b32.xlu0 %v5839_v41, %s5570_s30  ;;  %v2668_v45 = vrot.slane %v5839_v41, 1  ;;  %v2673_v46 = vrot.slane %v5839_v41, 2  ;;  %v2663_v52 = vrot.slane %v5839_v41, 7 }
 0xd77   :  { %v2671_v47 = vsel %vm72_vm0, %v2668_v45, 0  ;;  %v2676_v48 = vsel %vm282_vm13, %v2673_v46, 0  ;;  %v2667_v50 = vrot.slane %v5841_v44, 1  ;;  %v2662_v51 = vrot.slane %v5841_v44, 7 }
 0xd78   :  { %2684 = vrot.lane.b32.xlu1 %v2671_v47, %s5567_s18  ;;  %v2672_v55 = vrot.slane %v5841_v44, 2  ;;  %v5480_v47 = vld [vmem:[#allocation2 + $0x540] sm:$0xff]  }
 0xd79   :  { %2689 = vrot.lane.b32.xlu0 %v2676_v48, %s5574_s8  ;;  %v2664_v54 = vsel %vm60_vm1, %v2662_v51, %v2663_v52  ;;  %v2669_v56 = vsel %vm72_vm0, %v2667_v50, %v2668_v45  ;;  %v2666_v5 = vsel %vm60_vm1, 0, %v2662_v51  ;;  %v5481_v48 = vld [vmem:[#allocation2 + $0x538] sm:$0xff]   ;;  %v5483_v50 = vld [vmem:[#allocation2 + $0x528] sm:$0xff]   ;;  %v5484_v51 = vld [vmem:[#allocation2 + $0x520] sm:$0xff]  }
 0xd7a   :  { %v2674_v59 = vsel %vm282_vm13, %v2672_v55, %v2673_v46  ;;  %v5486_v52 = vld [vmem:[#allocation2 + $0x510] sm:$0xff]  }
 0xd7c   :  { %2677 = vrot.lane.b32.xlu1 %v5841_v44, %s5570_s30 }
 0xd7d   :  { %2682 = vrot.lane.b32.xlu0 %v2669_v56, %s5567_s18 }
 0xd80   :  { %2687 = vrot.lane.b32.xlu1 %v2674_v59, %s5574_s8 }
 0xde7   :  { %v2680_v62 = vpop.permute.xlu0 %2679 }
 0xde8   :  { %v2695_v63 = vsel %vm112_vm3, %v2664_v54, %v2680_v62 }
 0xdea   :  { %v2685_v0 = vpop.permute.xlu1 %2684 }
 0xdeb   :  { %v2699_v1 = vsel %vm311_vm15, %v2695_v63, %v2685_v0  ;;  %v2690_v2 = vpop.permute.xlu0 %2689 }
 0xdec   :  { %v2704_v3 = vsel %vm2592_vm6, %v2699_v1, %v2690_v2 }
 0xded   :  { %5083 = vmatpush3.bf16.msra.mxu1 %v2704_v3 }
 0xdee   :  { %v2678_v4 = vpop.permute.xlu1 %2677  ;;  %5084 = vmatprep.subr.bf16.mxu1 %v5572_v30 }
 0xdef   :  { %v2692_v6 = vsel %vm112_vm3, %v2666_v5, %v2678_v4  ;;  %v2683_v7 = vpop.permute.xlu0 %2682 }
 0xdf0   :  { %v2697_v8 = vsel %vm311_vm15, %v2692_v6, %v2683_v7 }
 0xdf2   :  { %v2688_v9 = vpop.permute.xlu1 %2687 }
 0xdf3   :  { %v2701_v10 = vsel %vm2592_vm6, %v2697_v8, %v2688_v9 }
 0xdf4   :  { %5085 = vmatpush3.bf16.msra.mxu1 %v2701_v10 }
 0xdf5   :  { %5110 = vmatprep.subr.bf16.mxu1 %v5572_v30 }
 0xdf7   :  { %5087 = vmatmul.mubr.msk.bf16.vlgmr.msra.gmra.mxu1 %vm112_vm3, %v5543_v11 }
 0xdf8   :  { %5112 = vmatprep.mubr.msk.bf16.mxu1 %vm5573_vm4, %v5572_v30 }
 0xeb7   :  { %v2740_v14 = vpop.f32.mrf.mxu1 }
 0xeb9   :  { %v5088_v15 = vpop.f32.mrf.mxu1 }
 0xebb   :  { %v2743_v16 = vpop.f32.mrf.mxu1 }
 0xebc   :  { %v2747_v17 = vpack.c.bf16 %v2743_v16, %v2740_v14 }
 0xebd   :  { %v5089_v18 = vpop.f32.mrf.mxu1 }
 0xebe   :  { %5107 = vmatmul.mubr.bf16.vlgmr.msra.gmra.mxu0 %v2747_v17  ;;  %v3069_v17 = vld [vmem:[%s6128_s3] sm:$0x3] }
 0xebf   :  { %5138 = vmatprep.mubr.msk.bf16.mxu0 %vm5573_vm4, %v5572_v30  ;;  %v5488_v18 = vld [vmem:[#allocation2 + $0x580] sm:$0xff]  }
 0xf7e   :  { %v2851_v20 = vpop.f32.mrf.mxu0 }
 0xf7f   :  { %v2852_v21 = vadd.f32 %v4683_v19, %v2851_v20  ;;  %v5490_v20 = vld [vmem:[#allocation2 + $0x570] sm:$0xff]  }
 0xf80   :  { %v5108_v22 = vpop.f32.mrf.mxu0 }
 0xf81   :  { %v2860_v24 = vmul.f32 0.2, %v2852_v21  ;;  %vm2858_vm5 = vcmp.ge.f32.partialorder %v2852_v21, 0.0  ;;  %v5492_v22 = vld [vmem:[#allocation2 + $0x560] sm:$0xff]  }
 0xf82   :  { %v2854_v23 = vpop.f32.mrf.mxu0 }
 0xf83   :  { %v2855_v25 = vadd.f32 %v4683_v19, %v2854_v23  ;;  %v2862_v28 = vsel %vm2858_vm5, %v2852_v21, %v2860_v24  ;;  %v5489_v19 = vld [vmem:[#allocation2 + $0x578] sm:$0xff]   ;;  %v5491_v21 = vld [vmem:[#allocation2 + $0x568] sm:$0xff]   ;;  %v5494_v24 = vld [vmem:[#allocation2 + $0x550] sm:$0xff]  }
 0xf84   :  { %v5109_v26 = vpop.f32.mrf.mxu0  ;;  %v5493_v23 = vld [vmem:[#allocation2 + $0x558] sm:$0xff]  }
 0xf85   :  { %vm2859_vm14 = vcmp.ge.f32.partialorder %v2855_v25, 0.0  ;;  %v2861_v27 = vmul.f32 0.2, %v2855_v25 }
 0xf87   :  { %v2863_v29 = vsel %vm2859_vm14, %v2855_v25, %v2861_v27  ;;  %v5495_v25 = vld [vmem:[#allocation2 + $0x548] sm:$0xff]  }
 0xf88   :  { %v5894_v31 = vpack.c.bf16 %v2863_v29, %v2862_v28 }
 0xf8a   :  { %2875 = vrot.lane.b32.xlu0 %v5894_v31, %s5570_s30  ;;  %v2869_v32 = vrot.slane %v5894_v31, 1  ;;  %v2872_v33 = vrot.slane %v5894_v31, 2  ;;  %v2866_v35 = vrot.slane %v5894_v31, 7 }
 0xf8c   :  { %v2871_v34 = vsel %vm72_vm0, %v2869_v32, 0  ;;  %v2874_v39 = vsel %vm282_vm13, %v2872_v33, 0  ;;  %v2868_v38 = vsel %vm60_vm1, 0, %v2866_v35  ;;  %v4703_v33 = vld [vmem:[%s6127_s2 + $0xb] ss:$0 sm:$0xff] }
 0xf8d   :  { %2878 = vrot.lane.b32.xlu1 %v2871_v34, %s5567_s18 }
 0xf8e   :  { %2881 = vrot.lane.b32.xlu0 %v2874_v39, %s5574_s8 }
 0xffc   :  { %v2876_v37 = vpop.permute.xlu0 %2875 }
 0xffd   :  { %v2884_v40 = vsel %vm112_vm3, %v2868_v38, %v2876_v37 }
 0xfff   :  { %v2879_v42 = vpop.permute.xlu1 %2878 }
0x1000   :  { %v2886_v43 = vsel %vm311_vm15, %v2884_v40, %v2879_v42  ;;  %v2882_v45 = vpop.permute.xlu0 %2881 }
0x1001   :  { %v2888_v46 = vsel %vm2592_vm6, %v2886_v43, %v2882_v45 }
0x1002   :  { %5111 = vmatpush3.bf16.msra.mxu1 %v2888_v46  ;;  %v3229_v46 = vld [vmem:[%s6128_s3 + $0x10] sm:$0xf] }
0x1003   :  { %5116 = vmatprep.subr.bf16.mxu1 %v5572_v30 }
0x1005   :  { %5113 = vmatmul.mubr.msk.bf16.vlgmr.msra.gmra.mxu1 %vm100_vm2, %v5753_v57  ;;  %v5485_v57 = vld [vmem:[#allocation2 + $0x518] sm:$0xff]  }
0x1006   :  { %5117 = vmatpush3.bf16.msra.mxu1 %v5480_v47  ;;  %5132 = vmatprep.mubr.msk.bf16.mxu1 %vm5573_vm4, %v5572_v30  ;;  %v5496_v47 = vld [vmem:[#allocation2 + $0x5b0] sm:$0xff]  }
0x1007   :  { %5118 = vmatprep.subr.bf16.mxu1 %v5572_v30 }
0x100a   :  { %5119 = vmatpush3.bf16.msra.mxu1 %v5481_v48  ;;  %v5497_v48 = vld [vmem:[#allocation2 + $0x5a8] sm:$0xff]  }
0x100b   :  { %5120 = vmatprep.subr.bf16.mxu1 %v5572_v30 }
0x100e   :  { %5121 = vmatpush3.bf16.msra.mxu1 %v5482_v49  ;;  %v5498_v49 = vld [vmem:[#allocation2 + $0x5a0] sm:$0xff]  }
0x100f   :  { %5122 = vmatprep.subr.bf16.mxu1 %v5572_v30 }
0x1012   :  { %5123 = vmatpush3.bf16.msra.mxu1 %v5483_v50  ;;  %v5499_v50 = vld [vmem:[#allocation2 + $0x598] sm:$0xff]  }
0x1013   :  { %5124 = vmatprep.subr.bf16.mxu1 %v5572_v30 }
0x1016   :  { %5125 = vmatpush3.bf16.msra.mxu1 %v5484_v51  ;;  %v5500_v51 = vld [vmem:[#allocation2 + $0x590] sm:$0xff]  }
0x1017   :  { %5126 = vmatprep.subr.bf16.mxu1 %v5572_v30 }
0x101a   :  { %5127 = vmatpush3.bf16.msra.mxu1 %v5485_v57  ;;  %v5501_v57 = vld [vmem:[#allocation2 + $0x588] sm:$0xff]  }
0x101b   :  { %5128 = vmatprep.subr.bf16.mxu1 %v5572_v30 }
0x101e   :  { %5129 = vmatpush3.bf16.msra.mxu1 %v5486_v52 }
0x101f   :  { %5130 = vmatprep.subr.bf16.mxu1 %v5572_v30 }
0x1022   :  { %5131 = vmatpush3.bf16.msra.mxu1 %v5487_v53 }
0x1023   :  { %5162 = vmatprep.subr.bf16.mxu1 %v5572_v30 }
0x10c5   :  { %v2924_v54 = vpop.f32.mrf.mxu1 }
0x10c6   :  { %v2930_v55 = vpack.c.bf16 %v2924_v54, %v2924_v54 }
0x10c7   :  { %v5114_v56 = vpop.f32.mrf.mxu1 }
0x10c8   :  { %5133 = vmatmul.mubr.bf16.vlgmr.msra.gmra.mxu1 %v2930_v55 }
0x10c9   :  { %v2927_v58 = vpop.f32.mrf.mxu1  ;;  %5164 = vmatprep.mubr.msk.bf16.mxu1 %vm5573_vm4, %v5572_v30 }
0x10cb   :  { %v5115_v59 = vpop.f32.mrf.mxu1 }
0x1188   :  { %v3034_v36 = vpop.f32.mrf.mxu1 }
0x1189   :  { %v3035_v61 = vadd.f32 %v4693_v60, %v3034_v36 }
0x118a   :  { %v5134_v62 = vpop.f32.mrf.mxu1 }
0x118b   :  { %vm3040_vm13 = vcmp.ge.f32.partialorder %v3035_v61, 0.0  ;;  %v3041_v63 = vmul.f32 0.2, %v3035_v61 }
0x118c   :  { %v3037_v0 = vpop.f32.mrf.mxu1 }
0x118d   :  { %v3042_v1 = vsel %vm3040_vm13, %v3035_v61, %v3041_v63 }
0x118e   :  { %v5927_v2 = vpack.c.bf16 %v3042_v1, %v3042_v1  ;;  %v5135_v3 = vpop.f32.mrf.mxu1 }
0x118f   :  { %v4713_v3 = vld [vmem:[%s6127_s2 + $0xc] ss:$0 sm:$0xff] }
0x1190   :  { %3055 = vrot.lane.b32.xlu1 %v5927_v2, %s5570_s30  ;;  %v3048_v4 = vrot.slane %v5927_v2, 1  ;;  %v3051_v5 = vrot.slane %v5927_v2, 2  ;;  %v3045_v8 = vrot.slane %v5927_v2, 7  ;;  %v3230_v52 = vunpack.c.l.bf16 %v5927_v2 }
0x1192   :  { %v3050_v6 = vsel %vm2086_vm7, %v3048_v4, 0  ;;  %v3054_v7 = vsel %vm3052_vm9, %v3051_v5, 0  ;;  %v3047_v10 = vsel %vm60_vm1, 0, %v3045_v8 }
0x1193   :  { %3058 = vrot.lane.b32.xlu0 %v3050_v6, %s5567_s18 }
0x1194   :  { %3061 = vrot.lane.b32.xlu1 %v3054_v7, %s5574_s8 }
0x1202   :  { %v3056_v9 = vpop.permute.xlu1 %3055 }
0x1203   :  { %v3064_v11 = vsel %vm112_vm3, %v3047_v10, %v3056_v9 }
0x1205   :  { %v3059_v12 = vpop.permute.xlu0 %3058 }
0x1206   :  { %v3066_v13 = vsel %vm311_vm15, %v3064_v11, %v3059_v12  ;;  %v3062_v14 = vpop.permute.xlu1 %3061 }
0x1207   :  { %v3068_v15 = vsel %vm2592_vm6, %v3066_v13, %v3062_v14  ;;  %v5502_v13 = vld [vmem:[%s6128_s3 + $0x10] sm:$0xff]   ;;  %v5503_v14 = vld [vmem:[#allocation2 + $0x5e0] sm:$0xff]  }
0x1208   :  { %v3073_v16 = vsel %vm2262_vm10, %v3068_v15, 0  ;;  %v5504_v15 = vld [vmem:[#allocation2 + $0x5d8] sm:$0xff]  }
0x1209   :  { %5137 = vmatpush3.bf16.msra.mxu0 %v3073_v16  ;;  %v5505_v16 = vld [vmem:[#allocation2 + $0x5d0] sm:$0xff]  }
0x120a   :  { %5142 = vmatprep.subr.bf16.mxu0 %v5572_v30 }
0x120c   :  { %5139 = vmatmul.mubr.msk.bf16.vlgmr.msra.gmra.mxu0 %vm2255_vm8, %v3069_v17  ;;  %v5506_v17 = vld [vmem:[#allocation2 + $0x5c8] sm:$0xff]  }
0x120d   :  { %5143 = vmatpush3.bf16.msra.mxu0 %v5488_v18  ;;  %5158 = vmatprep.mubr.msk.bf16.mxu0 %vm5573_vm4, %v5572_v30  ;;  %v5507_v18 = vld [vmem:[#allocation2 + $0x5c0] sm:$0xff]  }
0x120e   :  { %5144 = vmatprep.subr.bf16.mxu0 %v5572_v30 }
0x1211   :  { %5145 = vmatpush3.bf16.msra.mxu0 %v5489_v19  ;;  %v5508_v19 = vld [vmem:[#allocation2 + $0x5b8] sm:$0xff]  }
0x1212   :  { %5146 = vmatprep.subr.bf16.mxu0 %v5572_v30 }
0x1215   :  { %5147 = vmatpush3.bf16.msra.mxu0 %v5490_v20 }
0x1216   :  { %5148 = vmatprep.subr.bf16.mxu0 %v5572_v30 }
0x1219   :  { %5149 = vmatpush3.bf16.msra.mxu0 %v5491_v21 }
0x121a   :  { %5150 = vmatprep.subr.bf16.mxu0 %v5572_v30 }
0x121d   :  { %5151 = vmatpush3.bf16.msra.mxu0 %v5492_v22  ;;  %v3396_v22 = vunpack.c.l.bf16 %v5894_v31 }
0x121e   :  { %5152 = vmatprep.subr.bf16.mxu0 %v5572_v30 }
0x1221   :  { %5153 = vmatpush3.bf16.msra.mxu0 %v5493_v23  ;;  %v3397_v23 = vunpack.c.h.bf16 %v5894_v31 }
0x1222   :  { %5154 = vmatprep.subr.bf16.mxu0 %v5572_v30 }
0x1225   :  { %5155 = vmatpush3.bf16.msra.mxu0 %v5494_v24 }
0x1226   :  { %5156 = vmatprep.subr.bf16.mxu0 %v5572_v30 }
0x1229   :  { %5157 = vmatpush3.bf16.msra.mxu0 %v5495_v25 }
0x122a   :  { %5184 = vmatprep.subr.bf16.mxu0 %v5572_v30 }
0x12cc   :  { %v3109_v26 = vpop.f32.mrf.mxu0 }
0x12cd   :  { %v3115_v27 = vpack.c.bf16 %v3109_v26, %v3109_v26 }
0x12ce   :  { %v5140_v28 = vpop.f32.mrf.mxu0 }
0x12cf   :  { %5159 = vmatmul.mubr.bf16.vlgmr.msra.gmra.mxu0 %v3115_v27 }
0x12d0   :  { %v3112_v29 = vpop.f32.mrf.mxu0  ;;  %5186 = vmatprep.mubr.msk.bf16.mxu0 %vm5573_vm4, %v5572_v30 }
0x12d2   :  { %v5141_v32 = vpop.f32.mrf.mxu0 }
0x138f   :  { %v3219_v34 = vpop.f32.mrf.mxu0 }
0x1390   :  { %v3220_v39 = vadd.f32 %v4703_v33, %v3219_v34 }
0x1391   :  { %v5160_v35 = vpop.f32.mrf.mxu0 }
0x1392   :  { %vm3225_vm11 = vcmp.ge.f32.partialorder %v3220_v39, 0.0  ;;  %v3226_v37 = vmul.f32 0.2, %v3220_v39 }
0x1393   :  { %v3222_v38 = vpop.f32.mrf.mxu0 }
0x1394   :  { %v3227_v40 = vsel %vm3225_vm11, %v3220_v39, %v3226_v37  ;;  %v5509_v37 = vld [vmem:[%s6128_s3 + $0x10] sm:$0xff]   ;;  %v4723_v38 = vld [vmem:[%s6127_s2 + $0xd] ss:$0 sm:$0xff] }
0x1395   :  { %v3228_v42 = vpack.c.bf16 %v3227_v40, %v3227_v40  ;;  %v5161_v43 = vpop.f32.mrf.mxu0 }
0x1397   :  { %v3236_v45 = vsel %vm3052_vm9, %v3228_v42, 0 }
0x1398   :  { %5163 = vmatpush3.bf16.msra.mxu1 %v3236_v45 }
0x1399   :  { %5168 = vmatprep.subr.bf16.mxu1 %v5572_v30 }
0x139b   :  { %5165 = vmatmul.mubr.msk.bf16.vlgmr.msra.gmra.mxu1 %vm3231_vm12, %v3229_v46 }
0x139c   :  { %5180 = vmatprep.mubr.msk.bf16.mxu1 %vm5573_vm4, %v5572_v30  ;;  %5169 = vmatpush3.bf16.msra.mxu1 %v5496_v47 }
0x139d   :  { %5170 = vmatprep.subr.bf16.mxu1 %v5572_v30 }
0x13a0   :  { %5171 = vmatpush3.bf16.msra.mxu1 %v5497_v48 }
0x13a1   :  { %5172 = vmatprep.subr.bf16.mxu1 %v5572_v30 }
0x13a4   :  { %5173 = vmatpush3.bf16.msra.mxu1 %v5498_v49 }
0x13a5   :  { %5174 = vmatprep.subr.bf16.mxu1 %v5572_v30 }
0x13a8   :  { %5175 = vmatpush3.bf16.msra.mxu1 %v5499_v50 }
0x13a9   :  { %5176 = vmatprep.subr.bf16.mxu1 %v5572_v30 }
0x13ac   :  { %5177 = vmatpush3.bf16.msra.mxu1 %v5500_v51 }
0x13ad   :  { %5178 = vmatprep.subr.bf16.mxu1 %v5572_v30 }
0x13b0   :  { %5179 = vmatpush3.bf16.msra.mxu1 %v5501_v57 }
0x13b1   :  { %5190 = vmatprep.subr.bf16.mxu1 %v5572_v30 }
0x145b   :  { %v3272_v53 = vpop.f32.mrf.mxu1 }
0x145c   :  { %v3273_v54 = vadd.f32 %v3272_v53, %v3230_v52  ;;  %v5510_v52 = vld [vmem:[%s6128_s3 + $0x18] sm:$0xff]   ;;  %v5511_v53 = vld [vmem:[#allocation2 + $0x610] sm:$0xff]  }
0x145d   :  { %v5166_v55 = vpop.f32.mrf.mxu1 }
0x145e   :  { %v3278_v56 = vpack.c.bf16 %v3273_v54, %v3273_v54  ;;  %v5512_v54 = vld [vmem:[#allocation2 + $0x608] sm:$0xff]   ;;  %v5513_v55 = vld [vmem:[#allocation2 + $0x600] sm:$0xff]  }
0x145f   :  { %v3275_v58 = vpop.f32.mrf.mxu1 }
0x1460   :  { %3286 = vrot.lane.b32.xlu0 %v3278_v56, %s5570_s30  ;;  %v3283_v59 = vrot.slane %v3278_v56, 1  ;;  %v3280_v61 = vrot.slane %v3278_v56, 7  ;;  %v5514_v56 = vld [vmem:[#allocation2 + $0x5f8] sm:$0xff]   ;;  %v5515_v58 = vld [vmem:[#allocation2 + $0x5f0] sm:$0xff]  }
0x1461   :  { %v5167_v60 = vpop.f32.mrf.mxu1 }
0x1462   :  { %v3285_v36 = vsel %vm2086_vm7, %v3283_v59, 0  ;;  %v3282_v63 = vsel %vm60_vm1, 0, %v3280_v61  ;;  %v5516_v59 = vld [vmem:[#allocation2 + $0x5e8] sm:$0xff]   ;;  %v3576_v61 = vunpack.c.l.bf16 %v5839_v41 }
0x1463   :  { %3289 = vrot.lane.b32.xlu1 %v3285_v36, %s5567_s18 }
0x14d2   :  { %v3287_v62 = vpop.permute.xlu0 %3286 }
0x14d3   :  { %v3292_v0 = vsel %vm112_vm3, %v3282_v63, %v3287_v62  ;;  %v3577_v62 = vunpack.c.h.bf16 %v5839_v41 }
0x14d5   :  { %v3290_v1 = vpop.permute.xlu1 %3289 }
0x14d6   :  { %v3294_v2 = vsel %vm311_vm15, %v3292_v0, %v3290_v1  ;;  %v3574_v1 = vunpack.c.l.bf16 %v5841_v44 }
0x14d7   :  { %5181 = vmatmul.mubr.msk.bf16.vlgmr.msra.gmra.mxu1 %vm2592_vm6, %v3294_v2 }
0x14d8   :  { %5202 = vmatprep.mubr.msk.bf16.mxu1 %vm5573_vm4, %v5572_v30  ;;  %5191 = vmatpush3.bf16.msra.mxu1 %v5503_v14 }
0x14d9   :  { %5192 = vmatprep.subr.bf16.mxu1 %v5572_v30 }
0x14dc   :  { %5193 = vmatpush3.bf16.msra.mxu1 %v5504_v15 }
0x14dd   :  { %5194 = vmatprep.subr.bf16.mxu1 %v5572_v30 }
0x14e0   :  { %5195 = vmatpush3.bf16.msra.mxu1 %v5505_v16 }
0x14e1   :  { %5196 = vmatprep.subr.bf16.mxu1 %v5572_v30 }
0x14e4   :  { %5197 = vmatpush3.bf16.msra.mxu1 %v5506_v17 }
0x14e5   :  { %5198 = vmatprep.subr.bf16.mxu1 %v5572_v30 }
0x14e8   :  { %5199 = vmatpush3.bf16.msra.mxu1 %v5507_v18 }
0x14e9   :  { %5200 = vmatprep.subr.bf16.mxu1 %v5572_v30 }
0x14ec   :  { %5201 = vmatpush3.bf16.msra.mxu1 %v5508_v19 }
0x1597   :  { %v3384_v4 = vpop.f32.mrf.mxu1 }
0x1598   :  { %v3385_v5 = vadd.f32 %v4713_v3, %v3384_v4  ;;  %v3575_v3 = vunpack.c.h.bf16 %v5841_v44 }
0x1599   :  { %v5182_v6 = vpop.f32.mrf.mxu1 }
0x159a   :  { %vm3390_vm7 = vcmp.ge.f32.partialorder %v3385_v5, 0.0  ;;  %v3391_v7 = vmul.f32 0.2, %v3385_v5 }
0x159b   :  { %v3387_v8 = vpop.f32.mrf.mxu1 }
0x159c   :  { %v3392_v9 = vsel %vm3390_vm7, %v3385_v5, %v3391_v7 }
0x159d   :  { %v3393_v10 = vpack.c.bf16 %v3392_v9, %v3392_v9  ;;  %v5183_v11 = vpop.f32.mrf.mxu1 }
0x159f   :  { %v3407_v12 = vsel %vm2262_vm10, %v3393_v10, 0 }
0x15a0   :  { %5185 = vmatpush3.bf16.msra.mxu0 %v3407_v12 }
0x15a3   :  { %5187 = vmatmul.mubr.msk.bf16.vlgmr.msra.gmra.mxu0 %vm2255_vm8, %v5502_v13 }
0x15a4   :  { %5208 = vmatprep.mubr.msk.bf16.mxu0 %vm100_vm2, %v5509_v37 }
0x1663   :  { %v3443_v20 = vpop.f32.mrf.mxu0 }
0x1664   :  { %v3444_v25 = vadd.f32 %v3443_v20, %v3396_v22 }
0x1665   :  { %v5188_v21 = vpop.f32.mrf.mxu0 }
0x1667   :  { %v3446_v24 = vpop.f32.mrf.mxu0 }
0x1668   :  { %v3447_v26 = vadd.f32 %v3446_v24, %v3397_v23  ;;  %v5517_v23 = vld [vmem:[#allocation2 + $0x640] sm:$0xff]   ;;  %v5518_v24 = vld [vmem:[#allocation2 + $0x638] sm:$0xff]  }
0x1669   :  { %v5189_v27 = vpop.f32.mrf.mxu0  ;;  %5228 = vmatprep.subr.bf16.mxu1 %v5517_v23 }
0x166a   :  { %v3450_v28 = vpack.c.bf16 %v3447_v26, %v3444_v25  ;;  %v5519_v25 = vld [vmem:[#allocation2 + $0x630] sm:$0xff]   ;;  %v5520_v26 = vld [vmem:[#allocation2 + $0x628] sm:$0xff]  }
0x166b   :  { %v4735_v27 = vld [vmem:[%s6127_s2 + $0xe] ss:$0 sm:$0xff] }
0x166c   :  { %3458 = vrot.lane.b32.xlu0 %v3450_v28, %s5570_s30  ;;  %v3455_v29 = vrot.slane %v3450_v28, 1  ;;  %v3452_v30 = vrot.slane %v3450_v28, 7  ;;  %v5521_v28 = vld [vmem:[#allocation2 + $0x620] sm:$0xff]  }
0x166e   :  { %v3457_v32 = vsel %vm72_vm0, %v3455_v29, 0  ;;  %v3454_v34 = vsel %vm60_vm1, 0, %v3452_v30 }
0x166f   :  { %3461 = vrot.lane.b32.xlu1 %v3457_v32, %s5567_s18 }
0x16de   :  { %v3459_v33 = vpop.permute.xlu0 %3458 }
0x16df   :  { %v3464_v39 = vsel %vm112_vm3, %v3454_v34, %v3459_v33  ;;  %v5522_v33 = vld [vmem:[#allocation2 + $0x618] sm:$0xff]  }
0x16e1   :  { %v3462_v35 = vpop.permute.xlu1 %3461 }
0x16e2   :  { %v3466_v31 = vsel %vm311_vm15, %v3464_v39, %v3462_v35 }
0x16e3   :  { %5203 = vmatmul.mubr.msk.bf16.vlgmr.msra.gmra.mxu1 %vm2592_vm6, %v3466_v31 }
0x16e4   :  { %5229 = vmatpush3.bf16.msra.mxu1 %v5517_v23 }
0x16e5   :  { %5230 = vmatprep.subr.bf16.mxu1 %v5518_v24 }
0x16e8   :  { %5231 = vmatpush3.bf16.msra.mxu1 %v5518_v24 }
0x16e9   :  { %5232 = vmatprep.subr.bf16.mxu1 %v5519_v25 }
0x16ec   :  { %5233 = vmatpush3.bf16.msra.mxu1 %v5519_v25 }
0x16ed   :  { %5234 = vmatprep.subr.bf16.mxu1 %v5520_v26 }
0x16f0   :  { %5235 = vmatpush3.bf16.msra.mxu1 %v5520_v26 }
0x16f1   :  { %5236 = vmatprep.subr.bf16.mxu1 %v5521_v28 }
0x16f4   :  { %5237 = vmatpush3.bf16.msra.mxu1 %v5521_v28 }
0x16f5   :  { %5238 = vmatprep.subr.bf16.mxu1 %v5522_v33 }
0x16f8   :  { %5239 = vmatpush3.bf16.msra.mxu1 %v5522_v33 }
0x17a3   :  { %v3556_v40 = vpop.f32.mrf.mxu1 }
0x17a4   :  { %v3557_v42 = vadd.f32 %v4723_v38, %v3556_v40 }
0x17a5   :  { %v5204_v43 = vpop.f32.mrf.mxu1 }
0x17a6   :  { %v3565_v46 = vmul.f32 0.2, %v3557_v42  ;;  %vm3563_vm8 = vcmp.ge.f32.partialorder %v3557_v42, 0.0 }
0x17a7   :  { %v3559_v45 = vpop.f32.mrf.mxu1 }
0x17a8   :  { %v3560_v47 = vadd.f32 %v4723_v38, %v3559_v45  ;;  %v3567_v50 = vsel %vm3563_vm8, %v3557_v42, %v3565_v46 }
0x17a9   :  { %v5205_v48 = vpop.f32.mrf.mxu1 }
0x17aa   :  { %vm3564_vm10 = vcmp.ge.f32.partialorder %v3560_v47, 0.0  ;;  %v3566_v49 = vmul.f32 0.2, %v3560_v47 }
0x17ac   :  { %v3568_v51 = vsel %vm3564_vm10, %v3560_v47, %v3566_v49 }
0x17ad   :  { %v3569_v57 = vpack.c.bf16 %v3568_v51, %v3567_v50 }
0x17af   :  { %5206 = vmatprep.subr.bf16.mxu0 %v3569_v57 }
0x17b0   :  { %5207 = vmatpush3.bf16.msra.mxu0 %v3569_v57 }
0x17b1   :  { %5212 = vmatprep.subr.bf16.mxu0 %v5511_v53 }
0x17b3   :  { %5209 = vmatmul.mubr.msk.bf16.vlgmr.msra.gmra.mxu0 %vm100_vm2, %v5510_v52 }
0x17b4   :  { %5213 = vmatpush3.bf16.msra.mxu0 %v5511_v53 }
0x17b5   :  { %5214 = vmatprep.subr.bf16.mxu0 %v5512_v54 }
0x17b8   :  { %5215 = vmatpush3.bf16.msra.mxu0 %v5512_v54 }
0x17b9   :  { %5216 = vmatprep.subr.bf16.mxu0 %v5513_v55 }
0x17bc   :  { %5217 = vmatpush3.bf16.msra.mxu0 %v5513_v55 }
0x17bd   :  { %5218 = vmatprep.subr.bf16.mxu0 %v5514_v56 }
0x17c0   :  { %5219 = vmatpush3.bf16.msra.mxu0 %v5514_v56 }
0x17c1   :  { %5220 = vmatprep.subr.bf16.mxu0 %v5515_v58 }
0x17c4   :  { %5221 = vmatpush3.bf16.msra.mxu0 %v5515_v58 }
0x17c5   :  { %5222 = vmatprep.subr.bf16.mxu0 %v5516_v59 }
0x17c8   :  { %5223 = vmatpush3.bf16.msra.mxu0 %v5516_v59 }
0x1873   :  { %v5210_v60 = vpop.f32.mrf.mxu0 }
0x1874   :  { %v3637_v0 = vadd.f32 %v5210_v60, %v3576_v61 }
0x1875   :  { %v3628_v36 = vpop.f32.mrf.mxu0 }
0x1876   :  { %v3629_v5 = vadd.f32 %v3628_v36, %v3574_v1 }
0x1877   :  { %v5211_v63 = vpop.f32.mrf.mxu0 }
0x1878   :  { %v3640_v2 = vadd.f32 %v5211_v63, %v3577_v62 }
0x1879   :  { %v3631_v4 = vpop.f32.mrf.mxu0 }
0x187a   :  { %v3644_v6 = vpack.c.bf16 %v3640_v2, %v3637_v0  ;;  %v3632_v7 = vadd.f32 %v3631_v4, %v3575_v3  ;;  %v5523_v2 = vld [vmem:[#allocation2 + $0x670] sm:$0xff]   ;;  %v5524_v3 = vld [vmem:[#allocation2 + $0x668] sm:$0xff]   ;;  %v5525_v4 = vld [vmem:[#allocation2 + $0x660] sm:$0xff]  }
0x187b   :  { %5244 = vmatprep.subr.bf16.mxu0 %v5523_v2 }
0x187c   :  { %v3643_v8 = vpack.c.bf16 %v3632_v7, %v3629_v5  ;;  %3659 = vrot.lane.b32.xlu1 %v3644_v6, %s5570_s30  ;;  %v3653_v9 = vrot.slane %v3644_v6, 1  ;;  %v3648_v10 = vrot.slane %v3644_v6, 7  ;;  %v5526_v5 = vld [vmem:[#allocation2 + $0x658] sm:$0xff]   ;;  %v4744_v6 = vld [vmem:[%s6127_s2 + $0xf] ss:$0 sm:$0xff]  ;;  %v5527_v7 = vld [vmem:[#allocation2 + $0x650] sm:$0xff]  }
0x187e   :  { %v3647_v11 = vrot.slane %v3643_v8, 7  ;;  %3657 = vrot.lane.b32.xlu0 %v3643_v8, %s5570_s30  ;;  %v3656_v41 = vsel %vm72_vm0, %v3653_v9, 0  ;;  %v3652_v12 = vrot.slane %v3643_v8, 1 }
0x1880   :  { %3664 = vrot.lane.b32.xlu1 %v3656_v41, %s5567_s18  ;;  %v3654_v13 = vsel %vm72_vm0, %v3652_v12, %v3653_v9  ;;  %v3649_v44 = vsel %vm60_vm1, %v3647_v11, %v3648_v10  ;;  %v3651_v16 = vsel %vm60_vm1, 0, %v3647_v11  ;;  %v5528_v11 = vld [vmem:[#allocation2 + $0x648] sm:$0xff]  }
0x1882   :  { %3662 = vrot.lane.b32.xlu0 %v3654_v13, %s5567_s18 }
0x18ee   :  { %v3660_v14 = vpop.permute.xlu1 %3659 }
0x18ef   :  { %v3670_v20 = vsel %vm112_vm3, %v3649_v44, %v3660_v14 }
0x18f0   :  { %v3658_v15 = vpop.permute.xlu0 %3657 }
0x18f1   :  { %v3667_v18 = vsel %vm112_vm3, %v3651_v16, %v3658_v15 }
0x18f2   :  { %v3665_v17 = vpop.permute.xlu1 %3664 }
0x18f3   :  { %v3674_v22 = vsel %vm311_vm15, %v3670_v20, %v3665_v17 }
0x18f4   :  { %v3663_v19 = vpop.permute.xlu0 %3662 }
0x18f5   :  { %v3672_v21 = vsel %vm311_vm15, %v3667_v18, %v3663_v19 }
0x18f6   :  { %5224 = vmatprep.mubr.msk.bf16.mxu0 %vm2592_vm6, %v3672_v21 }
0x18f7   :  { %5225 = vmatmul.mubr.msk.bf16.vlgmr.msra.gmra.mxu0 %vm2592_vm6, %v3674_v22 }
0x18f8   :  { %5245 = vmatpush3.bf16.msra.mxu0 %v5523_v2 }
0x18f9   :  { %5246 = vmatprep.subr.bf16.mxu0 %v5524_v3 }
0x18fc   :  { %5247 = vmatpush3.bf16.msra.mxu0 %v5524_v3 }
0x18fd   :  { %5248 = vmatprep.subr.bf16.mxu0 %v5525_v4 }
0x1900   :  { %5249 = vmatpush3.bf16.msra.mxu0 %v5525_v4 }
0x1901   :  { %5250 = vmatprep.subr.bf16.mxu0 %v5526_v5 }
0x1904   :  { %5251 = vmatpush3.bf16.msra.mxu0 %v5526_v5 }
0x1905   :  { %5252 = vmatprep.subr.bf16.mxu0 %v5527_v7 }
0x1908   :  { %5253 = vmatpush3.bf16.msra.mxu0 %v5527_v7 }
0x1909   :  { %5254 = vmatprep.subr.bf16.mxu0 %v5528_v11 }
0x190c   :  { %5255 = vmatpush3.bf16.msra.mxu0 %v5528_v11 }
0x19b7   :  { %v5226_v29 = vpop.f32.mrf.mxu0 }
0x19b8   :  { %v3775_v32 = vadd.f32 %v5226_v29, %v4735_v27 }
0x19b9   :  { %v3766_v30 = vpop.f32.mrf.mxu0 }
0x19ba   :  { %v3767_v34 = vadd.f32 %v4735_v27, %v3766_v30  ;;  %v3787_v35 = vmul.f32 0.2, %v3775_v32  ;;  %vm3783_vm2 = vcmp.ge.f32.partialorder %v3775_v32, 0.0 }
0x19bb   :  { %v5227_v39 = vpop.f32.mrf.mxu0 }
0x19bc   :  { %v3778_v31 = vadd.f32 %v5227_v39, %v4735_v27  ;;  %v3785_v38 = vmul.f32 0.2, %v3767_v34  ;;  %vm3781_vm5 = vcmp.ge.f32.partialorder %v3767_v34, 0.0  ;;  %v3791_v45 = vsel %vm3783_vm2, %v3775_v32, %v3787_v35 }
0x19bd   :  { %v3769_v37 = vpop.f32.mrf.mxu0 }
0x19be   :  { %vm3784_vm4 = vcmp.ge.f32.partialorder %v3778_v31, 0.0  ;;  %v3788_v40 = vmul.f32 0.2, %v3778_v31  ;;  %v3770_v42 = vadd.f32 %v4735_v27, %v3769_v37  ;;  %v3789_v48 = vsel %vm3781_vm5, %v3767_v34, %v3785_v38 }
0x19c0   :  { %vm3782_vm14 = vcmp.ge.f32.partialorder %v3770_v42, 0.0  ;;  %v3786_v43 = vmul.f32 0.2, %v3770_v42  ;;  %v3792_v46 = vsel %vm3784_vm4, %v3778_v31, %v3788_v40 }
0x19c1   :  { %v3794_v47 = vpack.c.bf16 %v3792_v46, %v3791_v45  ;;  %v5530_v45 = vld [vmem:[#allocation2 + $0x698] sm:$0xff]   ;;  %v5531_v46 = vld [vmem:[#allocation2 + $0x690] sm:$0xff]  }
0x19c2   :  { %v3790_v49 = vsel %vm3782_vm14, %v3770_v42, %v3786_v43  ;;  %v5529_v43 = vld [vmem:[#allocation2 + $0x6a0] sm:$0xff]  }
0x19c3   :  { %3809 = vrot.lane.b32.xlu1 %v3794_v47, %s5570_s30  ;;  %v3793_v50 = vpack.c.bf16 %v3790_v49, %v3789_v48  ;;  %v3803_v51 = vrot.slane %v3794_v47, 1  ;;  %v3798_v54 = vrot.slane %v3794_v47, 7  ;;  %5260 = vmatprep.subr.bf16.mxu1 %v5529_v43  ;;  %v5532_v47 = vld [vmem:[#allocation2 + $0x688] sm:$0xff]   ;;  %v4753_v48 = vld [vmem:[%s6127_s2 + $0x10] ss:$0 sm:$0xff]  ;;  %v5533_v49 = vld [vmem:[#allocation2 + $0x680] sm:$0xff]  }
0x19c5   :  { %3807 = vrot.lane.b32.xlu0 %v3793_v50, %s5570_s30  ;;  %v3806_v57 = vsel %vm72_vm0, %v3803_v51, 0  ;;  %v3802_v52 = vrot.slane %v3793_v50, 1  ;;  %v3797_v53 = vrot.slane %v3793_v50, 7 }
0x19c7   :  { %3814 = vrot.lane.b32.xlu1 %v3806_v57, %s5567_s18  ;;  %v3804_v55 = vsel %vm72_vm0, %v3802_v52, %v3803_v51  ;;  %v3799_v56 = vsel %vm60_vm1, %v3797_v53, %v3798_v54  ;;  %v3801_v60 = vsel %vm60_vm1, 0, %v3797_v53  ;;  %v5534_v52 = vld [vmem:[#allocation2 + $0x678] sm:$0xff]  }
0x19c9   :  { %3812 = vrot.lane.b32.xlu0 %v3804_v55, %s5567_s18 }
0x1a35   :  { %v3810_v58 = vpop.permute.xlu1 %3809 }
0x1a36   :  { %v3820_v63 = vsel %vm112_vm3, %v3799_v56, %v3810_v58 }
0x1a37   :  { %v3808_v59 = vpop.permute.xlu0 %3807 }
0x1a38   :  { %v3817_v61 = vsel %vm112_vm3, %v3801_v60, %v3808_v59 }
0x1a39   :  { %v3815_v36 = vpop.permute.xlu1 %3814 }
0x1a3a   :  { %v3824_v1 = vsel %vm311_vm15, %v3820_v63, %v3815_v36 }
0x1a3b   :  { %v3813_v62 = vpop.permute.xlu0 %3812 }
0x1a3c   :  { %v3822_v0 = vsel %vm311_vm15, %v3817_v61, %v3813_v62 }
0x1a3d   :  { %5240 = vmatprep.mubr.msk.bf16.mxu1 %vm2592_vm6, %v3822_v0 }
0x1a3e   :  { %5241 = vmatmul.mubr.msk.bf16.vlgmr.msra.gmra.mxu1 %vm2592_vm6, %v3824_v1 }
0x1a3f   :  { %5261 = vmatpush3.bf16.msra.mxu1 %v5529_v43 }
0x1a40   :  { %5262 = vmatprep.subr.bf16.mxu1 %v5530_v45 }
0x1a43   :  { %5263 = vmatpush3.bf16.msra.mxu1 %v5530_v45 }
0x1a44   :  { %5264 = vmatprep.subr.bf16.mxu1 %v5531_v46 }
0x1a47   :  { %5265 = vmatpush3.bf16.msra.mxu1 %v5531_v46 }
0x1a48   :  { %5266 = vmatprep.subr.bf16.mxu1 %v5532_v47 }
0x1a4b   :  { %5267 = vmatpush3.bf16.msra.mxu1 %v5532_v47 }
0x1a4c   :  { %5268 = vmatprep.subr.bf16.mxu1 %v5533_v49 }
0x1a4f   :  { %5269 = vmatpush3.bf16.msra.mxu1 %v5533_v49 }
0x1a50   :  { %5270 = vmatprep.subr.bf16.mxu1 %v5534_v52 }
0x1a53   :  { %5271 = vmatpush3.bf16.msra.mxu1 %v5534_v52 }
0x1afe   :  { %v5242_v8 = vpop.f32.mrf.mxu1 }
0x1aff   :  { %v3925_v9 = vadd.f32 %v5242_v8, %v4744_v6 }
0x1b00   :  { %v3916_v10 = vpop.f32.mrf.mxu1 }
0x1b01   :  { %v3917_v41 = vadd.f32 %v4744_v6, %v3916_v10  ;;  %v3937_v13 = vmul.f32 0.2, %v3925_v9  ;;  %vm3933_vm13 = vcmp.ge.f32.partialorder %v3925_v9, 0.0 }
0x1b02   :  { %v5243_v12 = vpop.f32.mrf.mxu1 }
0x1b03   :  { %v3928_v44 = vadd.f32 %v5243_v12, %v4744_v6  ;;  %v3935_v15 = vmul.f32 0.2, %v3917_v41  ;;  %vm3931_vm11 = vcmp.ge.f32.partialorder %v3917_v41, 0.0  ;;  %v3941_v19 = vsel %vm3933_vm13, %v3925_v9, %v3937_v13 }
0x1b04   :  { %v3919_v14 = vpop.f32.mrf.mxu1 }
0x1b05   :  { %vm3934_vm9 = vcmp.ge.f32.partialorder %v3928_v44, 0.0  ;;  %v3938_v16 = vmul.f32 0.2, %v3928_v44  ;;  %v3920_v17 = vadd.f32 %v4744_v6, %v3919_v14  ;;  %v3939_v22 = vsel %vm3931_vm11, %v3917_v41, %v3935_v15 }
0x1b07   :  { %vm3932_vm12 = vcmp.ge.f32.partialorder %v3920_v17, 0.0  ;;  %v3936_v18 = vmul.f32 0.2, %v3920_v17  ;;  %v3942_v20 = vsel %vm3934_vm9, %v3928_v44, %v3938_v16 }
0x1b08   :  { %v3944_v21 = vpack.c.bf16 %v3942_v20, %v3941_v19  ;;  %v5536_v19 = vld [vmem:[#allocation2 + $0x6c8] sm:$0xff]   ;;  %v5537_v20 = vld [vmem:[#allocation2 + $0x6c0] sm:$0xff]  }
0x1b09   :  { %v3940_v23 = vsel %vm3932_vm12, %v3920_v17, %v3936_v18  ;;  %v5535_v18 = vld [vmem:[#allocation2 + $0x6d0] sm:$0xff]  }
0x1b0a   :  { %3959 = vrot.lane.b32.xlu1 %v3944_v21, %s5570_s30  ;;  %v3943_v24 = vpack.c.bf16 %v3940_v23, %v3939_v22  ;;  %v3953_v25 = vrot.slane %v3944_v21, 1  ;;  %v3948_v29 = vrot.slane %v3944_v21, 7  ;;  %5276 = vmatprep.subr.bf16.mxu0 %v5535_v18  ;;  %v5538_v21 = vld [vmem:[#allocation2 + $0x6b8] sm:$0xff]   ;;  %v4762_v22 = vld [vmem:[%s6127_s2 + $0x11] ss:$0 sm:$0xff] }
0x1b0b   :  { %v5539_v23 = vld [vmem:[#allocation2 + $0x6b0] sm:$0xff]  }
0x1b0c   :  { %3957 = vrot.lane.b32.xlu0 %v3943_v24, %s5570_s30  ;;  %v3956_v26 = vsel %vm72_vm0, %v3953_v25, 0  ;;  %v3952_v27 = vrot.slane %v3943_v24, 1  ;;  %v3947_v28 = vrot.slane %v3943_v24, 7 }
0x1b0e   :  { %3964 = vrot.lane.b32.xlu1 %v3956_v26, %s5567_s18  ;;  %v3954_v32 = vsel %vm72_vm0, %v3952_v27, %v3953_v25  ;;  %v3949_v30 = vsel %vm60_vm1, %v3947_v28, %v3948_v29  ;;  %v3951_v39 = vsel %vm60_vm1, 0, %v3947_v28  ;;  %v5540_v27 = vld [vmem:[#allocation2 + $0x6a8] sm:$0xff]  }
0x1b10   :  { %3962 = vrot.lane.b32.xlu0 %v3954_v32, %s5567_s18 }
0x1b7c   :  { %v3960_v33 = vpop.permute.xlu1 %3959 }
0x1b7d   :  { %v3970_v38 = vsel %vm112_vm3, %v3949_v30, %v3960_v33 }
0x1b7e   :  { %v3958_v34 = vpop.permute.xlu0 %3957 }
0x1b7f   :  { %v3967_v31 = vsel %vm112_vm3, %v3951_v39, %v3958_v34 }
0x1b80   :  { %v3965_v35 = vpop.permute.xlu1 %3964 }
0x1b81   :  { %v3974_v42 = vsel %vm311_vm15, %v3970_v38, %v3965_v35 }
0x1b82   :  { %v3963_v37 = vpop.permute.xlu0 %3962 }
0x1b83   :  { %v3972_v40 = vsel %vm311_vm15, %v3967_v31, %v3963_v37 }
0x1b84   :  { %5256 = vmatprep.mubr.msk.bf16.mxu0 %vm2592_vm6, %v3972_v40 }
0x1b85   :  { %5257 = vmatmul.mubr.msk.bf16.vlgmr.msra.gmra.mxu0 %vm2592_vm6, %v3974_v42 }
0x1b86   :  { %5277 = vmatpush3.bf16.msra.mxu0 %v5535_v18 }
0x1b87   :  { %5278 = vmatprep.subr.bf16.mxu0 %v5536_v19 }
0x1b8a   :  { %5279 = vmatpush3.bf16.msra.mxu0 %v5536_v19 }
0x1b8b   :  { %5280 = vmatprep.subr.bf16.mxu0 %v5537_v20 }
0x1b8e   :  { %5281 = vmatpush3.bf16.msra.mxu0 %v5537_v20 }
0x1b8f   :  { %5282 = vmatprep.subr.bf16.mxu0 %v5538_v21 }
0x1b92   :  { %5283 = vmatpush3.bf16.msra.mxu0 %v5538_v21 }
0x1b93   :  { %5284 = vmatprep.subr.bf16.mxu0 %v5539_v23 }
0x1b96   :  { %5285 = vmatpush3.bf16.msra.mxu0 %v5539_v23 }
0x1b97   :  { %5286 = vmatprep.subr.bf16.mxu0 %v5540_v27 }
0x1b9a   :  { %5287 = vmatpush3.bf16.msra.mxu0 %v5540_v27 }
0x1c45   :  { %v5258_v50 = vpop.f32.mrf.mxu0 }
0x1c46   :  { %v4075_v51 = vadd.f32 %v5258_v50, %v4753_v48 }
0x1c47   :  { %v4066_v57 = vpop.f32.mrf.mxu0 }
0x1c48   :  { %v4067_v53 = vadd.f32 %v4753_v48, %v4066_v57  ;;  %v4087_v55 = vmul.f32 0.2, %v4075_v51  ;;  %vm4083_vm7 = vcmp.ge.f32.partialorder %v4075_v51, 0.0 }
0x1c49   :  { %v5259_v54 = vpop.f32.mrf.mxu0 }
0x1c4a   :  { %v4078_v56 = vadd.f32 %v5259_v54, %v4753_v48  ;;  %v4085_v59 = vmul.f32 0.2, %v4067_v53  ;;  %vm4081_vm10 = vcmp.ge.f32.partialorder %v4067_v53, 0.0  ;;  %v4091_v62 = vsel %vm4083_vm7, %v4075_v51, %v4087_v55 }
0x1c4b   :  { %v4069_v58 = vpop.f32.mrf.mxu0 }
0x1c4c   :  { %vm4084_vm8 = vcmp.ge.f32.partialorder %v4078_v56, 0.0  ;;  %v4088_v60 = vmul.f32 0.2, %v4078_v56  ;;  %v4070_v36 = vadd.f32 %v4753_v48, %v4069_v58  ;;  %v4089_v1 = vsel %vm4081_vm10, %v4067_v53, %v4085_v59 }
0x1c4e   :  { %vm4082_vm2 = vcmp.ge.f32.partialorder %v4070_v36, 0.0  ;;  %v4086_v61 = vmul.f32 0.2, %v4070_v36  ;;  %v4092_v63 = vsel %vm4084_vm8, %v4078_v56, %v4088_v60 }
0x1c4f   :  { %v4094_v0 = vpack.c.bf16 %v4092_v63, %v4091_v62  ;;  %v5542_v62 = vld [vmem:[#allocation2 + $0x6d8] sm:$0xff]  }
0x1c50   :  { %v4090_v2 = vsel %vm4082_vm2, %v4070_v36, %v4086_v61  ;;  %v5541_v61 = vld [vmem:[#allocation2 + $0x6e0] sm:$0xff]  }
0x1c51   :  { %4109 = vrot.lane.b32.xlu1 %v4094_v0, %s5570_s30  ;;  %v4093_v3 = vpack.c.bf16 %v4090_v2, %v4089_v1  ;;  %v4103_v4 = vrot.slane %v4094_v0, 1  ;;  %v4098_v8 = vrot.slane %v4094_v0, 7  ;;  %5292 = vmatprep.subr.bf16.mxu1 %v5541_v61  ;;  %v4771_v0 = vld [vmem:[%s6127_s2 + $0x12] ss:$0 sm:$0xff] }
0x1c53   :  { %4107 = vrot.lane.b32.xlu0 %v4093_v3, %s5570_s30  ;;  %v4106_v5 = vsel %vm72_vm0, %v4103_v4, 0  ;;  %v4102_v6 = vrot.slane %v4093_v3, 1  ;;  %v4097_v7 = vrot.slane %v4093_v3, 7 }
0x1c55   :  { %4114 = vrot.lane.b32.xlu1 %v4106_v5, %s5567_s18  ;;  %v4104_v9 = vsel %vm72_vm0, %v4102_v6, %v4103_v4  ;;  %v4099_v10 = vsel %vm60_vm1, %v4097_v7, %v4098_v8  ;;  %v4101_v12 = vsel %vm60_vm1, 0, %v4097_v7 }
0x1c57   :  { %4112 = vrot.lane.b32.xlu0 %v4104_v9, %s5567_s18 }
0x1cc3   :  { %v4110_v11 = vpop.permute.xlu1 %4109 }
0x1cc4   :  { %v4120_v15 = vsel %vm112_vm3, %v4099_v10, %v4110_v11 }
0x1cc5   :  { %v4108_v41 = vpop.permute.xlu0 %4107 }
0x1cc6   :  { %v4117_v44 = vsel %vm112_vm3, %v4101_v12, %v4108_v41 }
0x1cc7   :  { %v4115_v13 = vpop.permute.xlu1 %4114 }
0x1cc8   :  { %v4124_v17 = vsel %vm311_vm15, %v4120_v15, %v4115_v13 }
0x1cc9   :  { %v4113_v14 = vpop.permute.xlu0 %4112 }
0x1cca   :  { %v4122_v16 = vsel %vm311_vm15, %v4117_v44, %v4113_v14 }
0x1ccb   :  { %5272 = vmatprep.mubr.msk.bf16.mxu1 %vm2592_vm6, %v4122_v16  ;;  %v4780_v16 = vld [vmem:[%s6127_s2 + $0x13] ss:$0 sm:$0xff] }
0x1ccc   :  { %5273 = vmatmul.mubr.msk.bf16.vlgmr.msra.gmra.mxu1 %vm2592_vm6, %v4124_v17 }
0x1ccd   :  { %5293 = vmatpush3.bf16.msra.mxu1 %v5541_v61 }
0x1cce   :  { %5294 = vmatprep.subr.bf16.mxu1 %v5542_v62 }
0x1cd1   :  { %5295 = vmatpush3.bf16.msra.mxu1 %v5542_v62 }
0x1d8c   :  { %v5274_v24 = vpop.f32.mrf.mxu1 }
0x1d8d   :  { %v4225_v25 = vadd.f32 %v5274_v24, %v4762_v22 }
0x1d8e   :  { %v4216_v26 = vpop.f32.mrf.mxu1 }
0x1d8f   :  { %v4217_v28 = vadd.f32 %v4762_v22, %v4216_v26  ;;  %v4237_v32 = vmul.f32 0.2, %v4225_v25  ;;  %vm4233_vm4 = vcmp.ge.f32.partialorder %v4225_v25, 0.0 }
0x1d90   :  { %v5275_v29 = vpop.f32.mrf.mxu1 }
0x1d91   :  { %v4228_v30 = vadd.f32 %v5275_v29, %v4762_v22  ;;  %v4235_v34 = vmul.f32 0.2, %v4217_v28  ;;  %vm4231_vm14 = vcmp.ge.f32.partialorder %v4217_v28, 0.0  ;;  %v4241_v37 = vsel %vm4233_vm4, %v4225_v25, %v4237_v32 }
0x1d92   :  { %v4219_v33 = vpop.f32.mrf.mxu1 }
0x1d93   :  { %vm4234_vm5 = vcmp.ge.f32.partialorder %v4228_v30, 0.0  ;;  %v4238_v39 = vmul.f32 0.2, %v4228_v30  ;;  %v4220_v35 = vadd.f32 %v4762_v22, %v4219_v33  ;;  %v4239_v42 = vsel %vm4231_vm14, %v4217_v28, %v4235_v34 }
0x1d95   :  { %vm4232_vm13 = vcmp.ge.f32.partialorder %v4220_v35, 0.0  ;;  %v4236_v31 = vmul.f32 0.2, %v4220_v35  ;;  %v4242_v38 = vsel %vm4234_vm5, %v4228_v30, %v4238_v39 }
0x1d96   :  { %v4244_v40 = vpack.c.bf16 %v4242_v38, %v4241_v37 }
0x1d97   :  { %v4240_v43 = vsel %vm4232_vm13, %v4220_v35, %v4236_v31 }
0x1d98   :  { %4259 = vrot.lane.b32.xlu1 %v4244_v40, %s5570_s30  ;;  %v4243_v45 = vpack.c.bf16 %v4240_v43, %v4239_v42  ;;  %v4253_v46 = vrot.slane %v4244_v40, 1  ;;  %v4248_v50 = vrot.slane %v4244_v40, 7 }
0x1d9a   :  { %4257 = vrot.lane.b32.xlu0 %v4243_v45, %s5570_s30  ;;  %v4256_v47 = vsel %vm72_vm0, %v4253_v46, 0  ;;  %v4252_v48 = vrot.slane %v4243_v45, 1  ;;  %v4247_v49 = vrot.slane %v4243_v45, 7 }
0x1d9c   :  { %4264 = vrot.lane.b32.xlu1 %v4256_v47, %s5567_s18  ;;  %v4254_v51 = vsel %vm72_vm0, %v4252_v48, %v4253_v46  ;;  %v4249_v57 = vsel %vm60_vm1, %v4247_v49, %v4248_v50  ;;  %v4251_v54 = vsel %vm60_vm1, 0, %v4247_v49 }
0x1d9e   :  { %4262 = vrot.lane.b32.xlu0 %v4254_v51, %s5567_s18 }
0x1e0a   :  { %v4260_v52 = vpop.permute.xlu1 %4259 }
0x1e0b   :  { %v4270_v59 = vsel %vm112_vm3, %v4249_v57, %v4260_v52 }
0x1e0c   :  { %v4258_v53 = vpop.permute.xlu0 %4257 }
0x1e0d   :  { %v4267_v56 = vsel %vm112_vm3, %v4251_v54, %v4258_v53 }
0x1e0e   :  { %v4265_v55 = vpop.permute.xlu1 %4264 }
0x1e0f   :  { %v4274_v36 = vsel %vm311_vm15, %v4270_v59, %v4265_v55 }
0x1e10   :  { %v4263_v58 = vpop.permute.xlu0 %4262 }
0x1e11   :  { %v4272_v60 = vsel %vm311_vm15, %v4267_v56, %v4263_v58 }
0x1e12   :  { %5288 = vmatprep.mubr.msk.bf16.mxu0 %vm2592_vm6, %v4272_v60 }
0x1e13   :  { %5289 = vmatmul.mubr.msk.bf16.vlgmr.msra.gmra.mxu0 %vm2592_vm6, %v4274_v36 }
0x1ed3   :  { %v5290_v63 = vpop.f32.mrf.mxu0 }
0x1ed4   :  { %v4375_v3 = vadd.f32 %v5290_v63, %v4771_v0 }
0x1ed5   :  { %v4366_v1 = vpop.f32.mrf.mxu0 }
0x1ed6   :  { %v4367_v2 = vadd.f32 %v4771_v0, %v4366_v1  ;;  %v4387_v10 = vmul.f32 0.2, %v4375_v3  ;;  %vm4383_vm15 = vcmp.ge.f32.partialorder %v4375_v3, 0.0 }
0x1ed7   :  { %v5291_v4 = vpop.f32.mrf.mxu0 }
0x1ed8   :  { %v4378_v5 = vadd.f32 %v5291_v4, %v4771_v0  ;;  %v4385_v7 = vmul.f32 0.2, %v4367_v2  ;;  %vm4381_vm1 = vcmp.ge.f32.partialorder %v4367_v2, 0.0  ;;  %v4391_v44 = vsel %vm4383_vm15, %v4375_v3, %v4387_v10 }
0x1ed9   :  { %v4369_v6 = vpop.f32.mrf.mxu0 }
0x1eda   :  { %vm4384_vm0 = vcmp.ge.f32.partialorder %v4378_v5, 0.0  ;;  %v4388_v8 = vmul.f32 0.2, %v4378_v5  ;;  %v4370_v9 = vadd.f32 %v4771_v0, %v4369_v6  ;;  %v4389_v12 = vsel %vm4381_vm1, %v4367_v2, %v4385_v7 }
0x1edc   :  { %vm4382_vm6 = vcmp.ge.f32.partialorder %v4370_v9, 0.0  ;;  %v4386_v11 = vmul.f32 0.2, %v4370_v9  ;;  %v4392_v41 = vsel %vm4384_vm0, %v4378_v5, %v4388_v8 }
0x1edd   :  { %v4394_v15 = vpack.c.bf16 %v4392_v41, %v4391_v44 }
0x1ede   :  { %v4390_v13 = vsel %vm4382_vm6, %v4370_v9, %v4386_v11 }
0x1edf   :  { %v4393_v14 = vpack.c.bf16 %v4390_v13, %v4389_v12 }
0x1ee1   :  { %5296 = vmatprep.mubr.msk.bf16.mxu1 %vm112_vm3, %v4393_v14 }
0x1ee2   :  { %5297 = vmatmul.mubr.msk.bf16.vlgmr.msra.gmra.mxu1 %vm112_vm3, %v4394_v15 }
0x1fa2   :  { %v5298_v17 = vpop.f32.mrf.mxu1 }
0x1fa3   :  { %v4465_v18 = vadd.f32 %v5298_v17, %v4780_v16 }
0x1fa4   :  { %v4456_v19 = vpop.f32.mrf.mxu1 }
0x1fa5   :  { %4473 = vst [vmem:[%s6129_s4 + $0x10] sm:$0xff] %v4465_v18  ;;  %v4457_v20 = vadd.f32 %v4780_v16, %v4456_v19 }
0x1fa6   :  { %v5299_v21 = vpop.f32.mrf.mxu1 }
0x1fa7   :  { %4471 = vst [vmem:[%s6129_s4] sm:$0xff] %v4457_v20  ;;  %v4468_v22 = vadd.f32 %v5299_v21, %v4780_v16 }
0x1fa8   :  { %v4459_v23 = vpop.f32.mrf.mxu1 }
0x1fa9   :  { %4474 = vst [vmem:[%s6129_s4 + $0x18] sm:$0xff] %v4468_v22  ;;  %v4460_v24 = vadd.f32 %v4780_v16, %v4459_v23 }
0x1fab   :  { %4472 = vst [vmem:[%s6129_s4 + $0x8] sm:$0xff] %v4460_v24 }
0x1fac   :  { %4479 = vsyncpa [#allocation3], 1 }

</bundles_post_ra>
